<compile_context>
chip_gen: v7x
topology: tpu7x:2x2x1
jax: 0.10.0
libtpu: 0.0.40
codegen_flags: <defaults>
</compile_context>

<pallas_src>
import jax
import jax.numpy as jnp
from jax.experimental import pallas as pl
from jax.experimental.pallas import tpu as pltpu

BN_EPS = 1e-5
TILE_M = 256                      # rows per grid step (raise to 512-2048 for large inputs)
VMEM_LIMIT = 32 * 1024 * 1024     # explicit scoped-VMEM limit (safe on v5e/v6e/v7x)


def _vmem():
    return pl.BlockSpec(memory_space=pltpu.MemorySpace.VMEM)


def _pick_tile(m, target=TILE_M):
    """Largest multiple-of-8 tile <= target that divides m (else whole m)."""
    if m <= target:
        return m
    for t in range(target, 7, -8):
        if m % t == 0:
            return t
    return m


# ----------------------------------------------------------------------------
# Kernel 1: tiled conv matmul (bf16 MXU, f32 acc) + bias, accumulating the
# per-channel sum / sum-of-squares needed for batch-statistics BN (pass 1).
# ----------------------------------------------------------------------------
def _conv_stats_kernel(p_ref, w_ref, b_ref, y_ref, sum_ref, ssq_ref):
    acc = jnp.dot(p_ref[...], w_ref[...], preferred_element_type=jnp.float32)
    acc = acc + b_ref[...]
    y_ref[...] = acc.astype(y_ref.dtype)

    @pl.when(pl.program_id(0) == 0)
    def _():
        sum_ref[...] = jnp.zeros_like(sum_ref)
        ssq_ref[...] = jnp.zeros_like(ssq_ref)

    sum_ref[...] += jnp.sum(acc, axis=0, keepdims=True)
    ssq_ref[...] += jnp.sum(acc * acc, axis=0, keepdims=True)


def conv_bn_stats(patches, w, b):
    M, K = patches.shape
    OC = w.shape[1]
    tm = _pick_tile(M)
    return pl.pallas_call(
        _conv_stats_kernel,
        out_shape=(jax.ShapeDtypeStruct((M, OC), jnp.bfloat16),   # raw conv+bias
                   jax.ShapeDtypeStruct((1, OC), jnp.float32),    # sum
                   jax.ShapeDtypeStruct((1, OC), jnp.float32)),   # sum of squares
        grid=(M // tm,),
        in_specs=[pl.BlockSpec((tm, K), lambda i: (i, 0)),
                  pl.BlockSpec((K, OC), lambda i: (0, 0)),        # resident weights
                  pl.BlockSpec((1, OC), lambda i: (0, 0))],
        out_specs=(pl.BlockSpec((tm, OC), lambda i: (i, 0)),
                   pl.BlockSpec((1, OC), lambda i: (0, 0)),       # resident accumulators
                   pl.BlockSpec((1, OC), lambda i: (0, 0))),
        compiler_params=pltpu.CompilerParams(
            dimension_semantics=("arbitrary",),
            vmem_limit_bytes=VMEM_LIMIT),
    )(patches, w, b)


def _bn_affine(s, ss, m, gamma, beta):
    """Tiny per-channel (1, OC) math: fold batch stats into scale/shift."""
    mu = s / m
    var = jnp.maximum(ss / m - mu * mu, 0.0)      # E[x^2] - mu^2
    scale = gamma.reshape(1, -1) * jax.lax.rsqrt(var + BN_EPS)
    shift = beta.reshape(1, -1) - mu * scale
    return scale, shift


# ----------------------------------------------------------------------------
# Kernel 2: tiled BN(scale/shift) + ReLU application (pass 2 for conv2).
# ----------------------------------------------------------------------------
def _bn_relu_kernel(y_ref, sc_ref, sh_ref, o_ref):
    y = y_ref[...].astype(jnp.float32) * sc_ref[...] + sh_ref[...]
    o_ref[...] = jnp.maximum(y, 0.0).astype(o_ref.dtype)


def bn_relu(y, scale, shift):
    M, C = y.shape
    tm = _pick_tile(M)
    return pl.pallas_call(
        _bn_relu_kernel,
        out_shape=jax.ShapeDtypeStruct((M, C), jnp.bfloat16),
        grid=(M // tm,),
        in_specs=[pl.BlockSpec((tm, C), lambda i: (i, 0)),
                  pl.BlockSpec((1, C), lambda i: (0, 0)),
                  pl.BlockSpec((1, C), lambda i: (0, 0))],
        out_specs=pl.BlockSpec((tm, C), lambda i: (i, 0)),
        compiler_params=pltpu.CompilerParams(
            dimension_semantics=("parallel",),
            vmem_limit_bytes=VMEM_LIMIT),
    )(y, scale, shift)


# ----------------------------------------------------------------------------
# Kernel 3: fused BN1 + ReLU + 3x3/s2/p1 max pool.
# Inputs are four non-duplicating even/odd row/col phase views of the
# edge-padded raw conv1 output, so all 9 taps are static contiguous slices.
# ----------------------------------------------------------------------------
def _pool_bn_relu_kernel(p00_ref, p01_ref, p10_ref, p11_ref, sc_ref, sh_ref, o_ref):
    PH, PW = o_ref.shape[1], o_ref.shape[2]
    sc = sc_ref[...]
    sh = sh_ref[...]
    phases = [r[...].astype(jnp.float32) * sc + sh
              for r in (p00_ref, p01_ref, p10_ref, p11_ref)]
    mx = None
    for i in range(3):
        for j in range(3):
            ph = phases[(i % 2) * 2 + (j % 2)]
            v = ph[:, i // 2:i // 2 + PH, j // 2:j // 2 + PW, :]
            mx = v if mx is None else jnp.maximum(mx, v)
    o_ref[...] = jnp.maximum(mx, 0.0).astype(o_ref.dtype)


def maxpool_bn_relu(y, scale, shift):
    """y: raw conv1 output (N, H1, W1, C) bf16 -> pooled+BN+ReLU (N, PH, PW, C)."""
    N, H1, W1, C = y.shape
    assert H1 % 2 == 0 and W1 % 2 == 0
    PH = (H1 - 1) // 2 + 1
    PW = (W1 - 1) // 2 + 1
    # Edge replication is exactly equivalent to -inf padding for this 3x3/s2/p1
    # pool and is safe to apply before the per-channel affine.
    yp = jnp.pad(y, ((0, 0), (1, 1), (1, 1), (0, 0)), mode="edge")
    phases = [yp[:, a::2, b::2, :] for a in (0, 1) for b in (0, 1)]
    Rp, Cp = phases[0].shape[1], phases[0].shape[2]          # PH+1, PW+1

    in_specs = [pl.BlockSpec((1, Rp, Cp, C), lambda n: (n, 0, 0, 0))
                for _ in range(4)]
    in_specs += [pl.BlockSpec((1, C), lambda n: (0, 0))] * 2
    return pl.pallas_call(
        _pool_bn_relu_kernel,
        out_shape=jax.ShapeDtypeStruct((N, PH, PW, C), jnp.bfloat16),
        grid=(N,),
        in_specs=in_specs,
        out_specs=pl.BlockSpec((1, PH, PW, C), lambda n: (n, 0, 0, 0)),
        compiler_params=pltpu.CompilerParams(
            dimension_semantics=("parallel",),
            vmem_limit_bytes=VMEM_LIMIT),
    )(*phases, scale, shift)


# ----------------------------------------------------------------------------
# Kernel 4: fused BN3 + ReLU + AdaptiveAvgPool((1,1)) + Linear head.
# Spatial mean is a tiny selection-matrix matmul (no in-kernel reshapes).
# ----------------------------------------------------------------------------
def _head_kernel(y_ref, sc_ref, sh_ref, sel_ref, wf_ref, bf_ref, o_ref):
    y = jnp.maximum(y_ref[...].astype(jnp.float32) * sc_ref[...] + sh_ref[...], 0.0)
    pooled = jnp.dot(sel_ref[...], y, preferred_element_type=jnp.float32)   # (N, C)
    o_ref[...] = jnp.dot(pooled, wf_ref[...],
                         preferred_element_type=jnp.float32) + bf_ref[...]


def head(y_raw, scale, shift, sel, wf, bf):
    N = sel.shape[0]
    D = wf.shape[1]
    return pl.pallas_call(
        _head_kernel,
        out_shape=jax.ShapeDtypeStruct((N, D), jnp.float32),
        in_specs=[_vmem() for _ in range(6)],
        out_specs=_vmem(),
        compiler_params=pltpu.CompilerParams(vmem_limit_bytes=VMEM_LIMIT),
    )(y_raw, scale, shift, sel, wf, bf)


# ------------------------- JAX glue (slicing / reshape only) -------------------------

def im2col(x, kh, kw, stride, pad):
    """x: (N, H, W, C) -> ((N*OH*OW, kh*kw*C), OH, OW).  Dtype preserved (bf16)."""
    N, H, W, C = x.shape
    OH = (H + 2 * pad - kh) // stride + 1
    OW = (W + 2 * pad - kw) // stride + 1
    xp = jnp.pad(x, ((0, 0), (pad, pad), (pad, pad), (0, 0)))
    cols = []
    for i in range(kh):
        for j in range(kw):
            cols.append(xp[:, i:i + (OH - 1) * stride + 1:stride,
                           j:j + (OW - 1) * stride + 1:stride, :])
    patches = jnp.stack(cols, axis=3)                     # (N, OH, OW, kh*kw, C)
    return patches.reshape(N * OH * OW, kh * kw * C), OH, OW


def frame_cnn_forward(x_nchw, params):
    """x_nchw: (N, C, H, W) float32 -> (N, out_dim) float32."""
    x = jnp.transpose(x_nchw, (0, 2, 3, 1)).astype(jnp.bfloat16)   # NCHW -> NHWC, bf16
    N = x.shape[0]

    # ---- conv1 (7x7, s2, p3): Cout zero-padded 64 -> 128 for lane-dense stores ----
    C1P = 128
    p1, OH1, OW1 = im2col(x, 7, 7, 2, 3)
    w1 = jnp.pad(params["w1"].reshape(-1, 64), ((0, 0), (0, C1P - 64))).astype(jnp.bfloat16)
    b1 = jnp.pad(params["b1"], (0, C1P - 64)).reshape(1, C1P)
    g1 = jnp.pad(params["g1"], (0, C1P - 64))       # padded gamma/beta = 0 -> padded
    be1 = jnp.pad(params["beta1"], (0, C1P - 64))   # channels stay exactly 0
    y1, s1, ss1 = conv_bn_stats(p1, w1, b1)
    sc1, sh1 = _bn_affine(s1, ss1, p1.shape[0], g1, be1)

    # ---- fused BN1 + ReLU + maxpool(3x3, s2, p1) ----
    y1 = y1.reshape(N, OH1, OW1, C1P)
    pooled = maxpool_bn_relu(y1, sc1, sh1)                  # (N, PH, PW, 128) bf16

    # ---- conv2 (3x3, s2, p1) + BN2 + ReLU ----
    p2, OH2, OW2 = im2col(pooled[..., :64], 3, 3, 2, 1)     # drop the zero channels
    w2 = params["w2"].reshape(-1, 128).astype(jnp.bfloat16)
    y2r, s2, ss2 = conv_bn_stats(p2, w2, params["b2"].reshape(1, 128))
    sc2, sh2 = _bn_affine(s2, ss2, p2.shape[0], params["g2"], params["beta2"])
    y2 = bn_relu(y2r, sc2, sh2)                             # (M2, 128) bf16

    # ---- conv3 (3x3, s2, p1); BN3+ReLU deferred into the head ----
    p3, OH3, OW3 = im2col(y2.reshape(N, OH2, OW2, 128), 3, 3, 2, 1)
    w3 = params["w3"].reshape(-1, 256).astype(jnp.bfloat16)
    y3r, s3, ss3 = conv_bn_stats(p3, w3, params["b3"].reshape(1, 256))
    sc3, sh3 = _bn_affine(s3, ss3, p3.shape[0], params["g3"], params["beta3"])

    # ---- head: BN3 + ReLU + global average pool + fc, all in one kernel ----
    HW3 = OH3 * OW3
    sel = jnp.repeat(jnp.eye(N, dtype=jnp.float32), HW3, axis=1) / HW3   # (N, N*HW3)
    return head(y3r, sc3, sh3, sel,
                params["wf"].astype(jnp.float32), params["bf"].reshape(1, -1))


# ------------------------- deterministic parameter init -------------------------

def init_params(key, in_channels=3, out_dim=256):
    ks = jax.random.split(key, 20)
    n = lambda k, s, sc: sc * jax.random.normal(k, s, jnp.float32)
    return dict(
        w1=n(ks[0], (7, 7, in_channels, 64), 0.05), b1=n(ks[1], (64,), 0.05),
        g1=1.0 + n(ks[2], (64,), 0.1), beta1=n(ks[3], (64,), 0.1),
        w2=n(ks[4], (3, 3, 64, 128), 0.05), b2=n(ks[5], (128,), 0.05),
        g2=1.0 + n(ks[6], (128,), 0.1), beta2=n(ks[7], (128,), 0.1),
        w3=n(ks[8], (3, 3, 128, 256), 0.05), b3=n(ks[9], (256,), 0.05),
        g3=1.0 + n(ks[10], (256,), 0.1), beta3=n(ks[11], (256,), 0.1),
        wf=n(ks[12], (256, out_dim), 0.05), bf=n(ks[13], (out_dim,), 0.05),
    )


# ------------------------- pure-JAX references for validation -------------------------

def reference_forward(x_nchw, params, mirror_bf16=False):
    """Reference.  mirror_bf16=True applies bf16 rounding at the same points as
    the kernel pipeline (inputs, weights, stored activations) so the comparison
    isolates structural correctness from the dtype policy."""
    dn = ("NHWC", "HWIO", "NHWC")
    f32 = jnp.float32

    def cast(v):
        return v.astype(jnp.bfloat16).astype(f32) if mirror_bf16 else v

    def conv(x, w, b, stride, pad):
        y = jax.lax.conv_general_dilated(
            x.astype(f32), cast(w).astype(f32), (stride, stride),
            [(pad, pad), (pad, pad)], dimension_numbers=dn,
            precision=jax.lax.Precision.HIGHEST)
        return y + b

    def bn_relu_(y, g, beta):
        mu = jnp.mean(y, axis=(0, 1, 2), keepdims=True)
        var = jnp.mean((y - mu) ** 2, axis=(0, 1, 2), keepdims=True)
        yr = cast(y)   # mirrors bf16 storage of the raw conv output
        return jnp.maximum((yr - mu) * jax.lax.rsqrt(var + BN_EPS) * g + beta, 0.0)

    x = cast(jnp.transpose(x_nchw, (0, 2, 3, 1)))
    y = bn_relu_(conv(x, params["w1"], params["b1"], 2, 3), params["g1"], params["beta1"])
    y = jax.lax.reduce_window(y, -jnp.inf, jax.lax.max,
                              (1, 3, 3, 1), (1, 2, 2, 1),
                              [(0, 0), (1, 1), (1, 1), (0, 0)])
    y = cast(y)
    y = cast(bn_relu_(conv(y, params["w2"], params["b2"], 2, 1),
                      params["g2"], params["beta2"]))
    y = bn_relu_(conv(y, params["w3"], params["b3"], 2, 1), params["g3"], params["beta3"])
    pooled = jnp.mean(y, axis=(1, 2))
    return jnp.dot(pooled, params["wf"],
                   precision=jax.lax.Precision.HIGHEST) + params["bf"]


if __name__ == "__main__":
    key = jax.random.PRNGKey(0)
    k_x, k_p = jax.random.split(key)
    N, C, H, W = 2, 3, 32, 32          # small, consistent with the module (NCHW input)
    out_dim = 256
    x = jax.random.normal(k_x, (N, C, H, W), jnp.float32)
    params = init_params(k_p, in_channels=C, out_dim=out_dim)

    out = jax.jit(frame_cnn_forward)(x, params)
    out = jax.block_until_ready(out)
    assert out.shape == (N, out_dim) and out.dtype == jnp.float32

    # Structural check: reference mirroring the bf16 storage/MXU-input policy.
    ref_strict = reference_forward(x, params, mirror_bf16=True)
    err_strict = float(jnp.max(jnp.abs(out - ref_strict)))
    # Sanity bound vs the pure-f32 reference (tolerance accounts for bf16 inputs
    # / bf16-stored activations with f32 accumulation through three conv+BN layers).
    ref_f32 = reference_forward(x, params, mirror_bf16=False)
    err_f32 = float(jnp.max(jnp.abs(out - ref_f32)))

    if err_strict > 3e-2:
        raise SystemExit(f"kernel/bf16-mirrored-reference mismatch: max abs err = {err_strict}")
    if err_f32 > 1e-1:
        raise SystemExit(f"kernel/f32-reference mismatch: max abs err = {err_f32}")

    print("KERNEL_OK")
</pallas_src>

<mosaic_0001>
module attributes {stable_mosaic.version = 11 : i64} {
  func.func @_conv_stats_kernel(%arg0: i32, %arg1: memref<256x147xbf16, #tpu.memory_space<vmem>>, %arg2: memref<147x128xbf16, #tpu.memory_space<vmem>>, %arg3: memref<1x128xf32, #tpu.memory_space<vmem>>, %arg4: memref<256x128xbf16, #tpu.memory_space<vmem>>, %arg5: memref<1x128xf32, #tpu.memory_space<vmem>>, %arg6: memref<1x128xf32, #tpu.memory_space<vmem>>) attributes {dimension_semantics = [#tpu.dimension_semantics<arbitrary>], iteration_bounds = array<i64: 2>, scalar_prefetch = 0 : i64, scratch_operands = 0 : i64, tpu.core_type = #tpu.core_type<tc>, window_params = [{transform_indices = @transform_0, window_bounds = array<i64: 256, 147>}, {pipeline_mode = #tpu.pipeline_mode<synchronous>, transform_indices = @transform_1, window_bounds = array<i64: 147, 128>}, {pipeline_mode = #tpu.pipeline_mode<synchronous>, transform_indices = @transform_2, window_bounds = array<i64: 1, 128>}, {transform_indices = @transform_3, window_bounds = array<i64: 256, 128>}, {pipeline_mode = #tpu.pipeline_mode<synchronous>, transform_indices = @transform_4, window_bounds = array<i64: 1, 128>}, {pipeline_mode = #tpu.pipeline_mode<synchronous>, transform_indices = @transform_5, window_bounds = array<i64: 1, 128>}]} {
    %c0 = arith.constant 0 : index
    %c0_0 = arith.constant 0 : index
    %0 = vector.load %arg1[%c0, %c0_0] : memref<256x147xbf16, #tpu.memory_space<vmem>>, vector<256x147xbf16>
    %c0_1 = arith.constant 0 : index
    %c0_2 = arith.constant 0 : index
    %1 = vector.load %arg2[%c0_1, %c0_2] : memref<147x128xbf16, #tpu.memory_space<vmem>>, vector<147x128xbf16>
    %cst = arith.constant dense<0.000000e+00> : vector<256x128xf32>
    %2 = tpu.matmul %0, %1, %cst {dimension_numbers = #tpu.dot_dimension_numbers<[1], [0], [0], [1], [0, 0, 1, 1], [], []>} : vector<256x147xbf16>, vector<147x128xbf16>, vector<256x128xf32> -> vector<256x128xf32>
    %c0_3 = arith.constant 0 : index
    %c0_4 = arith.constant 0 : index
    %3 = vector.load %arg3[%c0_3, %c0_4] : memref<1x128xf32, #tpu.memory_space<vmem>>, vector<1x128xf32>
    %4 = vector.broadcast %3 : vector<1x128xf32> to vector<256x128xf32>
    %5 = arith.addf %2, %4 : vector<256x128xf32>
    %6 = arith.truncf %5 : vector<256x128xf32> to vector<256x128xbf16>
    %c0_5 = arith.constant 0 : index
    %c0_6 = arith.constant 0 : index
    %7 = vector.load %arg4[%c0_5, %c0_6] : memref<256x128xbf16, #tpu.memory_space<vmem>>, vector<256x128xbf16>
    tpu.vector_store %arg4[%c0_5, %c0_6], %6 {strides = array<i32>} : memref<256x128xbf16, #tpu.memory_space<vmem>>, vector<256x128xbf16>,
    %c0_i32 = arith.constant 0 : i32
    %8 = arith.cmpi eq, %arg0, %c0_i32 : i32
    %9 = arith.extui %8 : i1 to i32
    %c0_i32_7 = arith.constant 0 : i32
    %10 = arith.cmpi ne, %9, %c0_i32_7 : i32
    scf.if %10 {
      %cst_18 = arith.constant 0.000000e+00 : f32
      %22 = vector.broadcast %cst_18 : f32 to vector<1x128xf32>
      %c0_19 = arith.constant 0 : index
      %c0_20 = arith.constant 0 : index
      %23 = vector.load %arg5[%c0_19, %c0_20] : memref<1x128xf32, #tpu.memory_space<vmem>>, vector<1x128xf32>
      tpu.vector_store %arg5[%c0_19, %c0_20], %22 {strides = array<i32>} : memref<1x128xf32, #tpu.memory_space<vmem>>, vector<1x128xf32>,
      %cst_21 = arith.constant 0.000000e+00 : f32
      %24 = vector.broadcast %cst_21 : f32 to vector<1x128xf32>
      %c0_22 = arith.constant 0 : index
      %c0_23 = arith.constant 0 : index
      %25 = vector.load %arg6[%c0_22, %c0_23] : memref<1x128xf32, #tpu.memory_space<vmem>>, vector<1x128xf32>
      tpu.vector_store %arg6[%c0_22, %c0_23], %24 {strides = array<i32>} : memref<1x128xf32, #tpu.memory_space<vmem>>, vector<1x128xf32>,
    } else {
    }
    %c0_8 = arith.constant 0 : index
    %c0_9 = arith.constant 0 : index
    %11 = vector.load %arg5[%c0_8, %c0_9] : memref<1x128xf32, #tpu.memory_space<vmem>>, vector<1x128xf32>
    %cst_10 = arith.constant dense<0.000000e+00> : vector<128xf32>
    %12 = vector.multi_reduction <add>, %5, %cst_10 [0] : vector<256x128xf32> to vector<128xf32>
    %13 = vector.shape_cast %12 : vector<128xf32> to vector<1x128xf32>
    %14 = arith.addf %11, %13 : vector<1x128xf32>
    %c0_11 = arith.constant 0 : index
    %c0_12 = arith.constant 0 : index
    %15 = vector.load %arg5[%c0_11, %c0_12] : memref<1x128xf32, #tpu.memory_space<vmem>>, vector<1x128xf32>
    tpu.vector_store %arg5[%c0_11, %c0_12], %14 {strides = array<i32>} : memref<1x128xf32, #tpu.memory_space<vmem>>, vector<1x128xf32>,
    %c0_13 = arith.constant 0 : index
    %c0_14 = arith.constant 0 : index
    %16 = vector.load %arg6[%c0_13, %c0_14] : memref<1x128xf32, #tpu.memory_space<vmem>>, vector<1x128xf32>
    %17 = arith.mulf %5, %5 : vector<256x128xf32>
    %cst_15 = arith.constant dense<0.000000e+00> : vector<128xf32>
    %18 = vector.multi_reduction <add>, %17, %cst_15 [0] : vector<256x128xf32> to vector<128xf32>
    %19 = vector.shape_cast %18 : vector<128xf32> to vector<1x128xf32>
    %20 = arith.addf %16, %19 : vector<1x128xf32>
    %c0_16 = arith.constant 0 : index
    %c0_17 = arith.constant 0 : index
    %21 = vector.load %arg6[%c0_16, %c0_17] : memref<1x128xf32, #tpu.memory_space<vmem>>, vector<1x128xf32>
    tpu.vector_store %arg6[%c0_16, %c0_17], %20 {strides = array<i32>} : memref<1x128xf32, #tpu.memory_space<vmem>>, vector<1x128xf32>,
    return
  }
  func.func @transform_0(%arg0: i32) -> (i32, i32) {
    %c0_i32 = arith.constant 0 : i32
    %c0_i32_0 = arith.constant 0 : i32
    return %arg0, %c0_i32 : i32, i32
  }
  func.func @transform_1(%arg0: i32) -> (i32, i32) {
    %c0_i32 = arith.constant 0 : i32
    %c0_i32_0 = arith.constant 0 : i32
    %c0_i32_1 = arith.constant 0 : i32
    return %c0_i32, %c0_i32_0 : i32, i32
  }
  func.func @transform_2(%arg0: i32) -> (i32, i32) {
    %c0_i32 = arith.constant 0 : i32
    %c0_i32_0 = arith.constant 0 : i32
    %c0_i32_1 = arith.constant 0 : i32
    return %c0_i32, %c0_i32_0 : i32, i32
  }
  func.func @transform_3(%arg0: i32) -> (i32, i32) {
    %c0_i32 = arith.constant 0 : i32
    %c0_i32_0 = arith.constant 0 : i32
    return %arg0, %c0_i32 : i32, i32
  }
  func.func @transform_4(%arg0: i32) -> (i32, i32) {
    %c0_i32 = arith.constant 0 : i32
    %c0_i32_0 = arith.constant 0 : i32
    %c0_i32_1 = arith.constant 0 : i32
    return %c0_i32, %c0_i32_0 : i32, i32
  }
  func.func @transform_5(%arg0: i32) -> (i32, i32) {
    %c0_i32 = arith.constant 0 : i32
    %c0_i32_0 = arith.constant 0 : i32
    %c0_i32_1 = arith.constant 0 : i32
    return %c0_i32, %c0_i32_0 : i32, i32
  }
}

module attributes {stable_mosaic.version = 11 : i64} {
  func.func @_pool_bn_relu_kernel(%arg0: i32, %arg1: memref<1x9x9x128xbf16, #tpu.memory_space<vmem>>, %arg2: memref<1x9x9x128xbf16, #tpu.memory_space<vmem>>, %arg3: memref<1x9x9x128xbf16, #tpu.memory_space<vmem>>, %arg4: memref<1x9x9x128xbf16, #tpu.memory_space<vmem>>, %arg5: memref<1x128xf32, #tpu.memory_space<vmem>>, %arg6: memref<1x128xf32, #tpu.memory_space<vmem>>, %arg7: memref<1x8x8x128xbf16, #tpu.memory_space<vmem>>) attributes {dimension_semantics = [#tpu.dimension_semantics<parallel>], iteration_bounds = array<i64: 2>, scalar_prefetch = 0 : i64, scratch_operands = 0 : i64, tpu.core_type = #tpu.core_type<tc>, window_params = [{transform_indices = @transform_0, window_bounds = array<i64: 1, 9, 9, 128>}, {transform_indices = @transform_1, window_bounds = array<i64: 1, 9, 9, 128>}, {transform_indices = @transform_2, window_bounds = array<i64: 1, 9, 9, 128>}, {transform_indices = @transform_3, window_bounds = array<i64: 1, 9, 9, 128>}, {pipeline_mode = #tpu.pipeline_mode<synchronous>, transform_indices = @transform_4, window_bounds = array<i64: 1, 128>}, {pipeline_mode = #tpu.pipeline_mode<synchronous>, transform_indices = @transform_5, window_bounds = array<i64: 1, 128>}, {transform_indices = @transform_6, window_bounds = array<i64: 1, 8, 8, 128>}]} {
    %c0 = arith.constant 0 : index
    %c0_0 = arith.constant 0 : index
    %0 = vector.load %arg5[%c0, %c0_0] : memref<1x128xf32, #tpu.memory_space<vmem>>, vector<1x128xf32>
    %c0_1 = arith.constant 0 : index
    %c0_2 = arith.constant 0 : index
    %1 = vector.load %arg6[%c0_1, %c0_2] : memref<1x128xf32, #tpu.memory_space<vmem>>, vector<1x128xf32>
    %c0_3 = arith.constant 0 : index
    %c0_4 = arith.constant 0 : index
    %c0_5 = arith.constant 0 : index
    %c0_6 = arith.constant 0 : index
    %2 = vector.load %arg1[%c0_3, %c0_4, %c0_5, %c0_6] : memref<1x9x9x128xbf16, #tpu.memory_space<vmem>>, vector<1x9x9x128xbf16>
    %3 = arith.extf %2 : vector<1x9x9x128xbf16> to vector<1x9x9x128xf32>
    %4 = vector.shape_cast %0 : vector<1x128xf32> to vector<1x1x1x128xf32>
    %5 = vector.broadcast %4 : vector<1x1x1x128xf32> to vector<1x9x9x128xf32>
    %6 = arith.mulf %3, %5 : vector<1x9x9x128xf32>
    %7 = vector.shape_cast %1 : vector<1x128xf32> to vector<1x1x1x128xf32>
    %8 = vector.broadcast %7 : vector<1x1x1x128xf32> to vector<1x9x9x128xf32>
    %9 = arith.addf %6, %8 : vector<1x9x9x128xf32>
    %c0_7 = arith.constant 0 : index
    %c0_8 = arith.constant 0 : index
    %c0_9 = arith.constant 0 : index
    %c0_10 = arith.constant 0 : index
    %10 = vector.load %arg2[%c0_7, %c0_8, %c0_9, %c0_10] : memref<1x9x9x128xbf16, #tpu.memory_space<vmem>>, vector<1x9x9x128xbf16>
    %11 = arith.extf %10 : vector<1x9x9x128xbf16> to vector<1x9x9x128xf32>
    %12 = vector.shape_cast %0 : vector<1x128xf32> to vector<1x1x1x128xf32>
    %13 = vector.broadcast %12 : vector<1x1x1x128xf32> to vector<1x9x9x128xf32>
    %14 = arith.mulf %11, %13 : vector<1x9x9x128xf32>
    %15 = vector.shape_cast %1 : vector<1x128xf32> to vector<1x1x1x128xf32>
    %16 = vector.broadcast %15 : vector<1x1x1x128xf32> to vector<1x9x9x128xf32>
    %17 = arith.addf %14, %16 : vector<1x9x9x128xf32>
    %c0_11 = arith.constant 0 : index
    %c0_12 = arith.constant 0 : index
    %c0_13 = arith.constant 0 : index
    %c0_14 = arith.constant 0 : index
    %18 = vector.load %arg3[%c0_11, %c0_12, %c0_13, %c0_14] : memref<1x9x9x128xbf16, #tpu.memory_space<vmem>>, vector<1x9x9x128xbf16>
    %19 = arith.extf %18 : vector<1x9x9x128xbf16> to vector<1x9x9x128xf32>
    %20 = vector.shape_cast %0 : vector<1x128xf32> to vector<1x1x1x128xf32>
    %21 = vector.broadcast %20 : vector<1x1x1x128xf32> to vector<1x9x9x128xf32>
    %22 = arith.mulf %19, %21 : vector<1x9x9x128xf32>
    %23 = vector.shape_cast %1 : vector<1x128xf32> to vector<1x1x1x128xf32>
    %24 = vector.broadcast %23 : vector<1x1x1x128xf32> to vector<1x9x9x128xf32>
    %25 = arith.addf %22, %24 : vector<1x9x9x128xf32>
    %c0_15 = arith.constant 0 : index
    %c0_16 = arith.constant 0 : index
    %c0_17 = arith.constant 0 : index
    %c0_18 = arith.constant 0 : index
    %26 = vector.load %arg4[%c0_15, %c0_16, %c0_17, %c0_18] : memref<1x9x9x128xbf16, #tpu.memory_space<vmem>>, vector<1x9x9x128xbf16>
    %27 = arith.extf %26 : vector<1x9x9x128xbf16> to vector<1x9x9x128xf32>
    %28 = vector.shape_cast %0 : vector<1x128xf32> to vector<1x1x1x128xf32>
    %29 = vector.broadcast %28 : vector<1x1x1x128xf32> to vector<1x9x9x128xf32>
    %30 = arith.mulf %27, %29 : vector<1x9x9x128xf32>
    %31 = vector.shape_cast %1 : vector<1x128xf32> to vector<1x1x1x128xf32>
    %32 = vector.broadcast %31 : vector<1x1x1x128xf32> to vector<1x9x9x128xf32>
    %33 = arith.addf %30, %32 : vector<1x9x9x128xf32>
    %34 = vector.extract_strided_slice %9 {offsets = [0, 0, 0, 0], sizes = [1, 8, 8, 128], strides = [1, 1, 1, 1]} : vector<1x9x9x128xf32> to vector<1x8x8x128xf32>
    %35 = vector.extract_strided_slice %17 {offsets = [0, 0, 0, 0], sizes = [1, 8, 8, 128], strides = [1, 1, 1, 1]} : vector<1x9x9x128xf32> to vector<1x8x8x128xf32>
    %36 = arith.maximumf %34, %35 : vector<1x8x8x128xf32>
    %37 = vector.extract_strided_slice %9 {offsets = [0, 0, 1, 0], sizes = [1, 8, 8, 128], strides = [1, 1, 1, 1]} : vector<1x9x9x128xf32> to vector<1x8x8x128xf32>
    %38 = arith.maximumf %36, %37 : vector<1x8x8x128xf32>
    %39 = vector.extract_strided_slice %25 {offsets = [0, 0, 0, 0], sizes = [1, 8, 8, 128], strides = [1, 1, 1, 1]} : vector<1x9x9x128xf32> to vector<1x8x8x128xf32>
    %40 = arith.maximumf %38, %39 : vector<1x8x8x128xf32>
    %41 = vector.extract_strided_slice %33 {offsets = [0, 0, 0, 0], sizes = [1, 8, 8, 128], strides = [1, 1, 1, 1]} : vector<1x9x9x128xf32> to vector<1x8x8x128xf32>
    %42 = arith.maximumf %40, %41 : vector<1x8x8x128xf32>
    %43 = vector.extract_strided_slice %25 {offsets = [0, 0, 1, 0], sizes = [1, 8, 8, 128], strides = [1, 1, 1, 1]} : vector<1x9x9x128xf32> to vector<1x8x8x128xf32>
    %44 = arith.maximumf %42, %43 : vector<1x8x8x128xf32>
    %45 = vector.extract_strided_slice %9 {offsets = [0, 1, 0, 0], sizes = [1, 8, 8, 128], strides = [1, 1, 1, 1]} : vector<1x9x9x128xf32> to vector<1x8x8x128xf32>
    %46 = arith.maximumf %44, %45 : vector<1x8x8x128xf32>
    %47 = vector.extract_strided_slice %17 {offsets = [0, 1, 0, 0], sizes = [1, 8, 8, 128], strides = [1, 1, 1, 1]} : vector<1x9x9x128xf32> to vector<1x8x8x128xf32>
    %48 = arith.maximumf %46, %47 : vector<1x8x8x128xf32>
    %49 = vector.extract_strided_slice %9 {offsets = [0, 1, 1, 0], sizes = [1, 8, 8, 128], strides = [1, 1, 1, 1]} : vector<1x9x9x128xf32> to vector<1x8x8x128xf32>
    %50 = arith.maximumf %48, %49 : vector<1x8x8x128xf32>
    %cst = arith.constant 0.000000e+00 : f32
    %51 = vector.broadcast %cst : f32 to vector<1x8x8x128xf32>
    %52 = arith.maximumf %50, %51 : vector<1x8x8x128xf32>
    %53 = arith.truncf %52 : vector<1x8x8x128xf32> to vector<1x8x8x128xbf16>
    %c0_19 = arith.constant 0 : index
    %c0_20 = arith.constant 0 : index
    %c0_21 = arith.constant 0 : index
    %c0_22 = arith.constant 0 : index
    %54 = vector.load %arg7[%c0_19, %c0_20, %c0_21, %c0_22] : memref<1x8x8x128xbf16, #tpu.memory_space<vmem>>, vector<1x8x8x128xbf16>
    tpu.vector_store %arg7[%c0_19, %c0_20, %c0_21, %c0_22], %53 {strides = array<i32>} : memref<1x8x8x128xbf16, #tpu.memory_space<vmem>>, vector<1x8x8x128xbf16>,
    return
  }
  func.func @transform_0(%arg0: i32) -> (i32, i32, i32, i32) {
    %c0_i32 = arith.constant 0 : i32
    %c0_i32_0 = arith.constant 0 : i32
    %c0_i32_1 = arith.constant 0 : i32
    %c0_i32_2 = arith.constant 0 : i32
    return %arg0, %c0_i32, %c0_i32_0, %c0_i32_1 : i32, i32, i32, i32
  }
  func.func @transform_1(%arg0: i32) -> (i32, i32, i32, i32) {
    %c0_i32 = arith.constant 0 : i32
    %c0_i32_0 = arith.constant 0 : i32
    %c0_i32_1 = arith.constant 0 : i32
    %c0_i32_2 = arith.constant 0 : i32
    return %arg0, %c0_i32, %c0_i32_0, %c0_i32_1 : i32, i32, i32, i32
  }
  func.func @transform_2(%arg0: i32) -> (i32, i32, i32, i32) {
    %c0_i32 = arith.constant 0 : i32
    %c0_i32_0 = arith.constant 0 : i32
    %c0_i32_1 = arith.constant 0 : i32
    %c0_i32_2 = arith.constant 0 : i32
    return %arg0, %c0_i32, %c0_i32_0, %c0_i32_1 : i32, i32, i32, i32
  }
  func.func @transform_3(%arg0: i32) -> (i32, i32, i32, i32) {
    %c0_i32 = arith.constant 0 : i32
    %c0_i32_0 = arith.constant 0 : i32
    %c0_i32_1 = arith.constant 0 : i32
    %c0_i32_2 = arith.constant 0 : i32
    return %arg0, %c0_i32, %c0_i32_0, %c0_i32_1 : i32, i32, i32, i32
  }
  func.func @transform_4(%arg0: i32) -> (i32, i32) {
    %c0_i32 = arith.constant 0 : i32
    %c0_i32_0 = arith.constant 0 : i32
    %c0_i32_1 = arith.constant 0 : i32
    return %c0_i32, %c0_i32_0 : i32, i32
  }
  func.func @transform_5(%arg0: i32) -> (i32, i32) {
    %c0_i32 = arith.constant 0 : i32
    %c0_i32_0 = arith.constant 0 : i32
    %c0_i32_1 = arith.constant 0 : i32
    return %c0_i32, %c0_i32_0 : i32, i32
  }
  func.func @transform_6(%arg0: i32) -> (i32, i32, i32, i32) {
    %c0_i32 = arith.constant 0 : i32
    %c0_i32_0 = arith.constant 0 : i32
    %c0_i32_1 = arith.constant 0 : i32
    %c0_i32_2 = arith.constant 0 : i32
    return %arg0, %c0_i32, %c0_i32_0, %c0_i32_1 : i32, i32, i32, i32
  }
}

module attributes {stable_mosaic.version = 11 : i64} {
  func.func @_conv_stats_kernel(%arg0: i32, %arg1: memref<32x576xbf16, #tpu.memory_space<vmem>>, %arg2: memref<576x128xbf16, #tpu.memory_space<vmem>>, %arg3: memref<1x128xf32, #tpu.memory_space<vmem>>, %arg4: memref<32x128xbf16, #tpu.memory_space<vmem>>, %arg5: memref<1x128xf32, #tpu.memory_space<vmem>>, %arg6: memref<1x128xf32, #tpu.memory_space<vmem>>) attributes {dimension_semantics = [#tpu.dimension_semantics<arbitrary>], iteration_bounds = array<i64: 1>, scalar_prefetch = 0 : i64, scratch_operands = 0 : i64, tpu.core_type = #tpu.core_type<tc>, window_params = [{transform_indices = @transform_0, window_bounds = array<i64: 32, 576>}, {pipeline_mode = #tpu.pipeline_mode<synchronous>, transform_indices = @transform_1, window_bounds = array<i64: 576, 128>}, {pipeline_mode = #tpu.pipeline_mode<synchronous>, transform_indices = @transform_2, window_bounds = array<i64: 1, 128>}, {transform_indices = @transform_3, window_bounds = array<i64: 32, 128>}, {pipeline_mode = #tpu.pipeline_mode<synchronous>, transform_indices = @transform_4, window_bounds = array<i64: 1, 128>}, {pipeline_mode = #tpu.pipeline_mode<synchronous>, transform_indices = @transform_5, window_bounds = array<i64: 1, 128>}]} {
    %c0 = arith.constant 0 : index
    %c0_0 = arith.constant 0 : index
    %0 = vector.load %arg1[%c0, %c0_0] : memref<32x576xbf16, #tpu.memory_space<vmem>>, vector<32x576xbf16>
    %c0_1 = arith.constant 0 : index
    %c0_2 = arith.constant 0 : index
    %1 = vector.load %arg2[%c0_1, %c0_2] : memref<576x128xbf16, #tpu.memory_space<vmem>>, vector<576x128xbf16>
    %cst = arith.constant dense<0.000000e+00> : vector<32x128xf32>
    %2 = tpu.matmul %0, %1, %cst {dimension_numbers = #tpu.dot_dimension_numbers<[1], [0], [0], [1], [0, 0, 1, 1], [], []>} : vector<32x576xbf16>, vector<576x128xbf16>, vector<32x128xf32> -> vector<32x128xf32>
    %c0_3 = arith.constant 0 : index
    %c0_4 = arith.constant 0 : index
    %3 = vector.load %arg3[%c0_3, %c0_4] : memref<1x128xf32, #tpu.memory_space<vmem>>, vector<1x128xf32>
    %4 = vector.broadcast %3 : vector<1x128xf32> to vector<32x128xf32>
    %5 = arith.addf %2, %4 : vector<32x128xf32>
    %6 = arith.truncf %5 : vector<32x128xf32> to vector<32x128xbf16>
    %c0_5 = arith.constant 0 : index
    %c0_6 = arith.constant 0 : index
    %7 = vector.load %arg4[%c0_5, %c0_6] : memref<32x128xbf16, #tpu.memory_space<vmem>>, vector<32x128xbf16>
    tpu.vector_store %arg4[%c0_5, %c0_6], %6 {strides = array<i32>} : memref<32x128xbf16, #tpu.memory_space<vmem>>, vector<32x128xbf16>,
    %c0_i32 = arith.constant 0 : i32
    %8 = arith.cmpi eq, %arg0, %c0_i32 : i32
    %9 = arith.extui %8 : i1 to i32
    %c0_i32_7 = arith.constant 0 : i32
    %10 = arith.cmpi ne, %9, %c0_i32_7 : i32
    scf.if %10 {
      %cst_18 = arith.constant 0.000000e+00 : f32
      %22 = vector.broadcast %cst_18 : f32 to vector<1x128xf32>
      %c0_19 = arith.constant 0 : index
      %c0_20 = arith.constant 0 : index
      %23 = vector.load %arg5[%c0_19, %c0_20] : memref<1x128xf32, #tpu.memory_space<vmem>>, vector<1x128xf32>
      tpu.vector_store %arg5[%c0_19, %c0_20], %22 {strides = array<i32>} : memref<1x128xf32, #tpu.memory_space<vmem>>, vector<1x128xf32>,
      %cst_21 = arith.constant 0.000000e+00 : f32
      %24 = vector.broadcast %cst_21 : f32 to vector<1x128xf32>
      %c0_22 = arith.constant 0 : index
      %c0_23 = arith.constant 0 : index
      %25 = vector.load %arg6[%c0_22, %c0_23] : memref<1x128xf32, #tpu.memory_space<vmem>>, vector<1x128xf32>
      tpu.vector_store %arg6[%c0_22, %c0_23], %24 {strides = array<i32>} : memref<1x128xf32, #tpu.memory_space<vmem>>, vector<1x128xf32>,
    } else {
    }
    %c0_8 = arith.constant 0 : index
    %c0_9 = arith.constant 0 : index
    %11 = vector.load %arg5[%c0_8, %c0_9] : memref<1x128xf32, #tpu.memory_space<vmem>>, vector<1x128xf32>
    %cst_10 = arith.constant dense<0.000000e+00> : vector<128xf32>
    %12 = vector.multi_reduction <add>, %5, %cst_10 [0] : vector<32x128xf32> to vector<128xf32>
    %13 = vector.shape_cast %12 : vector<128xf32> to vector<1x128xf32>
    %14 = arith.addf %11, %13 : vector<1x128xf32>
    %c0_11 = arith.constant 0 : index
    %c0_12 = arith.constant 0 : index
    %15 = vector.load %arg5[%c0_11, %c0_12] : memref<1x128xf32, #tpu.memory_space<vmem>>, vector<1x128xf32>
    tpu.vector_store %arg5[%c0_11, %c0_12], %14 {strides = array<i32>} : memref<1x128xf32, #tpu.memory_space<vmem>>, vector<1x128xf32>,
    %c0_13 = arith.constant 0 : index
    %c0_14 = arith.constant 0 : index
    %16 = vector.load %arg6[%c0_13, %c0_14] : memref<1x128xf32, #tpu.memory_space<vmem>>, vector<1x128xf32>
    %17 = arith.mulf %5, %5 : vector<32x128xf32>
    %cst_15 = arith.constant dense<0.000000e+00> : vector<128xf32>
    %18 = vector.multi_reduction <add>, %17, %cst_15 [0] : vector<32x128xf32> to vector<128xf32>
    %19 = vector.shape_cast %18 : vector<128xf32> to vector<1x128xf32>
    %20 = arith.addf %16, %19 : vector<1x128xf32>
    %c0_16 = arith.constant 0 : index
    %c0_17 = arith.constant 0 : index
    %21 = vector.load %arg6[%c0_16, %c0_17] : memref<1x128xf32, #tpu.memory_space<vmem>>, vector<1x128xf32>
    tpu.vector_store %arg6[%c0_16, %c0_17], %20 {strides = array<i32>} : memref<1x128xf32, #tpu.memory_space<vmem>>, vector<1x128xf32>,
    return
  }
  func.func @transform_0(%arg0: i32) -> (i32, i32) {
    %c0_i32 = arith.constant 0 : i32
    %c0_i32_0 = arith.constant 0 : i32
    return %arg0, %c0_i32 : i32, i32
  }
  func.func @transform_1(%arg0: i32) -> (i32, i32) {
    %c0_i32 = arith.constant 0 : i32
    %c0_i32_0 = arith.constant 0 : i32
    %c0_i32_1 = arith.constant 0 : i32
    return %c0_i32, %c0_i32_0 : i32, i32
  }
  func.func @transform_2(%arg0: i32) -> (i32, i32) {
    %c0_i32 = arith.constant 0 : i32
    %c0_i32_0 = arith.constant 0 : i32
    %c0_i32_1 = arith.constant 0 : i32
    return %c0_i32, %c0_i32_0 : i32, i32
  }
  func.func @transform_3(%arg0: i32) -> (i32, i32) {
    %c0_i32 = arith.constant 0 : i32
    %c0_i32_0 = arith.constant 0 : i32
    return %arg0, %c0_i32 : i32, i32
  }
  func.func @transform_4(%arg0: i32) -> (i32, i32) {
    %c0_i32 = arith.constant 0 : i32
    %c0_i32_0 = arith.constant 0 : i32
    %c0_i32_1 = arith.constant 0 : i32
    return %c0_i32, %c0_i32_0 : i32, i32
  }
  func.func @transform_5(%arg0: i32) -> (i32, i32) {
    %c0_i32 = arith.constant 0 : i32
    %c0_i32_0 = arith.constant 0 : i32
    %c0_i32_1 = arith.constant 0 : i32
    return %c0_i32, %c0_i32_0 : i32, i32
  }
}

module attributes {stable_mosaic.version = 11 : i64} {
  func.func @_bn_relu_kernel(%arg0: i32, %arg1: memref<32x128xbf16, #tpu.memory_space<vmem>>, %arg2: memref<1x128xf32, #tpu.memory_space<vmem>>, %arg3: memref<1x128xf32, #tpu.memory_space<vmem>>, %arg4: memref<32x128xbf16, #tpu.memory_space<vmem>>) attributes {dimension_semantics = [#tpu.dimension_semantics<parallel>], iteration_bounds = array<i64: 1>, scalar_prefetch = 0 : i64, scratch_operands = 0 : i64, tpu.core_type = #tpu.core_type<tc>, window_params = [{transform_indices = @transform_0, window_bounds = array<i64: 32, 128>}, {pipeline_mode = #tpu.pipeline_mode<synchronous>, transform_indices = @transform_1, window_bounds = array<i64: 1, 128>}, {pipeline_mode = #tpu.pipeline_mode<synchronous>, transform_indices = @transform_2, window_bounds = array<i64: 1, 128>}, {transform_indices = @transform_3, window_bounds = array<i64: 32, 128>}]} {
    %c0 = arith.constant 0 : index
    %c0_0 = arith.constant 0 : index
    %0 = vector.load %arg1[%c0, %c0_0] : memref<32x128xbf16, #tpu.memory_space<vmem>>, vector<32x128xbf16>
    %1 = arith.extf %0 : vector<32x128xbf16> to vector<32x128xf32>
    %c0_1 = arith.constant 0 : index
    %c0_2 = arith.constant 0 : index
    %2 = vector.load %arg2[%c0_1, %c0_2] : memref<1x128xf32, #tpu.memory_space<vmem>>, vector<1x128xf32>
    %3 = vector.broadcast %2 : vector<1x128xf32> to vector<32x128xf32>
    %4 = arith.mulf %1, %3 : vector<32x128xf32>
    %c0_3 = arith.constant 0 : index
    %c0_4 = arith.constant 0 : index
    %5 = vector.load %arg3[%c0_3, %c0_4] : memref<1x128xf32, #tpu.memory_space<vmem>>, vector<1x128xf32>
    %6 = vector.broadcast %5 : vector<1x128xf32> to vector<32x128xf32>
    %7 = arith.addf %4, %6 : vector<32x128xf32>
    %cst = arith.constant 0.000000e+00 : f32
    %8 = vector.broadcast %cst : f32 to vector<32x128xf32>
    %9 = arith.maximumf %7, %8 : vector<32x128xf32>
    %10 = arith.truncf %9 : vector<32x128xf32> to vector<32x128xbf16>
    %c0_5 = arith.constant 0 : index
    %c0_6 = arith.constant 0 : index
    %11 = vector.load %arg4[%c0_5, %c0_6] : memref<32x128xbf16, #tpu.memory_space<vmem>>, vector<32x128xbf16>
    tpu.vector_store %arg4[%c0_5, %c0_6], %10 {strides = array<i32>} : memref<32x128xbf16, #tpu.memory_space<vmem>>, vector<32x128xbf16>,
    return
  }
  func.func @transform_0(%arg0: i32) -> (i32, i32) {
    %c0_i32 = arith.constant 0 : i32
    %c0_i32_0 = arith.constant 0 : i32
    return %arg0, %c0_i32 : i32, i32
  }
  func.func @transform_1(%arg0: i32) -> (i32, i32) {
    %c0_i32 = arith.constant 0 : i32
    %c0_i32_0 = arith.constant 0 : i32
    %c0_i32_1 = arith.constant 0 : i32
    return %c0_i32, %c0_i32_0 : i32, i32
  }
  func.func @transform_2(%arg0: i32) -> (i32, i32) {
    %c0_i32 = arith.constant 0 : i32
    %c0_i32_0 = arith.constant 0 : i32
    %c0_i32_1 = arith.constant 0 : i32
    return %c0_i32, %c0_i32_0 : i32, i32
  }
  func.func @transform_3(%arg0: i32) -> (i32, i32) {
    %c0_i32 = arith.constant 0 : i32
    %c0_i32_0 = arith.constant 0 : i32
    return %arg0, %c0_i32 : i32, i32
  }
}

module attributes {stable_mosaic.version = 11 : i64} {
  func.func @_conv_stats_kernel(%arg0: i32, %arg1: memref<8x1152xbf16, #tpu.memory_space<vmem>>, %arg2: memref<1152x256xbf16, #tpu.memory_space<vmem>>, %arg3: memref<1x256xf32, #tpu.memory_space<vmem>>, %arg4: memref<8x256xbf16, #tpu.memory_space<vmem>>, %arg5: memref<1x256xf32, #tpu.memory_space<vmem>>, %arg6: memref<1x256xf32, #tpu.memory_space<vmem>>) attributes {dimension_semantics = [#tpu.dimension_semantics<arbitrary>], iteration_bounds = array<i64: 1>, scalar_prefetch = 0 : i64, scratch_operands = 0 : i64, tpu.core_type = #tpu.core_type<tc>, window_params = [{transform_indices = @transform_0, window_bounds = array<i64: 8, 1152>}, {pipeline_mode = #tpu.pipeline_mode<synchronous>, transform_indices = @transform_1, window_bounds = array<i64: 1152, 256>}, {pipeline_mode = #tpu.pipeline_mode<synchronous>, transform_indices = @transform_2, window_bounds = array<i64: 1, 256>}, {transform_indices = @transform_3, window_bounds = array<i64: 8, 256>}, {pipeline_mode = #tpu.pipeline_mode<synchronous>, transform_indices = @transform_4, window_bounds = array<i64: 1, 256>}, {pipeline_mode = #tpu.pipeline_mode<synchronous>, transform_indices = @transform_5, window_bounds = array<i64: 1, 256>}]} {
    %c0 = arith.constant 0 : index
    %c0_0 = arith.constant 0 : index
    %0 = vector.load %arg1[%c0, %c0_0] : memref<8x1152xbf16, #tpu.memory_space<vmem>>, vector<8x1152xbf16>
    %c0_1 = arith.constant 0 : index
    %c0_2 = arith.constant 0 : index
    %1 = vector.load %arg2[%c0_1, %c0_2] : memref<1152x256xbf16, #tpu.memory_space<vmem>>, vector<1152x256xbf16>
    %cst = arith.constant dense<0.000000e+00> : vector<8x256xf32>
    %2 = tpu.matmul %0, %1, %cst {dimension_numbers = #tpu.dot_dimension_numbers<[1], [0], [0], [1], [0, 0, 1, 1], [], []>} : vector<8x1152xbf16>, vector<1152x256xbf16>, vector<8x256xf32> -> vector<8x256xf32>
    %c0_3 = arith.constant 0 : index
    %c0_4 = arith.constant 0 : index
    %3 = vector.load %arg3[%c0_3, %c0_4] : memref<1x256xf32, #tpu.memory_space<vmem>>, vector<1x256xf32>
    %4 = vector.broadcast %3 : vector<1x256xf32> to vector<8x256xf32>
    %5 = arith.addf %2, %4 : vector<8x256xf32>
    %6 = arith.truncf %5 : vector<8x256xf32> to vector<8x256xbf16>
    %c0_5 = arith.constant 0 : index
    %c0_6 = arith.constant 0 : index
    %7 = vector.load %arg4[%c0_5, %c0_6] : memref<8x256xbf16, #tpu.memory_space<vmem>>, vector<8x256xbf16>
    tpu.vector_store %arg4[%c0_5, %c0_6], %6 {strides = array<i32>} : memref<8x256xbf16, #tpu.memory_space<vmem>>, vector<8x256xbf16>,
    %c0_i32 = arith.constant 0 : i32
    %8 = arith.cmpi eq, %arg0, %c0_i32 : i32
    %9 = arith.extui %8 : i1 to i32
    %c0_i32_7 = arith.constant 0 : i32
    %10 = arith.cmpi ne, %9, %c0_i32_7 : i32
    scf.if %10 {
      %cst_18 = arith.constant 0.000000e+00 : f32
      %22 = vector.broadcast %cst_18 : f32 to vector<1x256xf32>
      %c0_19 = arith.constant 0 : index
      %c0_20 = arith.constant 0 : index
      %23 = vector.load %arg5[%c0_19, %c0_20] : memref<1x256xf32, #tpu.memory_space<vmem>>, vector<1x256xf32>
      tpu.vector_store %arg5[%c0_19, %c0_20], %22 {strides = array<i32>} : memref<1x256xf32, #tpu.memory_space<vmem>>, vector<1x256xf32>,
      %cst_21 = arith.constant 0.000000e+00 : f32
      %24 = vector.broadcast %cst_21 : f32 to vector<1x256xf32>
      %c0_22 = arith.constant 0 : index
      %c0_23 = arith.constant 0 : index
      %25 = vector.load %arg6[%c0_22, %c0_23] : memref<1x256xf32, #tpu.memory_space<vmem>>, vector<1x256xf32>
      tpu.vector_store %arg6[%c0_22, %c0_23], %24 {strides = array<i32>} : memref<1x256xf32, #tpu.memory_space<vmem>>, vector<1x256xf32>,
    } else {
    }
    %c0_8 = arith.constant 0 : index
    %c0_9 = arith.constant 0 : index
    %11 = vector.load %arg5[%c0_8, %c0_9] : memref<1x256xf32, #tpu.memory_space<vmem>>, vector<1x256xf32>
    %cst_10 = arith.constant dense<0.000000e+00> : vector<256xf32>
    %12 = vector.multi_reduction <add>, %5, %cst_10 [0] : vector<8x256xf32> to vector<256xf32>
    %13 = vector.shape_cast %12 : vector<256xf32> to vector<1x256xf32>
    %14 = arith.addf %11, %13 : vector<1x256xf32>
    %c0_11 = arith.constant 0 : index
    %c0_12 = arith.constant 0 : index
    %15 = vector.load %arg5[%c0_11, %c0_12] : memref<1x256xf32, #tpu.memory_space<vmem>>, vector<1x256xf32>
    tpu.vector_store %arg5[%c0_11, %c0_12], %14 {strides = array<i32>} : memref<1x256xf32, #tpu.memory_space<vmem>>, vector<1x256xf32>,
    %c0_13 = arith.constant 0 : index
    %c0_14 = arith.constant 0 : index
    %16 = vector.load %arg6[%c0_13, %c0_14] : memref<1x256xf32, #tpu.memory_space<vmem>>, vector<1x256xf32>
    %17 = arith.mulf %5, %5 : vector<8x256xf32>
    %cst_15 = arith.constant dense<0.000000e+00> : vector<256xf32>
    %18 = vector.multi_reduction <add>, %17, %cst_15 [0] : vector<8x256xf32> to vector<256xf32>
    %19 = vector.shape_cast %18 : vector<256xf32> to vector<1x256xf32>
    %20 = arith.addf %16, %19 : vector<1x256xf32>
    %c0_16 = arith.constant 0 : index
    %c0_17 = arith.constant 0 : index
    %21 = vector.load %arg6[%c0_16, %c0_17] : memref<1x256xf32, #tpu.memory_space<vmem>>, vector<1x256xf32>
    tpu.vector_store %arg6[%c0_16, %c0_17], %20 {strides = array<i32>} : memref<1x256xf32, #tpu.memory_space<vmem>>, vector<1x256xf32>,
    return
  }
  func.func @transform_0(%arg0: i32) -> (i32, i32) {
    %c0_i32 = arith.constant 0 : i32
    %c0_i32_0 = arith.constant 0 : i32
    return %arg0, %c0_i32 : i32, i32
  }
  func.func @transform_1(%arg0: i32) -> (i32, i32) {
    %c0_i32 = arith.constant 0 : i32
    %c0_i32_0 = arith.constant 0 : i32
    %c0_i32_1 = arith.constant 0 : i32
    return %c0_i32, %c0_i32_0 : i32, i32
  }
  func.func @transform_2(%arg0: i32) -> (i32, i32) {
    %c0_i32 = arith.constant 0 : i32
    %c0_i32_0 = arith.constant 0 : i32
    %c0_i32_1 = arith.constant 0 : i32
    return %c0_i32, %c0_i32_0 : i32, i32
  }
  func.func @transform_3(%arg0: i32) -> (i32, i32) {
    %c0_i32 = arith.constant 0 : i32
    %c0_i32_0 = arith.constant 0 : i32
    return %arg0, %c0_i32 : i32, i32
  }
  func.func @transform_4(%arg0: i32) -> (i32, i32) {
    %c0_i32 = arith.constant 0 : i32
    %c0_i32_0 = arith.constant 0 : i32
    %c0_i32_1 = arith.constant 0 : i32
    return %c0_i32, %c0_i32_0 : i32, i32
  }
  func.func @transform_5(%arg0: i32) -> (i32, i32) {
    %c0_i32 = arith.constant 0 : i32
    %c0_i32_0 = arith.constant 0 : i32
    %c0_i32_1 = arith.constant 0 : i32
    return %c0_i32, %c0_i32_0 : i32, i32
  }
}

module attributes {stable_mosaic.version = 11 : i64} {
  func.func @_head_kernel(%arg0: memref<8x256xbf16, #tpu.memory_space<vmem>>, %arg1: memref<1x256xf32, #tpu.memory_space<vmem>>, %arg2: memref<1x256xf32, #tpu.memory_space<vmem>>, %arg3: memref<2x8xf32, #tpu.memory_space<vmem>>, %arg4: memref<256x256xf32, #tpu.memory_space<vmem>>, %arg5: memref<1x256xf32, #tpu.memory_space<vmem>>, %arg6: memref<2x256xf32, #tpu.memory_space<vmem>>) attributes {dimension_semantics = [], scalar_prefetch = 0 : i64, scratch_operands = 0 : i64, tpu.core_type = #tpu.core_type<tc>} {
    %c0 = arith.constant 0 : index
    %c0_0 = arith.constant 0 : index
    %0 = vector.load %arg0[%c0, %c0_0] : memref<8x256xbf16, #tpu.memory_space<vmem>>, vector<8x256xbf16>
    %1 = arith.extf %0 : vector<8x256xbf16> to vector<8x256xf32>
    %c0_1 = arith.constant 0 : index
    %c0_2 = arith.constant 0 : index
    %2 = vector.load %arg1[%c0_1, %c0_2] : memref<1x256xf32, #tpu.memory_space<vmem>>, vector<1x256xf32>
    %3 = vector.broadcast %2 : vector<1x256xf32> to vector<8x256xf32>
    %4 = arith.mulf %1, %3 : vector<8x256xf32>
    %c0_3 = arith.constant 0 : index
    %c0_4 = arith.constant 0 : index
    %5 = vector.load %arg2[%c0_3, %c0_4] : memref<1x256xf32, #tpu.memory_space<vmem>>, vector<1x256xf32>
    %6 = vector.broadcast %5 : vector<1x256xf32> to vector<8x256xf32>
    %7 = arith.addf %4, %6 : vector<8x256xf32>
    %cst = arith.constant 0.000000e+00 : f32
    %8 = vector.broadcast %cst : f32 to vector<8x256xf32>
    %9 = arith.maximumf %7, %8 : vector<8x256xf32>
    %c0_5 = arith.constant 0 : index
    %c0_6 = arith.constant 0 : index
    %10 = vector.load %arg3[%c0_5, %c0_6] : memref<2x8xf32, #tpu.memory_space<vmem>>, vector<2x8xf32>
    %cst_7 = arith.constant dense<0.000000e+00> : vector<2x256xf32>
    %11 = tpu.matmul %10, %9, %cst_7 {dimension_numbers = #tpu.dot_dimension_numbers<[1], [0], [0], [1], [0, 0, 1, 1], [], []>} : vector<2x8xf32>, vector<8x256xf32>, vector<2x256xf32> -> vector<2x256xf32>
    %c0_8 = arith.constant 0 : index
    %c0_9 = arith.constant 0 : index
    %12 = vector.load %arg4[%c0_8, %c0_9] : memref<256x256xf32, #tpu.memory_space<vmem>>, vector<256x256xf32>
    %cst_10 = arith.constant dense<0.000000e+00> : vector<2x256xf32>
    %13 = tpu.matmul %11, %12, %cst_10 {dimension_numbers = #tpu.dot_dimension_numbers<[1], [0], [0], [1], [0, 0, 1, 1], [], []>} : vector<2x256xf32>, vector<256x256xf32>, vector<2x256xf32> -> vector<2x256xf32>
    %c0_11 = arith.constant 0 : index
    %c0_12 = arith.constant 0 : index
    %14 = vector.load %arg5[%c0_11, %c0_12] : memref<1x256xf32, #tpu.memory_space<vmem>>, vector<1x256xf32>
    %15 = vector.broadcast %14 : vector<1x256xf32> to vector<2x256xf32>
    %16 = arith.addf %13, %15 : vector<2x256xf32>
    %c0_13 = arith.constant 0 : index
    %c0_14 = arith.constant 0 : index
    %17 = vector.load %arg6[%c0_13, %c0_14] : memref<2x256xf32, #tpu.memory_space<vmem>>, vector<2x256xf32>
    tpu.vector_store %arg6[%c0_13, %c0_14], %16 {strides = array<i32>} : memref<2x256xf32, #tpu.memory_space<vmem>>, vector<2x256xf32>,
    return
  }
}

</mosaic_0001>

<bundles_post_ra>
// kernel: frame_cnn_forward.6
= control target key start
LH: loop header
LB: loop body
LE: loop exit
PB: predicated region body
PF: predicated region fallthrough
CT: control target
= control target key end

     0   :  { %s1411_s18 = smov 0   ;;  %s1769_s0 = inlined_call_operand.vmem [shape: bf16[512,147], index: 0, kind: input, shape index: {}]   ;;  %s1770_s1 = inlined_call_operand.vmem [shape: bf16[147,128], index: 1, kind: input, shape index: {}]   ;;  %s1771_s2 = inlined_call_operand.vmem [shape: f32[1,128], index: 2, kind: input, shape index: {}]   ;;  %s1772_s3 = inlined_call_operand.vmem [shape: bf16[512,128], index: 3, kind: output, shape index: {0}]   ;;  %s1773_s4 = inlined_call_operand.vmem [shape: f32[1,128], index: 4, kind: output, shape index: {1}]   ;;  %s1774_s5 = inlined_call_operand.vmem [shape: f32[1,128], index: 5, kind: output, shape index: {2}]  }
   0x1 LB: > { %s1049_s19 = sadd.s32 4294967295, %s1376_s18   ;;  %p1053_p0 = scmp.ge.s32.totalorder %s1376_s18, 1  ;;  %s1376_s18 = sphi %s1411_s18, %s16_s18  }
   0x2   : > { %p184_p1 = scmp.lt.s32.totalorder %s1376_s18, 3 }
   0x4   : > { %p185_p2 = pnand %p1053_p0, %p184_p1 }
   0x5   : > { %v1312_v0 = vld [vmem:[%s1770_s1] sm:$0xff] (!%p185_p2)   ;;  %v1378_v1 = vmov (!%p185_p2), 0   ;;  %v1313_v2 = vld [vmem:[%s1770_s1 + $0x8] sm:$0xff] (!%p185_p2)   ;;  %v1314_v3 = vld [vmem:[%s1770_s1 + $0x10] sm:$0xff] (!%p185_p2)   ;;  %s1054_s26 = sshll.u32 (!%p185_p2), %s1049_s19, 5  ;;  %vm486_vm0 = vcmask (!%p185_p2), 154624  }
   0x6   : > { %188 = sbr.rel (%p185_p2) target bundleno = 400 (0x190), region = 32  ;;  %542 = vmatprep.subr.bf16.mxu0 (!%p185_p2), %v1378_v1  ;;  %1281 = vmatprep.subr.bf16.mxu1 (!%p185_p2), %v1378_v1  ;;  %p214_p3 = scmp.lt.s32.totalorder (!%p185_p2), %s1054_s26, 63  ;;  %v1315_v4 = vld [vmem:[%s1770_s1 + $0x18] sm:$0xff] (!%p185_p2)   ;;  %v1316_v5 = vld [vmem:[%s1770_s1 + $0x20] sm:$0xff] (!%p185_p2)   ;;  %v1317_v8 = vld [vmem:[%s1770_s1 + $0x28] sm:$0xff] (!%p185_p2)   ;;  %vm535_vm1 = vcmask (!%p185_p2), 1040384  }
   0x7   : > { %543 = vmatpush1.bf16.msra.mxu0 (!%p185_p2), %v1312_v0  ;;  %1291 = vmatpush1.bf16.msra.mxu1 (!%p185_p2), %v1312_v0  ;;  %v1318_v9 = vld [vmem:[%s1770_s1 + $0x30] sm:$0xff] (!%p185_p2)   ;;  %v1319_v10 = vld [vmem:[%s1770_s1 + $0x38] sm:$0xff] (!%p185_p2)   ;;  %vm536_vm2 = vcmask (!%p185_p2), 1041408   ;;  %v1379_v11 = vmov (!%p185_p2), 65535   ;;  %v1320_v13 = vld [vmem:[%s1770_s1 + $0x40] sm:$0xff] (!%p185_p2)   ;;  %p1150_p4 = scmp.ne.s32.totalorder (!%p185_p2), %s1049_s19, 0 }
   0x8   : > { %544 = vmatprep.subr.bf16.mxu0 (!%p185_p2), %v1378_v1  ;;  %1282 = vmatprep.subr.bf16.mxu1 (!%p185_p2), %v1378_v1  ;;  %v537_v12 = vsel (!%p185_p2), %vm535_vm1, 4294967295, %v1379_v11  ;;  %v1321_v14 = vld [vmem:[%s1770_s1 + $0x48] ss:$0 sps:$4 sm:$0x33] (!%p185_p2)   ;;  %v1510_v47 = vld [vmem:[%s1771_s2] ss:$0 sm:$0xff] (!%p185_p2) }
   0x9   : > { %v538_v15 = vsel (!%p185_p2), %vm536_vm2, %v537_v12, 0 }
   0xa   : > { %v540_v16 = vand.u32 (!%p185_p2), %v1321_v14, %v538_v15 }
   0xb   : > { %545 = vmatpush1.bf16.msra.mxu0 (!%p185_p2), %v1313_v2  ;;  %1292 = vmatpush1.bf16.msra.mxu1 (!%p185_p2), %v1313_v2 }
   0xc   : > { %546 = vmatprep.subr.bf16.mxu0 (!%p185_p2), %v1378_v1  ;;  %1283 = vmatprep.subr.bf16.mxu1 (!%p185_p2), %v1378_v1 }
   0xd   : > { %s1776_s26 = smov (!%p214_p3, %s1054_s26), 63 }
   0xe   : > { %s1153_s29 = sshll.u32 %s1776_s26, 3  ;;  %s1058_s24 = sshll.u32 %s1776_s26, 2 }
   0xf   : > { %547 = vmatpush1.bf16.msra.mxu0 %v1314_v3  ;;  %1293 = vmatpush1.bf16.msra.mxu1 %v1314_v3  ;;  %s1439_s7 = scalar_lea.vmem %s1769_s0, %s1153_s29  ;;  %s1528_s26 = scalar_lea.vmem %s1772_s3, %s1058_s24 }
  0x10   : > { %548 = vmatprep.subr.bf16.mxu0 %v1378_v1  ;;  %1284 = vmatprep.subr.bf16.mxu1 %v1378_v1  ;;  %v1324_v6 = vld [vmem:[%s1439_s7 + $0x4] ss:$8 sps:$4 sm:$0xff]   ;;  %v1322_v17 = vld [vmem:[%s1439_s7] ss:$8 sps:$4 sm:$0xff]   ;;  %v1328_v19 = vld [vmem:[%s1439_s7 + $0x14] ss:$8 sps:$4 sm:$0xff]  }
  0x11   : > { %v1327_v7 = vld [vmem:[%s1439_s7 + $0x84] ss:$8 sps:$4 sm:$0xff]   ;;  %1102 = vmatprep.mubr.msk.bf16.mxu0 %vm486_vm0, %v1324_v6  ;;  %v1325_v18 = vld [vmem:[%s1439_s7 + $0x80] ss:$8 sps:$4 sm:$0xff]   ;;  %v1330_v20 = vld [vmem:[%s1439_s7 + $0x94] ss:$8 sps:$4 sm:$0xff]  }
  0x12   : > { %1110 = vmatprep.mubr.msk.bf16.mxu1 %vm486_vm0, %v1327_v7  ;;  %v1332_v21 = vld [vmem:[%s1439_s7 + $0x10] ss:$8 sps:$4 sm:$0xff]   ;;  %v1334_v23 = vld [vmem:[%s1439_s7 + $0x24] ss:$8 sps:$4 sm:$0xff]   ;;  %v1338_v25 = vld [vmem:[%s1439_s7 + $0x20] ss:$8 sps:$4 sm:$0xff]  }
  0x13   : > { %549 = vmatpush1.bf16.msra.mxu0 %v1315_v4  ;;  %1294 = vmatpush1.bf16.msra.mxu1 %v1315_v4  ;;  %v1333_v22 = vld [vmem:[%s1439_s7 + $0x90] ss:$8 sps:$4 sm:$0xff]   ;;  %v1336_v24 = vld [vmem:[%s1439_s7 + $0xa4] ss:$8 sps:$4 sm:$0xff]   ;;  %v1339_v26 = vld [vmem:[%s1439_s7 + $0xa0] ss:$8 sps:$4 sm:$0xff]  }
  0x14   : > { %550 = vmatprep.subr.bf16.mxu0 %v1378_v1  ;;  %1285 = vmatprep.subr.bf16.mxu1 %v1378_v1  ;;  %v1340_v27 = vld [vmem:[%s1439_s7 + $0x34] ss:$8 sps:$4 sm:$0xff]   ;;  %v1344_v29 = vld [vmem:[%s1439_s7 + $0x30] ss:$8 sps:$4 sm:$0xff]   ;;  %v1346_v31 = vld [vmem:[%s1439_s7 + $0x44] ss:$8 sps:$4 sm:$0xff]  }
  0x15   : > { %v1342_v28 = vld [vmem:[%s1439_s7 + $0xb4] ss:$8 sps:$4 sm:$0xff]   ;;  %v1345_v30 = vld [vmem:[%s1439_s7 + $0xb0] ss:$8 sps:$4 sm:$0xff]   ;;  %v1348_v32 = vld [vmem:[%s1439_s7 + $0xc4] ss:$8 sps:$4 sm:$0xff]  }
  0x16   : > { %v1350_v33 = vld [vmem:[%s1439_s7 + $0x40] ss:$8 sps:$4 sm:$0xff]   ;;  %v1352_v35 = vld [vmem:[%s1439_s7 + $0x54] ss:$8 sps:$4 sm:$0xff]   ;;  %v1356_v37 = vld [vmem:[%s1439_s7 + $0x50] ss:$8 sps:$4 sm:$0xff]  }
  0x17   : > { %551 = vmatpush1.bf16.msra.mxu0 %v1316_v5  ;;  %1295 = vmatpush1.bf16.msra.mxu1 %v1316_v5  ;;  %v1351_v34 = vld [vmem:[%s1439_s7 + $0xc0] ss:$8 sps:$4 sm:$0xff]   ;;  %v1354_v36 = vld [vmem:[%s1439_s7 + $0xd4] ss:$8 sps:$4 sm:$0xff]   ;;  %v1357_v38 = vld [vmem:[%s1439_s7 + $0xd0] ss:$8 sps:$4 sm:$0xff]  }
  0x18   : > { %552 = vmatprep.subr.bf16.mxu0 %v1378_v1  ;;  %1286 = vmatprep.subr.bf16.mxu1 %v1378_v1  ;;  %v1358_v39 = vld [vmem:[%s1439_s7 + $0x64] ss:$8 sps:$4 sm:$0xff]   ;;  %v1362_v41 = vld [vmem:[%s1439_s7 + $0x60] ss:$8 sps:$4 sm:$0xff]   ;;  %v1364_v43 = vld [vmem:[%s1439_s7 + $0x74] ss:$8 sps:$4 sm:$0xff]  }
  0x19   : > { %v1360_v40 = vld [vmem:[%s1439_s7 + $0xe4] ss:$8 sps:$4 sm:$0xff]   ;;  %v1363_v42 = vld [vmem:[%s1439_s7 + $0xe0] ss:$8 sps:$4 sm:$0xff]   ;;  %v1366_v44 = vld [vmem:[%s1439_s7 + $0xf4] ss:$8 sps:$4 sm:$0xff]  }
  0x1a   : > { %v1368_v45 = vld [vmem:[%s1439_s7 + $0x70] ss:$8 sps:$4 sm:$0xff]  }
  0x1b   : > { %553 = vmatpush1.bf16.msra.mxu0 %v1317_v8  ;;  %1296 = vmatpush1.bf16.msra.mxu1 %v1317_v8  ;;  %v1369_v46 = vld [vmem:[%s1439_s7 + $0xf0] ss:$8 sps:$4 sm:$0xff]  }
  0x1c   : > { %554 = vmatprep.subr.bf16.mxu0 %v1378_v1  ;;  %1287 = vmatprep.subr.bf16.mxu1 %v1378_v1 }
  0x1f   : > { %555 = vmatpush1.bf16.msra.mxu0 %v1318_v9  ;;  %1297 = vmatpush1.bf16.msra.mxu1 %v1318_v9 }
  0x20   : > { %556 = vmatprep.subr.bf16.mxu0 %v1378_v1  ;;  %1288 = vmatprep.subr.bf16.mxu1 %v1378_v1 }
  0x23   : > { %557 = vmatpush1.bf16.msra.mxu0 %v1319_v10  ;;  %1298 = vmatpush1.bf16.msra.mxu1 %v1319_v10 }
  0x24   : > { %558 = vmatprep.subr.bf16.mxu0 %v1378_v1  ;;  %1289 = vmatprep.subr.bf16.mxu1 %v1378_v1 }
  0x27   : > { %559 = vmatpush1.bf16.msra.mxu0 %v1320_v13  ;;  %1299 = vmatpush1.bf16.msra.mxu1 %v1320_v13 }
  0x28   : > { %560 = vmatprep.subr.bf16.mxu0 %v1378_v1  ;;  %1290 = vmatprep.subr.bf16.mxu1 %v1378_v1 }
  0x2b   : > { %561 = vmatpush1.bf16.msra.mxu0 %v540_v16  ;;  %1300 = vmatpush1.bf16.msra.mxu1 %v540_v16 }
  0x2e   : > { %575 = vmatmul.mubr.bf16.vlgmr.msra.gmra.mrb[0].mxu0 %v1322_v17  ;;  %639 = vmatmul.mubr.bf16.vlgmr.msra.gmra.mrb[0].mxu1 %v1325_v18 }
  0x2f   : > { %1103 = vmatprep.mubr.msk.bf16.mxu0 %vm486_vm0, %v1328_v19  ;;  %1111 = vmatprep.mubr.msk.bf16.mxu1 %vm486_vm0, %v1330_v20 }
  0x36   : > { %583 = vmatmul.mubr.bf16.gmra.mrb[4].mxu0 %v1332_v21  ;;  %647 = vmatmul.mubr.bf16.gmra.mrb[4].mxu1 %v1333_v22 }
  0x37   : > { %1104 = vmatprep.mubr.msk.bf16.mxu0 %vm486_vm0, %v1334_v23  ;;  %1112 = vmatprep.mubr.msk.bf16.mxu1 %vm486_vm0, %v1336_v24 }
  0x3e   : > { %591 = vmatmul.mubr.bf16.gmra.mrb[8].mxu0 %v1338_v25  ;;  %655 = vmatmul.mubr.bf16.gmra.mrb[8].mxu1 %v1339_v26 }
  0x3f   : > { %1105 = vmatprep.mubr.msk.bf16.mxu0 %vm486_vm0, %v1340_v27  ;;  %1113 = vmatprep.mubr.msk.bf16.mxu1 %vm486_vm0, %v1342_v28 }
  0x46   : > { %599 = vmatmul.mubr.bf16.gmra.mrb[12].mxu0 %v1344_v29  ;;  %663 = vmatmul.mubr.bf16.gmra.mrb[12].mxu1 %v1345_v30 }
  0x47   : > { %1106 = vmatprep.mubr.msk.bf16.mxu0 %vm486_vm0, %v1346_v31  ;;  %1114 = vmatprep.mubr.msk.bf16.mxu1 %vm486_vm0, %v1348_v32 }
  0x4e   : > { %607 = vmatmul.mubr.bf16.gmra.mrb[16].mxu0 %v1350_v33  ;;  %671 = vmatmul.mubr.bf16.gmra.mrb[16].mxu1 %v1351_v34 }
  0x4f   : > { %1107 = vmatprep.mubr.msk.bf16.mxu0 %vm486_vm0, %v1352_v35  ;;  %1115 = vmatprep.mubr.msk.bf16.mxu1 %vm486_vm0, %v1354_v36 }
  0x56   : > { %615 = vmatmul.mubr.bf16.gmra.mrb[20].mxu0 %v1356_v37  ;;  %679 = vmatmul.mubr.bf16.gmra.mrb[20].mxu1 %v1357_v38 }
  0x57   : > { %1108 = vmatprep.mubr.msk.bf16.mxu0 %vm486_vm0, %v1358_v39  ;;  %1116 = vmatprep.mubr.msk.bf16.mxu1 %vm486_vm0, %v1360_v40 }
  0x5e   : > { %623 = vmatmul.mubr.bf16.gmra.mrb[24].mxu0 %v1362_v41  ;;  %687 = vmatmul.mubr.bf16.gmra.mrb[24].mxu1 %v1363_v42 }
  0x5f   : > { %1109 = vmatprep.mubr.msk.bf16.mxu0 %vm486_vm0, %v1364_v43  ;;  %1117 = vmatprep.mubr.msk.bf16.mxu1 %vm486_vm0, %v1366_v44 }
  0x66   : > { %631 = vmatmul.mubr.bf16.gmra.mrb[28].mxu0 %v1368_v45  ;;  %695 = vmatmul.mubr.bf16.gmra.mrb[28].mxu1 %v1369_v46 }
 0x101   : > { %v576_v48 = vpop.f32.mrb[0].mxu0  ;;  %v640_v49 = vpop.f32.mrb[0].mxu1 }
 0x102   : > { %v578_v50 = vpop.f32.mrb[1].mxu0  ;;  %v642_v51 = vpop.f32.mrb[1].mxu1  ;;  %v1514_v54 = vadd.f32 %v1510_v47, %v576_v48  ;;  %v1517_v55 = vadd.f32 %v1510_v47, %v640_v49 }
 0x103   : > { %v579_v52 = vpop.f32.mrb[2].mxu0  ;;  %v643_v53 = vpop.f32.mrb[2].mxu1 }
 0x104   : > { %v1520_v56 = vadd.f32 %v1510_v47, %v579_v52  ;;  %v1523_v57 = vadd.f32 %v1510_v47, %v643_v53  ;;  %v581_v58 = vpop.f32.mrb[3].mxu0  ;;  %v645_v59 = vpop.f32.mrb[3].mxu1 }
 0x106   : > { %v1189_v60 = vpack.c.bf16 %v1520_v56, %v1514_v54  ;;  %v1229_v61 = vpack.c.bf16 %v1523_v57, %v1517_v55 }
 0x108   : > { %1190 = vst [vmem:[%s1528_s26] sm:$0xff] %v1189_v60   ;;  %1273 = vst [vmem:[%s1528_s26 + $0x40] sm:$0xff] %v1229_v61  }
 0x109   : > { %v584_v62 = vpop.f32.mrb[4].mxu0  ;;  %v648_v63 = vpop.f32.mrb[4].mxu1 }
 0x10a   : > { %v586_v0 = vpop.f32.mrb[5].mxu0  ;;  %v650_v1 = vpop.f32.mrb[5].mxu1  ;;  %v1537_v4 = vadd.f32 %v1510_v47, %v584_v62  ;;  %v1540_v5 = vadd.f32 %v1510_v47, %v648_v63 }
 0x10b   : > { %v587_v2 = vpop.f32.mrb[6].mxu0  ;;  %v651_v3 = vpop.f32.mrb[6].mxu1 }
 0x10c   : > { %v1543_v6 = vadd.f32 %v1510_v47, %v587_v2  ;;  %v1546_v7 = vadd.f32 %v1510_v47, %v651_v3  ;;  %v589_v8 = vpop.f32.mrb[7].mxu0  ;;  %v653_v9 = vpop.f32.mrb[7].mxu1 }
 0x10e   : > { %v1194_v10 = vpack.c.bf16 %v1543_v6, %v1537_v4  ;;  %v1234_v11 = vpack.c.bf16 %v1546_v7, %v1540_v5 }
 0x110   : > { %1266 = vst [vmem:[%s1528_s26 + $0x8] sm:$0xff] %v1194_v10   ;;  %1274 = vst [vmem:[%s1528_s26 + $0x48] sm:$0xff] %v1234_v11  }
 0x111   : > { %v592_v12 = vpop.f32.mrb[8].mxu0  ;;  %v656_v13 = vpop.f32.mrb[8].mxu1 }
 0x112   : > { %v594_v14 = vpop.f32.mrb[9].mxu0  ;;  %v658_v15 = vpop.f32.mrb[9].mxu1  ;;  %v1555_v18 = vadd.f32 %v1510_v47, %v592_v12  ;;  %v1558_v19 = vadd.f32 %v1510_v47, %v656_v13 }
 0x113   : > { %v595_v16 = vpop.f32.mrb[10].mxu0  ;;  %v659_v17 = vpop.f32.mrb[10].mxu1 }
 0x114   : > { %v1561_v20 = vadd.f32 %v1510_v47, %v595_v16  ;;  %v1564_v21 = vadd.f32 %v1510_v47, %v659_v17  ;;  %v597_v22 = vpop.f32.mrb[11].mxu0  ;;  %v661_v23 = vpop.f32.mrb[11].mxu1 }
 0x116   : > { %v1199_v24 = vpack.c.bf16 %v1561_v20, %v1555_v18  ;;  %v1239_v25 = vpack.c.bf16 %v1564_v21, %v1558_v19 }
 0x118   : > { %1267 = vst [vmem:[%s1528_s26 + $0x10] sm:$0xff] %v1199_v24   ;;  %1275 = vst [vmem:[%s1528_s26 + $0x50] sm:$0xff] %v1239_v25  }
 0x119   : > { %v600_v26 = vpop.f32.mrb[12].mxu0  ;;  %v664_v27 = vpop.f32.mrb[12].mxu1 }
 0x11a   : > { %v602_v28 = vpop.f32.mrb[13].mxu0  ;;  %v666_v29 = vpop.f32.mrb[13].mxu1  ;;  %v1573_v32 = vadd.f32 %v1510_v47, %v600_v26  ;;  %v1576_v33 = vadd.f32 %v1510_v47, %v664_v27 }
 0x11b   : > { %v603_v30 = vpop.f32.mrb[14].mxu0  ;;  %v667_v31 = vpop.f32.mrb[14].mxu1 }
 0x11c   : > { %v1579_v34 = vadd.f32 %v1510_v47, %v603_v30  ;;  %v1582_v35 = vadd.f32 %v1510_v47, %v667_v31  ;;  %v605_v36 = vpop.f32.mrb[15].mxu0  ;;  %v669_v37 = vpop.f32.mrb[15].mxu1 }
 0x11e   : > { %v1204_v38 = vpack.c.bf16 %v1579_v34, %v1573_v32  ;;  %v1244_v39 = vpack.c.bf16 %v1582_v35, %v1576_v33 }
 0x120   : > { %1268 = vst [vmem:[%s1528_s26 + $0x18] sm:$0xff] %v1204_v38   ;;  %1276 = vst [vmem:[%s1528_s26 + $0x58] sm:$0xff] %v1244_v39  }
 0x121   : > { %v608_v40 = vpop.f32.mrb[16].mxu0  ;;  %v672_v41 = vpop.f32.mrb[16].mxu1 }
 0x122   : > { %v610_v42 = vpop.f32.mrb[17].mxu0  ;;  %v674_v43 = vpop.f32.mrb[17].mxu1  ;;  %v1591_v46 = vadd.f32 %v1510_v47, %v608_v40  ;;  %v1594_v48 = vadd.f32 %v1510_v47, %v672_v41 }
 0x123   : > { %v611_v44 = vpop.f32.mrb[18].mxu0  ;;  %v675_v45 = vpop.f32.mrb[18].mxu1 }
 0x124   : > { %v1597_v49 = vadd.f32 %v1510_v47, %v611_v44  ;;  %v1600_v50 = vadd.f32 %v1510_v47, %v675_v45  ;;  %v613_v51 = vpop.f32.mrb[19].mxu0  ;;  %v677_v52 = vpop.f32.mrb[19].mxu1 }
 0x126   : > { %v1209_v53 = vpack.c.bf16 %v1597_v49, %v1591_v46  ;;  %v1249_v58 = vpack.c.bf16 %v1600_v50, %v1594_v48 }
 0x128   : > { %1269 = vst [vmem:[%s1528_s26 + $0x20] sm:$0xff] %v1209_v53   ;;  %1277 = vst [vmem:[%s1528_s26 + $0x60] sm:$0xff] %v1249_v58   ;;  %v1380_v58 = vmov (!%p1150_p4), 0.0  }
 0x129   : > { %v616_v59 = vpop.f32.mrb[20].mxu0  ;;  %v680_v60 = vpop.f32.mrb[20].mxu1  ;;  %867 = vst [vmem:[%s1773_s4] sm:$0x1] (!%p1150_p4), %v1380_v58  ;;  %868 = vst [vmem:[%s1774_s5] sm:$0x1] (!%p1150_p4), %v1380_v58 }
 0x12a   : > { %v618_v61 = vpop.f32.mrb[21].mxu0  ;;  %v682_v62 = vpop.f32.mrb[21].mxu1  ;;  %v1609_v1 = vadd.f32 %v1510_v47, %v616_v59  ;;  %v1612_v2 = vadd.f32 %v1510_v47, %v680_v60 }
 0x12b   : > { %v619_v63 = vpop.f32.mrb[22].mxu0  ;;  %v683_v0 = vpop.f32.mrb[22].mxu1 }
 0x12c   : > { %v1615_v3 = vadd.f32 %v1510_v47, %v619_v63  ;;  %v1618_v8 = vadd.f32 %v1510_v47, %v683_v0  ;;  %v621_v9 = vpop.f32.mrb[23].mxu0  ;;  %v685_v10 = vpop.f32.mrb[23].mxu1 }
 0x12e   : > { %v1214_v11 = vpack.c.bf16 %v1615_v3, %v1609_v1  ;;  %v1254_v12 = vpack.c.bf16 %v1618_v8, %v1612_v2 }
 0x130   : > { %1270 = vst [vmem:[%s1528_s26 + $0x28] sm:$0xff] %v1214_v11   ;;  %1278 = vst [vmem:[%s1528_s26 + $0x68] sm:$0xff] %v1254_v12  }
 0x131   : > { %v624_v13 = vpop.f32.mrb[24].mxu0  ;;  %v688_v14 = vpop.f32.mrb[24].mxu1 }
 0x132   : > { %v626_v15 = vpop.f32.mrb[25].mxu0  ;;  %v690_v16 = vpop.f32.mrb[25].mxu1  ;;  %v1627_v23 = vadd.f32 %v1510_v47, %v624_v13  ;;  %v1630_v24 = vadd.f32 %v1510_v47, %v688_v14 }
 0x133   : > { %v627_v17 = vpop.f32.mrb[26].mxu0  ;;  %v691_v22 = vpop.f32.mrb[26].mxu1 }
 0x134   : > { %v1633_v25 = vadd.f32 %v1510_v47, %v627_v17  ;;  %v1636_v26 = vadd.f32 %v1510_v47, %v691_v22  ;;  %v629_v27 = vpop.f32.mrb[27].mxu0  ;;  %v693_v28 = vpop.f32.mrb[27].mxu1 }
 0x136   : > { %v1219_v29 = vpack.c.bf16 %v1633_v25, %v1627_v23  ;;  %v1259_v30 = vpack.c.bf16 %v1636_v26, %v1630_v24 }
 0x138   : > { %1271 = vst [vmem:[%s1528_s26 + $0x30] sm:$0xff] %v1219_v29   ;;  %1279 = vst [vmem:[%s1528_s26 + $0x70] sm:$0xff] %v1259_v30  }
 0x139   : > { %v632_v31 = vpop.f32.mrb[28].mxu0  ;;  %v696_v36 = vpop.f32.mrb[28].mxu1 }
 0x13a   : > { %v634_v37 = vpop.f32.mrb[29].mxu0  ;;  %v698_v38 = vpop.f32.mrb[29].mxu1  ;;  %v633_v41 = vadd.f32 %v1510_v47, %v632_v31  ;;  %v1646_v42 = vadd.f32 %v1510_v47, %v696_v36  ;;  %866 = sbr.rel (%p1150_p4) target bundleno = 321 (0x141), region = 36 }
 0x13b   : > { %v635_v39 = vpop.f32.mrb[30].mxu0  ;;  %v699_v40 = vpop.f32.mrb[30].mxu1 }
 0x13c   : > { %v636_v43 = vadd.f32 %v1510_v47, %v635_v39  ;;  %v1650_v44 = vadd.f32 %v1510_v47, %v699_v40  ;;  %v637_v45 = vpop.f32.mrb[31].mxu0  ;;  %v701_v51 = vpop.f32.mrb[31].mxu1 }
 0x13e   : > { %v1224_v52 = vpack.c.bf16 %v636_v43, %v633_v41  ;;  %v1264_v53 = vpack.c.bf16 %v1650_v44, %v1646_v42 }
 0x140   : > { %1272 = vst [vmem:[%s1528_s26 + $0x38] sm:$0xff] %v1224_v52   ;;  %1280 = vst [vmem:[%s1528_s26 + $0x78] sm:$0xff] %v1264_v53  }
 0x141 PF: > { %v870_v47 = vadd.f32 %v1520_v56, %v1514_v54  ;;  %v910_v61 = vmul.f32 %v1514_v54, %v1514_v54  ;;  %v911_v62 = vmul.f32 %v1520_v56, %v1520_v56  ;;  %v912_v0 = vmul.f32 %v1537_v4, %v1537_v4 }
 0x142   : > { %v913_v10 = vmul.f32 %v1543_v6, %v1543_v6  ;;  %v914_v13 = vmul.f32 %v1555_v18, %v1555_v18  ;;  %v915_v56 = vmul.f32 %v1561_v20, %v1561_v20  ;;  %v916_v16 = vmul.f32 %v1573_v32, %v1573_v32 }
 0x143   : > { %v871_v59 = vadd.f32 %v870_v47, %v1537_v4  ;;  %v942_v11 = vadd.f32 %v911_v62, %v910_v61  ;;  %v917_v22 = vmul.f32 %v1579_v34, %v1579_v34  ;;  %v918_v28 = vmul.f32 %v1591_v46, %v1591_v46 }
 0x144   : > { %v919_v30 = vmul.f32 %v1597_v49, %v1597_v49  ;;  %v920_v36 = vmul.f32 %v1609_v1, %v1609_v1  ;;  %v921_v38 = vmul.f32 %v1615_v3, %v1615_v3  ;;  %v922_v40 = vmul.f32 %v1627_v23, %v1627_v23 }
 0x145   : > { %v872_v60 = vadd.f32 %v871_v59, %v1543_v6  ;;  %v943_v54 = vadd.f32 %v942_v11, %v912_v0  ;;  %v925_v59 = vmul.f32 %v636_v43, %v636_v43  ;;  %v926_v61 = vmul.f32 %v1517_v55, %v1517_v55 }
 0x147   : > { %v873_v63 = vadd.f32 %v872_v60, %v1555_v18  ;;  %v944_v15 = vadd.f32 %v943_v54, %v913_v10  ;;  %v929_v10 = vmul.f32 %v1546_v7, %v1546_v7  ;;  %v931_v54 = vmul.f32 %v1564_v21, %v1564_v21 }
 0x149   : > { %v874_v9 = vadd.f32 %v873_v63, %v1561_v20  ;;  %v945_v17 = vadd.f32 %v944_v15, %v914_v13 }
 0x14b   : > { %v875_v12 = vadd.f32 %v874_v9, %v1573_v32  ;;  %v946_v27 = vadd.f32 %v945_v17, %v915_v56  ;;  %v932_v56 = vmul.f32 %v1576_v33, %v1576_v33  ;;  %v934_v17 = vmul.f32 %v1594_v48, %v1594_v48 }
 0x14d   : > { %v876_v14 = vadd.f32 %v875_v12, %v1579_v34  ;;  %v947_v29 = vadd.f32 %v946_v27, %v916_v16  ;;  %v930_v12 = vmul.f32 %v1558_v19, %v1558_v19 }
 0x14f   : > { %v877_v4 = vadd.f32 %v876_v14, %v1591_v46  ;;  %v948_v31 = vadd.f32 %v947_v29, %v917_v22  ;;  %v935_v22 = vmul.f32 %v1600_v50, %v1600_v50  ;;  %v937_v29 = vmul.f32 %v1618_v8, %v1618_v8 }
 0x151   : > { %v878_v6 = vadd.f32 %v877_v4, %v1597_v49  ;;  %v949_v37 = vadd.f32 %v948_v31, %v918_v28  ;;  %v923_v49 = vmul.f32 %v1633_v25, %v1633_v25  ;;  %v933_v4 = vmul.f32 %v1582_v35, %v1582_v35 }
 0x153   : > { %v879_v18 = vadd.f32 %v878_v6, %v1609_v1  ;;  %v950_v39 = vadd.f32 %v949_v37, %v919_v30  ;;  %v924_v1 = vmul.f32 %v633_v41, %v633_v41  ;;  %v938_v30 = vmul.f32 %v1630_v24, %v1630_v24 }
 0x154   : > { %v940_v37 = vmul.f32 %v1646_v42, %v1646_v42 }
 0x155   : > { %v880_v20 = vadd.f32 %v879_v18, %v1615_v3  ;;  %v951_v45 = vadd.f32 %v950_v39, %v920_v36  ;;  %v936_v18 = vmul.f32 %v1612_v2, %v1612_v2 }
 0x157   : > { %v881_v32 = vadd.f32 %v880_v20, %v1627_v23  ;;  %v952_v52 = vadd.f32 %v951_v45, %v921_v38 }
 0x159   : > { %v882_v34 = vadd.f32 %v881_v32, %v1633_v25  ;;  %v953_v58 = vadd.f32 %v952_v52, %v922_v40  ;;  %v927_v25 = vmul.f32 %v1523_v57, %v1523_v57  ;;  %v939_v32 = vmul.f32 %v1636_v26, %v1636_v26 }
 0x15b   : > { %v883_v46 = vadd.f32 %v882_v34, %v633_v41  ;;  %v954_v60 = vadd.f32 %v953_v58, %v923_v49  ;;  %v928_v41 = vmul.f32 %v1540_v5, %v1540_v5 }
 0x15d   : > { %v884_v51 = vadd.f32 %v883_v46, %v636_v43  ;;  %v955_v23 = vadd.f32 %v954_v60, %v924_v1 }
 0x15f   : > { %v885_v53 = vadd.f32 %v884_v51, %v1517_v55  ;;  %v956_v63 = vadd.f32 %v955_v23, %v925_v59 }
 0x161   : > { %v886_v47 = vadd.f32 %v885_v53, %v1523_v57  ;;  %v957_v9 = vadd.f32 %v956_v63, %v926_v61 }
 0x163   : > { %v887_v3 = vadd.f32 %v886_v47, %v1540_v5  ;;  %v958_v11 = vadd.f32 %v957_v9, %v927_v25  ;;  %v909_v47 = vld [vmem:[%s1774_s5] sm:$0x1] }
 0x165   : > { %v888_v62 = vadd.f32 %v887_v3, %v1546_v7  ;;  %v959_v13 = vadd.f32 %v958_v11, %v928_v41 }
 0x167   : > { %v889_v0 = vadd.f32 %v888_v62, %v1558_v19  ;;  %v960_v14 = vadd.f32 %v959_v13, %v929_v10 }
 0x169   : > { %v890_v43 = vadd.f32 %v889_v0, %v1564_v21  ;;  %v961_v15 = vadd.f32 %v960_v14, %v930_v12 }
 0x16b   : > { %v891_v55 = vadd.f32 %v890_v43, %v1576_v33  ;;  %v962_v16 = vadd.f32 %v961_v15, %v931_v54 }
 0x16d   : > { %v892_v57 = vadd.f32 %v891_v55, %v1582_v35  ;;  %v963_v6 = vadd.f32 %v962_v16, %v932_v56 }
 0x16f   : > { %v893_v5 = vadd.f32 %v892_v57, %v1594_v48  ;;  %v964_v27 = vadd.f32 %v963_v6, %v933_v4 }
 0x171   : > { %v894_v7 = vadd.f32 %v893_v5, %v1600_v50  ;;  %v965_v28 = vadd.f32 %v964_v27, %v934_v17 }
 0x173   : > { %v895_v19 = vadd.f32 %v894_v7, %v1612_v2  ;;  %v966_v20 = vadd.f32 %v965_v28, %v935_v22 }
 0x175   : > { %v896_v21 = vadd.f32 %v895_v19, %v1618_v8  ;;  %v967_v31 = vadd.f32 %v966_v20, %v936_v18  ;;  %v941_v8 = vmul.f32 %v1650_v44, %v1650_v44 }
 0x177   : > { %v897_v33 = vadd.f32 %v896_v21, %v1630_v24  ;;  %v968_v36 = vadd.f32 %v967_v31, %v937_v29 }
 0x179   : > { %v898_v35 = vadd.f32 %v897_v33, %v1636_v26  ;;  %v969_v34 = vadd.f32 %v968_v36, %v938_v30  ;;  %v869_v26 = vld [vmem:[%s1773_s4] sm:$0x1] }
 0x17b   : > { %v899_v48 = vadd.f32 %v898_v35, %v1646_v42  ;;  %v970_v39 = vadd.f32 %v969_v34, %v939_v32 }
 0x17d   : > { %v900_v50 = vadd.f32 %v899_v48, %v1650_v44  ;;  %v971_v40 = vadd.f32 %v970_v39, %v940_v37 }
 0x17f   : > { %v901_v2 = vrot.slane %v900_v50, 4  ;;  %v972_v45 = vadd.f32 %v971_v40, %v941_v8 }
 0x181   : > { %v902_v38 = vadd.f32 %v901_v2, %v900_v50  ;;  %v973_v49 = vrot.slane %v972_v45, 4 }
 0x183   : > { %v903_v46 = vrot.slane %v902_v38, 2  ;;  %v974_v53 = vadd.f32 %v973_v49, %v972_v45 }
 0x185   : > { %v904_v24 = vadd.f32 %v903_v46, %v902_v38  ;;  %v975_v42 = vrot.slane %v974_v53, 2 }
 0x187   : > { %v905_v51 = vrot.slane %v904_v24, 1  ;;  %v976_v44 = vadd.f32 %v975_v42, %v974_v53 }
 0x189   : > { %v906_v52 = vadd.f32 %v905_v51, %v904_v24  ;;  %v977_v58 = vrot.slane %v976_v44, 1 }
 0x18b   : > { %v907_v1 = vadd.f32 %v906_v52, %v869_v26  ;;  %v978_v59 = vadd.f32 %v977_v58, %v976_v44 }
 0x18d   : > { %908 = vst [vmem:[%s1773_s4] sm:$0x1] %v907_v1  ;;  %v979_v60 = vadd.f32 %v978_v59, %v909_v47 }
 0x18f   : > { %980 = vst [vmem:[%s1774_s5] sm:$0x1] %v979_v60 }
 0x190 PF: > { %s16_s18 = sadd.s32 1, %s1376_s18  }
 0x191   : > { %p13_p5 = scmp.ge.s32.totalorder %s16_s18, 4  }
 0x193   :  { %15 = sbr.rel (!%p13_p5) target bundleno = 1 (0x1), region = 82 }

// kernel: frame_cnn_forward.7
= control target key start
LH: loop header
LB: loop body
LE: loop exit
PB: predicated region body
PF: predicated region fallthrough
CT: control target
= control target key end

     0   :  { %s903_s21 = smov 0   ;;  %s1270_s0 = inlined_call_operand.vmem [shape: bf16[2,9,9,128], index: 0, kind: input, shape index: {}]   ;;  %s1271_s1 = inlined_call_operand.vmem [shape: bf16[2,9,9,128], index: 1, kind: input, shape index: {}]   ;;  %s1272_s2 = inlined_call_operand.vmem [shape: bf16[2,9,9,128], index: 2, kind: input, shape index: {}]   ;;  %s1273_s3 = inlined_call_operand.vmem [shape: bf16[2,9,9,128], index: 3, kind: input, shape index: {}]   ;;  %s1274_s4 = inlined_call_operand.vmem [shape: f32[1,128], index: 4, kind: input, shape index: {}]   ;;  %s1275_s5 = inlined_call_operand.vmem [shape: f32[1,128], index: 5, kind: input, shape index: {}]   ;;  %s1276_s6 = inlined_call_operand.vmem [shape: bf16[2,8,8,128], index: 6, kind: output, shape index: {}]  }
   0x1 LB: > { %s812_s22 = sadd.s32 4294967295, %s866_s21   ;;  %p816_p0 = scmp.ge.s32.totalorder %s866_s21, 1  ;;  %s866_s21 = sphi %s903_s21, %s16_s21  }
   0x2   : > { %p242_p1 = scmp.lt.s32.totalorder %s866_s21, 3 }
   0x4   : > { %p243_p2 = pnand %p816_p0, %p242_p1 }
   0x6   : > { %246 = sbr.rel (%p243_p2) target bundleno = 94 (0x5e), region = 44 }
   0xd   : > { %p287_p3 = scmp.lt.s32.totalorder %s812_s22, 1  ;;  %v923_v0 = vld [vmem:[%s1274_s4] ss:$0 sm:$0xff]  ;;  %vm554_vm0 = vcmask 1046528  }
   0xe   : > { %v934_v39 = vld [vmem:[%s1275_s5] ss:$0 sm:$0xff] }
   0xf   : > { %s1294_s22 = smov (!%p287_p3, %s812_s22), 1 }
  0x10   : > { %s914_s23 = smul.u32 72, %s1294_s22  ;;  %s827_s16 = sshll.u32 %s1294_s22, 5 }
  0x11   : > { %s311_s19 = scalar_lea.vmem %s1276_s6, %s827_s16 }
  0x12   : > { %s291_s26 = scalar_lea.vmem %s1270_s0, %s914_s23  ;;  %s296_s9 = scalar_lea.vmem %s1271_s1, %s914_s23 }
  0x13   : > { %v314_v1 = vld [vmem:[%s291_s26] ss:$8 sps:$4 sm:$0xff]   ;;  %v315_v2 = vld [vmem:[%s291_s26 + $0x4] sm:$0x1]  ;;  %v317_v3 = vld [vmem:[%s291_s26 + $0xc] sm:$0x1]  ;;  %s1010_s12 = scalar_lea.vmem %s1272_s2, %s914_s23  ;;  %s306_s15 = scalar_lea.vmem %s1273_s3, %s914_s23 }
  0x14   : > { %v318_v4 = vld [vmem:[%s291_s26 + $0x10] ss:$8 sps:$4 sm:$0xff]   ;;  %v319_v5 = vld [vmem:[%s291_s26 + $0x14] sm:$0x1]  ;;  %v321_v6 = vld [vmem:[%s291_s26 + $0x1c] sm:$0x1]  ;;  %v332_v7 = vunpack.c.l.bf16 %v314_v1  ;;  %v333_v8 = vunpack.c.l.bf16 %v315_v2  ;;  %v334_v9 = vunpack.c.h.bf16 %v314_v1  ;;  %v335_v10 = vunpack.c.l.bf16 %v317_v3 }
  0x15   : > { %v322_v11 = vld [vmem:[%s291_s26 + $0x20] ss:$8 sps:$4 sm:$0xff]   ;;  %v323_v12 = vld [vmem:[%s291_s26 + $0x24] sm:$0x1]  ;;  %v325_v13 = vld [vmem:[%s291_s26 + $0x2c] sm:$0x1]  ;;  %v336_v14 = vunpack.c.l.bf16 %v318_v4  ;;  %v337_v15 = vunpack.c.l.bf16 %v319_v5  ;;  %v338_v16 = vunpack.c.h.bf16 %v318_v4  ;;  %v339_v17 = vunpack.c.l.bf16 %v321_v6 }
  0x16   : > { %v326_v18 = vld [vmem:[%s291_s26 + $0x30] ss:$8 sps:$4 sm:$0xff]   ;;  %v327_v19 = vld [vmem:[%s291_s26 + $0x34] sm:$0x1]  ;;  %v329_v20 = vld [vmem:[%s291_s26 + $0x3c] sm:$0x1]  ;;  %v340_v21 = vunpack.c.l.bf16 %v322_v11  ;;  %v341_v22 = vunpack.c.l.bf16 %v323_v12  ;;  %v342_v23 = vunpack.c.h.bf16 %v322_v11  ;;  %v343_v24 = vunpack.c.l.bf16 %v325_v13 }
  0x17   : > { %v330_v25 = vld [vmem:[%s291_s26 + $0x40] sm:$0xf]  ;;  %v331_v26 = vld [vmem:[%s291_s26 + $0x44] sm:$0x1]  ;;  %v344_v27 = vunpack.c.l.bf16 %v326_v18  ;;  %v345_v28 = vunpack.c.l.bf16 %v327_v19  ;;  %v346_v29 = vunpack.c.h.bf16 %v326_v18  ;;  %v347_v30 = vunpack.c.l.bf16 %v329_v20  ;;  %v400_v2 = vld [vmem:[%s296_s9 + $0x10] ss:$8 sps:$4 sm:$0xff]  }
  0x18   : > { %v348_v31 = vunpack.c.l.bf16 %v330_v25  ;;  %v349_v32 = vunpack.c.l.bf16 %v331_v26  ;;  %v356_v33 = vmul.f32 %v923_v0, %v332_v7  ;;  %v357_v34 = vmul.f32 %v923_v0, %v333_v8  ;;  %v398_v60 = vld [vmem:[%s296_s9] ss:$8 sps:$4 sm:$0xff]   ;;  %v404_v8 = vld [vmem:[%s296_s9 + $0x30] ss:$8 sps:$4 sm:$0xff]  }
  0x19   : > { %v358_v35 = vmul.f32 %v923_v0, %v334_v9  ;;  %v359_v36 = vmul.f32 %v923_v0, %v335_v10  ;;  %v360_v37 = vmul.f32 %v923_v0, %v336_v14  ;;  %v361_v38 = vmul.f32 %v923_v0, %v337_v15  ;;  %v402_v3 = vld [vmem:[%s296_s9 + $0x20] ss:$8 sps:$4 sm:$0xff]  }
  0x1a   : > { %v362_v40 = vmul.f32 %v923_v0, %v338_v16  ;;  %v363_v41 = vmul.f32 %v923_v0, %v339_v17  ;;  %v364_v42 = vmul.f32 %v923_v0, %v340_v21  ;;  %v365_v43 = vmul.f32 %v923_v0, %v341_v22  ;;  %v406_v9 = vld [vmem:[%s296_s9 + $0x40] sm:$0xf] }
  0x1b   : > { %v366_v44 = vmul.f32 %v923_v0, %v342_v23  ;;  %v367_v45 = vmul.f32 %v923_v0, %v343_v24  ;;  %v368_v46 = vmul.f32 %v923_v0, %v344_v27  ;;  %v369_v47 = vmul.f32 %v923_v0, %v345_v28 }
  0x1c   : > { %v370_v48 = vmul.f32 %v923_v0, %v346_v29  ;;  %v371_v49 = vmul.f32 %v923_v0, %v347_v30  ;;  %v372_v50 = vmul.f32 %v923_v0, %v348_v31  ;;  %v373_v51 = vmul.f32 %v923_v0, %v349_v32  ;;  %v434_v30 = vld [vmem:[%s1010_s12] ss:$8 sps:$4 sm:$0xff]   ;;  %v435_v31 = vld [vmem:[%s1010_s12 + $0x4] sm:$0x1] }
  0x1d   : > { %v953_v52 = vadd.f32 %v934_v39, %v356_v33  ;;  %v956_v53 = vadd.f32 %v934_v39, %v357_v34  ;;  %v959_v54 = vadd.f32 %v934_v39, %v358_v35  ;;  %v962_v55 = vadd.f32 %v934_v39, %v359_v36  ;;  %v437_v36 = vld [vmem:[%s1010_s12 + $0xc] sm:$0x1] }
  0x1e   : > { %v965_v56 = vadd.f32 %v934_v39, %v360_v37  ;;  %v968_v57 = vadd.f32 %v934_v39, %v361_v38  ;;  %v971_v58 = vadd.f32 %v934_v39, %v362_v40  ;;  %v974_v59 = vadd.f32 %v934_v39, %v363_v41  ;;  %v438_v37 = vld [vmem:[%s1010_s12 + $0x10] ss:$8 sps:$4 sm:$0xff]   ;;  %v439_v38 = vld [vmem:[%s1010_s12 + $0x14] sm:$0x1] }
  0x1f   : > { %v977_v61 = vadd.f32 %v934_v39, %v364_v42  ;;  %v980_v62 = vadd.f32 %v934_v39, %v365_v43  ;;  %v983_v63 = vadd.f32 %v934_v39, %v366_v44  ;;  %v986_v1 = vadd.f32 %v934_v39, %v367_v45  ;;  %v441_v44 = vld [vmem:[%s1010_s12 + $0x1c] sm:$0x1]  ;;  %v442_v45 = vld [vmem:[%s1010_s12 + $0x20] ss:$8 sps:$4 sm:$0xff]  }
  0x20   : > { %v989_v4 = vadd.f32 %v934_v39, %v368_v46  ;;  %v992_v5 = vadd.f32 %v934_v39, %v369_v47  ;;  %v995_v6 = vadd.f32 %v934_v39, %v370_v48  ;;  %v998_v7 = vadd.f32 %v934_v39, %v371_v49  ;;  %v443_v46 = vld [vmem:[%s1010_s12 + $0x24] sm:$0x1]  ;;  %v445_v48 = vld [vmem:[%s1010_s12 + $0x2c] sm:$0x1]  ;;  %v446_v49 = vld [vmem:[%s1010_s12 + $0x30] ss:$8 sps:$4 sm:$0xff]  }
  0x21   : > { %v1001_v10 = vadd.f32 %v934_v39, %v372_v50  ;;  %v1004_v11 = vadd.f32 %v934_v39, %v373_v51  ;;  %v407_v12 = vunpack.c.l.bf16 %v398_v60  ;;  %v408_v13 = vunpack.c.h.bf16 %v398_v60  ;;  %v447_v50 = vld [vmem:[%s1010_s12 + $0x34] sm:$0x1] }
  0x22   : > { %v409_v14 = vunpack.c.l.bf16 %v400_v2  ;;  %v410_v15 = vunpack.c.h.bf16 %v400_v2  ;;  %v411_v16 = vunpack.c.l.bf16 %v402_v3  ;;  %v412_v17 = vunpack.c.h.bf16 %v402_v3  ;;  %v449_v3 = vld [vmem:[%s1010_s12 + $0x3c] sm:$0x1] }
  0x23   : > { %1281 = vst [vmem:[#allocation2_spill] sm:$0xff] %v1004_v11  ;;  %v413_v18 = vunpack.c.l.bf16 %v404_v8  ;;  %v414_v19 = vunpack.c.h.bf16 %v404_v8  ;;  %v415_v20 = vunpack.c.l.bf16 %v406_v9  ;;  %v416_v21 = vmul.f32 %v923_v0, %v407_v12 }
  0x24   : > { %v417_v22 = vmul.f32 %v923_v0, %v408_v13  ;;  %v418_v23 = vmul.f32 %v923_v0, %v409_v14  ;;  %v419_v24 = vmul.f32 %v923_v0, %v410_v15  ;;  %v420_v25 = vmul.f32 %v923_v0, %v411_v16 }
  0x25   : > { %v421_v26 = vmul.f32 %v923_v0, %v412_v17  ;;  %v422_v27 = vmul.f32 %v923_v0, %v413_v18  ;;  %v423_v28 = vmul.f32 %v923_v0, %v414_v19  ;;  %v424_v29 = vmul.f32 %v923_v0, %v415_v20 }
  0x26   : > { %v1024_v32 = vadd.f32 %v934_v39, %v416_v21  ;;  %v1027_v33 = vadd.f32 %v934_v39, %v417_v22  ;;  %v1030_v34 = vadd.f32 %v934_v39, %v418_v23  ;;  %v1033_v35 = vadd.f32 %v934_v39, %v419_v24 }
  0x27   : > { %v1039_v40 = vadd.f32 %v934_v39, %v420_v25  ;;  %v1042_v41 = vadd.f32 %v934_v39, %v421_v26  ;;  %v1045_v42 = vadd.f32 %v934_v39, %v422_v27  ;;  %v1048_v43 = vadd.f32 %v934_v39, %v423_v28 }
  0x28   : > { %v1054_v47 = vadd.f32 %v934_v39, %v424_v29  ;;  %v450_v51 = vunpack.c.l.bf16 %v434_v30  ;;  %v451_v60 = vunpack.c.l.bf16 %v435_v31  ;;  %v452_v2 = vunpack.c.h.bf16 %v434_v30 }
  0x29   : > { %1282 = vst [vmem:[#allocation3_spill] sm:$0xff] %v1039_v40  ;;  %1283 = vst [vmem:[#allocation4_spill] sm:$0xff] %v1042_v41  ;;  %v453_v8 = vunpack.c.l.bf16 %v437_v36  ;;  %v454_v9 = vunpack.c.l.bf16 %v438_v37  ;;  %v455_v12 = vunpack.c.l.bf16 %v439_v38  ;;  %v456_v13 = vunpack.c.h.bf16 %v438_v37 }
  0x2a   : > { %1284 = vst [vmem:[#allocation5_spill] sm:$0xff] %v1045_v42  ;;  %1285 = vst [vmem:[#allocation6_spill] sm:$0xff] %v1048_v43  ;;  %v457_v14 = vunpack.c.l.bf16 %v441_v44  ;;  %v458_v15 = vunpack.c.l.bf16 %v442_v45  ;;  %v459_v16 = vunpack.c.l.bf16 %v443_v46  ;;  %v460_v17 = vunpack.c.h.bf16 %v442_v45 }
  0x2b   : > { %1286 = vst [vmem:[#allocation7_spill] sm:$0xff] %v1054_v47  ;;  %v461_v18 = vunpack.c.l.bf16 %v445_v48  ;;  %v462_v19 = vunpack.c.l.bf16 %v446_v49  ;;  %v463_v20 = vunpack.c.l.bf16 %v447_v50  ;;  %v464_v21 = vunpack.c.h.bf16 %v446_v49 }
  0x2c   : > { %v465_v22 = vunpack.c.l.bf16 %v449_v3  ;;  %v466_v23 = vmul.f32 %v923_v0, %v450_v51  ;;  %v467_v24 = vmul.f32 %v923_v0, %v451_v60  ;;  %v468_v25 = vmul.f32 %v923_v0, %v452_v2 }
  0x2d   : > { %v469_v26 = vmul.f32 %v923_v0, %v453_v8  ;;  %v470_v27 = vmul.f32 %v923_v0, %v454_v9  ;;  %v471_v28 = vmul.f32 %v923_v0, %v455_v12  ;;  %v472_v29 = vmul.f32 %v923_v0, %v456_v13  ;;  %v498_v9 = vld [vmem:[%s306_s15] ss:$8 sps:$4 sm:$0xff]   ;;  %v500_v12 = vld [vmem:[%s306_s15 + $0x10] ss:$8 sps:$4 sm:$0xff]  }
  0x2e   : > { %v473_v30 = vmul.f32 %v923_v0, %v457_v14  ;;  %v474_v31 = vmul.f32 %v923_v0, %v458_v15  ;;  %v475_v36 = vmul.f32 %v923_v0, %v459_v16  ;;  %v476_v37 = vmul.f32 %v923_v0, %v460_v17  ;;  %v502_v17 = vld [vmem:[%s306_s15 + $0x20] ss:$8 sps:$4 sm:$0xff]  }
  0x2f   : > { %v477_v38 = vmul.f32 %v923_v0, %v461_v18  ;;  %v478_v44 = vmul.f32 %v923_v0, %v462_v19  ;;  %v479_v45 = vmul.f32 %v923_v0, %v463_v20  ;;  %v480_v46 = vmul.f32 %v923_v0, %v464_v21  ;;  %v504_v18 = vld [vmem:[%s306_s15 + $0x30] ss:$8 sps:$4 sm:$0xff]  }
  0x30   : > { %v481_v48 = vmul.f32 %v923_v0, %v465_v22  ;;  %v1081_v49 = vadd.f32 %v934_v39, %v466_v23  ;;  %v1084_v50 = vadd.f32 %v934_v39, %v467_v24  ;;  %v1087_v51 = vadd.f32 %v934_v39, %v468_v25 }
  0x31   : > { %v1090_v60 = vadd.f32 %v934_v39, %v469_v26  ;;  %v1093_v2 = vadd.f32 %v934_v39, %v470_v27  ;;  %v1096_v3 = vadd.f32 %v934_v39, %v471_v28  ;;  %v1099_v8 = vadd.f32 %v934_v39, %v472_v29 }
  0x32   : > { %v1102_v13 = vadd.f32 %v934_v39, %v473_v30  ;;  %v1105_v14 = vadd.f32 %v934_v39, %v474_v31  ;;  %v1108_v15 = vadd.f32 %v934_v39, %v475_v36  ;;  %v1111_v16 = vadd.f32 %v934_v39, %v476_v37 }
  0x33   : > { %v1114_v19 = vadd.f32 %v934_v39, %v477_v38  ;;  %v1117_v20 = vadd.f32 %v934_v39, %v478_v44  ;;  %v1120_v21 = vadd.f32 %v934_v39, %v479_v45  ;;  %v1123_v22 = vadd.f32 %v934_v39, %v480_v46 }
  0x34   : > { %v1126_v23 = vadd.f32 %v934_v39, %v481_v48  ;;  %v506_v24 = vunpack.c.l.bf16 %v498_v9  ;;  %v507_v25 = vunpack.c.h.bf16 %v498_v9  ;;  %v508_v26 = vunpack.c.l.bf16 %v500_v12 }
  0x35   : > { %v509_v27 = vunpack.c.h.bf16 %v500_v12  ;;  %v510_v28 = vunpack.c.l.bf16 %v502_v17  ;;  %v511_v29 = vunpack.c.h.bf16 %v502_v17  ;;  %v512_v30 = vunpack.c.l.bf16 %v504_v18 }
  0x36   : > { %v513_v31 = vunpack.c.h.bf16 %v504_v18  ;;  %v514_v36 = vmul.f32 %v923_v0, %v506_v24  ;;  %v515_v37 = vmul.f32 %v923_v0, %v507_v25  ;;  %v516_v38 = vmul.f32 %v923_v0, %v508_v26 }
  0x37   : > { %v517_v44 = vmul.f32 %v923_v0, %v509_v27  ;;  %v518_v45 = vmul.f32 %v923_v0, %v510_v28  ;;  %v519_v46 = vmul.f32 %v923_v0, %v511_v29  ;;  %v520_v48 = vmul.f32 %v923_v0, %v512_v30 }
  0x38   : > { %v521_v9 = vmul.f32 %v923_v0, %v513_v31  ;;  %v522_v12 = vadd.f32 %v934_v39, %v514_v36  ;;  %v523_v17 = vadd.f32 %v934_v39, %v515_v37  ;;  %v524_v18 = vadd.f32 %v934_v39, %v516_v38 }
  0x39   : > { %v525_v24 = vadd.f32 %v934_v39, %v517_v44  ;;  %v526_v25 = vadd.f32 %v934_v39, %v518_v45  ;;  %v527_v26 = vadd.f32 %v934_v39, %v519_v46  ;;  %v528_v27 = vadd.f32 %v934_v39, %v520_v48 }
  0x3a   : > { %v529_v28 = vadd.f32 %v934_v39, %v521_v9  ;;  %v530_v29 = vmax.f32 %v953_v52, %v1024_v32  ;;  %v531_v0 = vmax.f32 %v959_v54, %v1027_v33  ;;  %v532_v30 = vmax.f32 %v965_v56, %v1030_v34 }
  0x3b   : > { %v533_v31 = vmax.f32 %v971_v58, %v1033_v35  ;;  %v534_v36 = vmax.f32 %v977_v61, %v1039_v40  ;;  %v535_v37 = vmax.f32 %v983_v63, %v1042_v41  ;;  %v536_v39 = vmax.f32 %v989_v4, %v1045_v42 }
  0x3c   : > { %v537_v32 = vmax.f32 %v995_v6, %v1048_v43  ;;  %v555_v38 = vrot.slane %v953_v52, 1  ;;  %v556_v44 = vrot.slane %v956_v53, 1  ;;  %v558_v45 = vrot.slane %v959_v54, 1 }
  0x3d   : > { %v559_v46 = vrot.slane %v962_v55, 1  ;;  %v561_v48 = vrot.slane %v965_v56, 1  ;;  %v562_v9 = vrot.slane %v968_v57, 1  ;;  %v564_v11 = vrot.slane %v971_v58, 1 }
  0x3e   : > { %v557_v47 = vsel %vm554_vm0, %v555_v38, %v556_v44  ;;  %v565_v42 = vrot.slane %v974_v59, 1  ;;  %v567_v43 = vrot.slane %v977_v61, 1  ;;  %v568_v52 = vrot.slane %v980_v62, 1 }
  0x3f   : > { %v1172_v53 = vsel %vm554_vm0, %v558_v45, %v559_v46  ;;  %v1175_v41 = vsel %vm554_vm0, %v561_v48, %v562_v9  ;;  %v570_v55 = vrot.slane %v983_v63, 1  ;;  %v571_v57 = vrot.slane %v986_v1, 1 }
  0x40   : > { %v1180_v40 = vsel %vm554_vm0, %v564_v11, %v565_v42  ;;  %v1183_v38 = vsel %vm554_vm0, %v567_v43, %v568_v52  ;;  %v573_v59 = vrot.slane %v989_v4, 1  ;;  %v574_v62 = vrot.slane %v992_v5, 1 }
  0x41   : > { %v1188_v44 = vsel %vm554_vm0, %v570_v55, %v571_v57  ;;  %v576_v45 = vrot.slane %v995_v6, 1  ;;  %v577_v46 = vrot.slane %v998_v7, 1  ;;  %v587_v48 = vmax.f32 %v530_v29, %v557_v47 }
  0x42   : > { %v1193_v1 = vsel %vm554_vm0, %v573_v59, %v574_v62  ;;  %v588_v11 = vmax.f32 %v531_v0, %v1172_v53  ;;  %v589_v42 = vmax.f32 %v532_v30, %v1175_v41  ;;  %v590_v43 = vmax.f32 %v533_v31, %v1180_v40 }
  0x43   : > { %v1199_v9 = vsel %vm554_vm0, %v576_v45, %v577_v46  ;;  %v591_v5 = vmax.f32 %v534_v36, %v1183_v38  ;;  %v592_v52 = vmax.f32 %v535_v37, %v1188_v44  ;;  %v593_v55 = vmax.f32 %v536_v39, %v1193_v1 }
  0x44   : > { %v594_v7 = vmax.f32 %v537_v32, %v1199_v9  ;;  %v595_v47 = vmax.f32 %v587_v48, %v1081_v49  ;;  %v596_v29 = vmax.f32 %v588_v11, %v1087_v51  ;;  %v597_v0 = vmax.f32 %v589_v42, %v1093_v2 }
  0x45   : > { %v598_v30 = vmax.f32 %v590_v43, %v1099_v8  ;;  %v599_v31 = vmax.f32 %v591_v5, %v1105_v14  ;;  %v600_v57 = vmax.f32 %v592_v52, %v1111_v16  ;;  %v601_v36 = vmax.f32 %v593_v55, %v1117_v20 }
  0x46   : > { %v602_v37 = vmax.f32 %v594_v7, %v1123_v22  ;;  %v603_v59 = vmax.f32 %v595_v47, %v522_v12  ;;  %v604_v39 = vmax.f32 %v596_v29, %v523_v17  ;;  %v605_v62 = vmax.f32 %v597_v0, %v524_v18 }
  0x47   : > { %v606_v32 = vmax.f32 %v598_v30, %v525_v24  ;;  %v607_v45 = vmax.f32 %v599_v31, %v526_v25  ;;  %v608_v46 = vmax.f32 %v600_v57, %v527_v26  ;;  %v609_v48 = vmax.f32 %v601_v36, %v528_v27 }
  0x48   : > { %v610_v11 = vmax.f32 %v602_v37, %v529_v28  ;;  %v627_v42 = vrot.slane %v1081_v49, 1  ;;  %v628_v43 = vrot.slane %v1084_v50, 1  ;;  %v630_v5 = vrot.slane %v1087_v51, 1 }
  0x49   : > { %v631_v52 = vrot.slane %v1090_v60, 1  ;;  %v633_v55 = vrot.slane %v1093_v2, 1  ;;  %v634_v7 = vrot.slane %v1096_v3, 1  ;;  %v636_v12 = vrot.slane %v1099_v8, 1 }
  0x4a   : > { %v629_v17 = vsel %vm554_vm0, %v627_v42, %v628_v43  ;;  %v637_v18 = vrot.slane %v1102_v13, 1  ;;  %v639_v24 = vrot.slane %v1105_v14, 1  ;;  %v640_v49 = vrot.slane %v1108_v15, 1  ;;  %v1291_v42 = vld [vmem:[#allocation7_spill] sm:$0xff]  ;;  %v1292_v43 = vld [vmem:[#allocation2_spill] sm:$0xff] }
  0x4b   : > { %v632_v50 = vsel %vm554_vm0, %v630_v5, %v631_v52  ;;  %v635_v51 = vsel %vm554_vm0, %v633_v55, %v634_v7  ;;  %v642_v60 = vrot.slane %v1111_v16, 1  ;;  %v643_v2 = vrot.slane %v1114_v19, 1 }
  0x4c   : > { %v638_v3 = vsel %vm554_vm0, %v636_v12, %v637_v18  ;;  %v641_v8 = vsel %vm554_vm0, %v639_v24, %v640_v49  ;;  %v645_v25 = vrot.slane %v1117_v20, 1  ;;  %v646_v13 = vrot.slane %v1120_v21, 1 }
  0x4d   : > { %v644_v14 = vsel %vm554_vm0, %v642_v60, %v643_v2  ;;  %v648_v15 = vrot.slane %v1123_v22, 1  ;;  %v649_v26 = vrot.slane %v1126_v23, 1  ;;  %v659_v27 = vmax.f32 %v603_v59, %v629_v17 }
  0x4e   : > { %v647_v28 = vsel %vm554_vm0, %v645_v25, %v646_v13  ;;  %v660_v16 = vmax.f32 %v604_v39, %v632_v50  ;;  %v661_v47 = vmax.f32 %v605_v62, %v635_v51  ;;  %v662_v19 = vmax.f32 %v606_v32, %v638_v3 }
  0x4f   : > { %v650_v29 = vsel %vm554_vm0, %v648_v15, %v649_v26  ;;  %v663_v0 = vmax.f32 %v607_v45, %v641_v8  ;;  %v664_v30 = vmax.f32 %v608_v46, %v644_v14  ;;  %v665_v31 = vmax.f32 %v609_v48, %v647_v28 }
  0x50   : > { %v666_v20 = vmax.f32 %v610_v11, %v650_v29  ;;  %v667_v21 = vmax.f32 %v659_v27, %v959_v54  ;;  %v668_v57 = vmax.f32 %v660_v16, %v965_v56  ;;  %v669_v22 = vmax.f32 %v661_v47, %v971_v58  ;;  %v1287_v56 = vld [vmem:[#allocation3_spill] sm:$0xff]  ;;  %v1288_v58 = vld [vmem:[#allocation4_spill] sm:$0xff]  ;;  %v1290_v11 = vld [vmem:[#allocation6_spill] sm:$0xff] }
  0x51   : > { %v670_v23 = vmax.f32 %v662_v19, %v977_v61  ;;  %v671_v36 = vmax.f32 %v663_v0, %v983_v63  ;;  %v672_v37 = vmax.f32 %v664_v30, %v989_v4  ;;  %v673_v59 = vmax.f32 %v665_v31, %v995_v6  ;;  %v1289_v61 = vld [vmem:[#allocation5_spill] sm:$0xff] }
  0x52   : > { %v674_v39 = vmax.f32 %v666_v20, %v1001_v10  ;;  %v675_v62 = vmax.f32 %v667_v21, %v1027_v33  ;;  %v676_v32 = vmax.f32 %v668_v57, %v1030_v34  ;;  %v677_v54 = vmax.f32 %v669_v22, %v1033_v35 }
  0x53   : > { %v678_v45 = vmax.f32 %v670_v23, %v1287_v56  ;;  %v679_v46 = vmax.f32 %v671_v36, %v1288_v58  ;;  %v680_v48 = vmax.f32 %v672_v37, %v1289_v61  ;;  %v681_v63 = vmax.f32 %v673_v59, %v1290_v11 }
  0x54   : > { %v682_v4 = vmax.f32 %v674_v39, %v1291_v42  ;;  %v685_v6 = vrot.slane %v1001_v10, 1  ;;  %v686_v5 = vrot.slane %v1292_v43, 1  ;;  %v689_v33 = vmax.f32 %v675_v62, %v1172_v53 }
  0x55   : > { %v690_v34 = vmax.f32 %v676_v32, %v1175_v41  ;;  %v691_v35 = vmax.f32 %v677_v54, %v1180_v40  ;;  %v692_v52 = vmax.f32 %v678_v45, %v1183_v38  ;;  %v693_v55 = vmax.f32 %v679_v46, %v1188_v44 }
  0x56   : > { %v687_v7 = vsel %vm554_vm0, %v685_v6, %v686_v5  ;;  %v694_v12 = vmax.f32 %v680_v48, %v1193_v1  ;;  %v695_v17 = vmax.f32 %v681_v63, %v1199_v9  ;;  %v697_v10 = vmax.f32 %v689_v33, 0.0 }
  0x57   : > { %v696_v18 = vmax.f32 %v682_v4, %v687_v7  ;;  %v698_v24 = vmax.f32 %v690_v34, 0.0  ;;  %v699_v49 = vmax.f32 %v691_v35, 0.0  ;;  %v700_v53 = vmax.f32 %v692_v52, 0.0 }
  0x58   : > { %v701_v40 = vmax.f32 %v693_v55, 0.0  ;;  %v702_v41 = vmax.f32 %v694_v12, 0.0  ;;  %v703_v38 = vmax.f32 %v695_v17, 0.0 }
  0x59   : > { %v704_v50 = vmax.f32 %v696_v18, 0.0  ;;  %v831_v44 = vpack.c.bf16 %v698_v24, %v697_v10  ;;  %v836_v51 = vpack.c.bf16 %v700_v53, %v699_v49 }
  0x5a   : > { %v841_v60 = vpack.c.bf16 %v702_v41, %v701_v40 }
  0x5b   : > { %832 = vst [vmem:[%s311_s19] sm:$0xff] %v831_v44   ;;  %848 = vst [vmem:[%s311_s19 + $0x8] sm:$0xff] %v836_v51   ;;  %v846_v1 = vpack.c.bf16 %v704_v50, %v703_v38 }
  0x5c   : > { %849 = vst [vmem:[%s311_s19 + $0x10] sm:$0xff] %v841_v60  }
  0x5d   : > { %850 = vst [vmem:[%s311_s19 + $0x18] sm:$0xff] %v846_v1  }
  0x5e PF: > { %s16_s21 = sadd.s32 1, %s866_s21  }
  0x5f   : > { %p13_p4 = scmp.ge.s32.totalorder %s16_s21, 4  }
  0x61   :  { %15 = sbr.rel (!%p13_p4) target bundleno = 1 (0x1), region = 83 }

// kernel: frame_cnn_forward.9
= control target key start
LH: loop header
LB: loop body
LE: loop exit
PB: predicated region body
PF: predicated region fallthrough
CT: control target
= control target key end

     0   :  { %s140_s0 = inlined_call_operand.vmem [shape: bf16[32,128], index: 0, kind: input, shape index: {}]   ;;  %s141_s1 = inlined_call_operand.vmem [shape: f32[1,128], index: 1, kind: input, shape index: {}]   ;;  %s142_s2 = inlined_call_operand.vmem [shape: f32[1,128], index: 2, kind: input, shape index: {}]   ;;  %s143_s3 = inlined_call_operand.vmem [shape: bf16[32,128], index: 3, kind: output, shape index: {}]  }
   0x1   :  { %v83_v0 = vld [vmem:[%s140_s0] sm:$0xff]   ;;  %v100_v4 = vld [vmem:[%s140_s0 + $0x8] sm:$0xff]  }
   0x2   :  { %v72_v1 = vld [vmem:[%s141_s1] ss:$0 sm:$0xff]  ;;  %v84_v2 = vunpack.c.l.bf16 %v83_v0  ;;  %v85_v3 = vunpack.c.h.bf16 %v83_v0  ;;  %v88_v6 = vunpack.c.l.bf16 %v100_v4  ;;  %v89_v7 = vunpack.c.h.bf16 %v100_v4 }
   0x3   :  { %v73_v5 = vld [vmem:[%s142_s2] ss:$0 sm:$0xff] }
   0x4   :  { %v29_v8 = vmul.f32 %v84_v2, %v72_v1  ;;  %v30_v9 = vmul.f32 %v85_v3, %v72_v1  ;;  %v31_v10 = vmul.f32 %v88_v6, %v72_v1  ;;  %v32_v11 = vmul.f32 %v89_v7, %v72_v1 }
   0x6   :  { %v40_v12 = vadd.f32 %v73_v5, %v29_v8  ;;  %v41_v13 = vadd.f32 %v73_v5, %v30_v9  ;;  %v42_v14 = vadd.f32 %v73_v5, %v31_v10  ;;  %v43_v15 = vadd.f32 %v73_v5, %v32_v11 }
   0x8   :  { %v44_v16 = vmax.f32 %v40_v12, 0.0  ;;  %v45_v17 = vmax.f32 %v41_v13, 0.0  ;;  %v46_v18 = vmax.f32 %v42_v14, 0.0  ;;  %v47_v19 = vmax.f32 %v43_v15, 0.0 }
   0xa   :  { %v93_v20 = vpack.c.bf16 %v45_v17, %v44_v16  ;;  %v98_v21 = vpack.c.bf16 %v47_v19, %v46_v18 }
   0xc   :  { %94 = vst [vmem:[%s143_s3] sm:$0xff] %v93_v20   ;;  %101 = vst [vmem:[%s143_s3 + $0x8] sm:$0xff] %v98_v21  }

// kernel: frame_cnn_forward.8
= control target key start
LH: loop header
LB: loop body
LE: loop exit
PB: predicated region body
PF: predicated region fallthrough
CT: control target
= control target key end

     0   :  { %vm375_vm0 = vcmask 523264   ;;  %v788_v46 = vmov 0.0   ;;  %s984_s1 = inlined_call_operand.vmem [shape: bf16[576,128], index: 1, kind: input, shape index: {}]   ;;  %s985_s0 = inlined_call_operand.vmem [shape: bf16[32,576], index: 0, kind: input, shape index: {}]   ;;  %s986_s4 = inlined_call_operand.vmem [shape: f32[1,128], index: 4, kind: output, shape index: {1}]   ;;  %s987_s5 = inlined_call_operand.vmem [shape: f32[1,128], index: 5, kind: output, shape index: {2}]   ;;  %s988_s2 = inlined_call_operand.vmem [shape: f32[1,128], index: 2, kind: input, shape index: {}]   ;;  %s989_s3 = inlined_call_operand.vmem [shape: bf16[32,128], index: 3, kind: output, shape index: {0}]  }
   0x1   :  { %v738_v0 = vld [vmem:[%s984_s1 + $0x40] sm:$0xff]   ;;  %v742_v4 = vld [vmem:[%s984_s1 + $0x48] sm:$0xff]   ;;  %v746_v8 = vld [vmem:[%s984_s1 + $0x50] sm:$0xff]   ;;  %553 = vst [vmem:[%s986_s4] sm:$0x1] %v788_v46 }
   0x2   :  { %v739_v1 = vld [vmem:[%s984_s1] sm:$0xff]   ;;  %663 = vmatprep.subr.bf16.mxu0 %v738_v0  ;;  %v743_v5 = vld [vmem:[%s984_s1 + $0x8] sm:$0xff]   ;;  %v747_v9 = vld [vmem:[%s984_s1 + $0x10] sm:$0xff]   ;;  %554 = vst [vmem:[%s987_s5] sm:$0x1] %v788_v46 }
   0x3   :  { %v740_v2 = vld [vmem:[%s984_s1 + $0xc0] sm:$0xff]   ;;  %664 = vmatpush3.bf16.msra.mxu0 %v739_v1  ;;  %v744_v6 = vld [vmem:[%s984_s1 + $0xc8] sm:$0xff]   ;;  %v748_v10 = vld [vmem:[%s984_s1 + $0xd0] sm:$0xff]  }
   0x4   :  { %v741_v3 = vld [vmem:[%s984_s1 + $0x80] sm:$0xff]   ;;  %691 = vmatprep.subr.bf16.mxu1 %v740_v2  ;;  %665 = vmatprep.subr.bf16.mxu0 %v742_v4  ;;  %v745_v7 = vld [vmem:[%s984_s1 + $0x88] sm:$0xff]   ;;  %v749_v11 = vld [vmem:[%s984_s1 + $0x90] sm:$0xff]  }
   0x5   :  { %692 = vmatpush3.bf16.msra.mxu1 %v741_v3  ;;  %v750_v12 = vld [vmem:[%s984_s1 + $0x58] sm:$0xff]   ;;  %v754_v16 = vld [vmem:[%s984_s1 + $0x60] sm:$0xff]   ;;  %v758_v20 = vld [vmem:[%s984_s1 + $0x68] sm:$0xff]  }
   0x6   :  { %693 = vmatprep.subr.bf16.mxu1 %v744_v6  ;;  %v751_v13 = vld [vmem:[%s984_s1 + $0x18] sm:$0xff]   ;;  %v755_v17 = vld [vmem:[%s984_s1 + $0x20] sm:$0xff]   ;;  %v759_v21 = vld [vmem:[%s984_s1 + $0x28] sm:$0xff]  }
   0x7   :  { %666 = vmatpush3.bf16.msra.mxu0 %v743_v5  ;;  %v752_v14 = vld [vmem:[%s984_s1 + $0xd8] sm:$0xff]   ;;  %v756_v18 = vld [vmem:[%s984_s1 + $0xe0] sm:$0xff]   ;;  %v760_v22 = vld [vmem:[%s984_s1 + $0xe8] sm:$0xff]  }
   0x8   :  { %667 = vmatprep.subr.bf16.mxu0 %v746_v8  ;;  %v753_v15 = vld [vmem:[%s984_s1 + $0x98] sm:$0xff]   ;;  %v757_v19 = vld [vmem:[%s984_s1 + $0xa0] sm:$0xff]   ;;  %v761_v23 = vld [vmem:[%s984_s1 + $0xa8] sm:$0xff]  }
   0x9   :  { %694 = vmatpush3.bf16.msra.mxu1 %v745_v7  ;;  %v762_v24 = vld [vmem:[%s984_s1 + $0x70] sm:$0xff]   ;;  %v766_v28 = vld [vmem:[%s984_s1 + $0x78] sm:$0xff]   ;;  %v773_v34 = vld [vmem:[%s984_s1 + $0x100] sm:$0xff]  }
   0xa   :  { %695 = vmatprep.subr.bf16.mxu1 %v748_v10  ;;  %v763_v25 = vld [vmem:[%s984_s1 + $0x30] sm:$0xff]   ;;  %v767_v29 = vld [vmem:[%s984_s1 + $0x38] sm:$0xff]   ;;  %v776_v36 = vld [vmem:[%s985_s0 + $0xc] ss:$20 sps:$4 sm:$0xff]  }
   0xb   :  { %668 = vmatpush3.bf16.msra.mxu0 %v747_v9  ;;  %v764_v26 = vld [vmem:[%s984_s1 + $0xf0] sm:$0xff]   ;;  %v768_v30 = vld [vmem:[%s984_s1 + $0xf8] sm:$0xff]   ;;  %v777_v37 = vld [vmem:[%s984_s1 + $0x108] sm:$0xff]   ;;  %463 = vmatprep.mubr.bf16.mxu1 %v776_v36 }
   0xc   :  { %669 = vmatprep.subr.bf16.mxu0 %v750_v12  ;;  %v765_v27 = vld [vmem:[%s984_s1 + $0xb0] sm:$0xff]   ;;  %v771_v32 = vld [vmem:[%s985_s0 + $0x4] ss:$20 sps:$4 sm:$0xff]   ;;  %v774_v35 = vld [vmem:[%s985_s0 + $0x8] ss:$20 sps:$4 sm:$0xff]  }
   0xd   :  { %696 = vmatpush3.bf16.msra.mxu1 %v749_v11  ;;  %v769_v31 = vld [vmem:[%s985_s0] ss:$20 sps:$4 sm:$0xff]   ;;  %v772_v33 = vld [vmem:[%s984_s1 + $0xb8] sm:$0xff]   ;;  %414 = vmatprep.mubr.bf16.mxu0 %v771_v32  ;;  %v784_v42 = vld [vmem:[%s985_s0 + $0x30] ss:$20 sps:$4 sm:$0xff]  }
   0xe   :  { %697 = vmatprep.subr.bf16.mxu1 %v752_v14  ;;  %v778_v38 = vld [vmem:[%s985_s0 + $0x2c] ss:$20 sps:$4 sm:$0xff]   ;;  %v780_v39 = vld [vmem:[%s985_s0 + $0x28] ss:$20 sps:$4 sm:$0xff]   ;;  %v781_v40 = vld [vmem:[%s984_s1 + $0x110] sm:$0xff]  }
   0xf   :  { %670 = vmatpush3.bf16.msra.mxu0 %v751_v13  ;;  %v782_v41 = vld [vmem:[%s985_s0 + $0x34] ss:$20 sps:$4 sm:$0xff]   ;;  %v785_v43 = vld [vmem:[%s984_s1 + $0x118] sm:$0xff]   ;;  %v786_v44 = vld [vmem:[%s985_s0 + $0x10] ss:$20 sps:$4 sm:$0xff]  }
  0x10   :  { %671 = vmatprep.subr.bf16.mxu0 %v754_v16  ;;  %v787_v45 = vld [vmem:[%s985_s0 + $0x38] ss:$20 sps:$4 sm:$0xff]   ;;  %v595_v48 = vld [vmem:[%s988_s2] ss:$0 sm:$0xff] }
  0x11   :  { %698 = vmatpush3.bf16.msra.mxu1 %v753_v15 }
  0x12   :  { %699 = vmatprep.subr.bf16.mxu1 %v756_v18 }
  0x13   :  { %672 = vmatpush3.bf16.msra.mxu0 %v755_v17 }
  0x14   :  { %673 = vmatprep.subr.bf16.mxu0 %v758_v20 }
  0x15   :  { %700 = vmatpush3.bf16.msra.mxu1 %v757_v19 }
  0x16   :  { %701 = vmatprep.subr.bf16.mxu1 %v760_v22 }
  0x17   :  { %674 = vmatpush3.bf16.msra.mxu0 %v759_v21 }
  0x18   :  { %675 = vmatprep.subr.bf16.mxu0 %v762_v24 }
  0x19   :  { %702 = vmatpush3.bf16.msra.mxu1 %v761_v23 }
  0x1a   :  { %703 = vmatprep.subr.bf16.mxu1 %v764_v26 }
  0x1b   :  { %676 = vmatpush3.bf16.msra.mxu0 %v763_v25 }
  0x1c   :  { %677 = vmatprep.subr.bf16.mxu0 %v766_v28 }
  0x1d   :  { %704 = vmatpush3.bf16.msra.mxu1 %v765_v27 }
  0x1e   :  { %705 = vmatprep.subr.bf16.mxu1 %v768_v30 }
  0x1f   :  { %678 = vmatpush3.bf16.msra.mxu0 %v767_v29 }
  0x20   :  { %725 = vmatprep.subr.bf16.mxu0 %v773_v34 }
  0x21   :  { %706 = vmatpush3.bf16.msra.mxu1 %v772_v33 }
  0x22   :  { %415 = vmatmul.mubr.bf16.vlgmr.msra.gmra.mrb[0].mxu0 %v769_v31 }
  0x23   :  { %726 = vmatpush3.bf16.msra.mxu0 %v773_v34  ;;  %422 = vmatprep.mubr.bf16.mxu0 %v778_v38 }
  0x24   :  { %464 = vmatmul.mubr.bf16.vlgmr.msra.gmra.mrb[0].mxu1 %v774_v35  ;;  %727 = vmatprep.subr.bf16.mxu0 %v777_v37 }
  0x25   :  { %471 = vmatprep.mubr.bf16.mxu1 %v782_v41 }
  0x27   :  { %728 = vmatpush3.bf16.msra.mxu0 %v777_v37 }
  0x28   :  { %729 = vmatprep.subr.bf16.mxu0 %v781_v40 }
  0x2a   :  { %423 = vmatmul.mubr.bf16.gmra.mrb[4].mxu0 %v780_v39 }
  0x2b   :  { %733 = vmatprep.mubr.msk.bf16.mxu0 %vm375_vm0, %v786_v44  ;;  %730 = vmatpush3.bf16.msra.mxu0 %v781_v40 }
  0x2c   :  { %472 = vmatmul.mubr.bf16.gmra.mrb[4].mxu1 %v784_v42  ;;  %731 = vmatprep.subr.bf16.mxu0 %v785_v43 }
  0x2f   :  { %732 = vmatpush3.bf16.msra.mxu0 %v785_v43 }
  0x32   :  { %734 = vmatmul.mubr.msk.bf16.vlgmr.msra.gmra.mrb[8].mxu0 %vm375_vm0, %v787_v45  ;;  %v555_v45 = vld [vmem:[%s986_s4] sm:$0x1] }
  0xf5   :  { %v679_v47 = vpop.f32.mrb[0].mxu0 }
  0xf6   :  { %v680_v49 = vpop.f32.mrb[1].mxu0 }
  0xf7   :  { %v681_v50 = vadd.f32 %v680_v49, %v679_v47  ;;  %v682_v51 = vpop.f32.mrb[2].mxu0  ;;  %v707_v52 = vpop.f32.mrb[0].mxu1 }
  0xf8   :  { %v683_v53 = vpop.f32.mrb[3].mxu0  ;;  %v708_v56 = vpop.f32.mrb[1].mxu1 }
  0xf9   :  { %v417_v54 = vadd.f32 %v681_v50, %v595_v48  ;;  %v684_v55 = vadd.f32 %v683_v53, %v682_v51  ;;  %v709_v57 = vadd.f32 %v708_v56, %v707_v52  ;;  %v710_v58 = vpop.f32.mrb[2].mxu1 }
  0xfa   :  { %v711_v60 = vpop.f32.mrb[3].mxu1 }
  0xfb   :  { %v420_v59 = vadd.f32 %v684_v55, %v595_v48  ;;  %v712_v61 = vadd.f32 %v711_v60, %v710_v58  ;;  %v466_v62 = vadd.f32 %v709_v57, %v417_v54 }
  0xfd   :  { %v685_v63 = vpop.f32.mrb[4].mxu0  ;;  %v469_v1 = vadd.f32 %v712_v61, %v420_v59 }
  0xfe   :  { %v686_v0 = vpop.f32.mrb[5].mxu0 }
  0xff   :  { %v687_v2 = vadd.f32 %v686_v0, %v685_v63  ;;  %v688_v3 = vpop.f32.mrb[6].mxu0  ;;  %v713_v4 = vpop.f32.mrb[4].mxu1 }
 0x100   :  { %v689_v5 = vpop.f32.mrb[7].mxu0  ;;  %v714_v8 = vpop.f32.mrb[5].mxu1 }
 0x101   :  { %v425_v6 = vadd.f32 %v687_v2, %v595_v48  ;;  %v690_v7 = vadd.f32 %v689_v5, %v688_v3  ;;  %v715_v9 = vadd.f32 %v714_v8, %v713_v4  ;;  %v716_v10 = vpop.f32.mrb[6].mxu1 }
 0x102   :  { %v717_v12 = vpop.f32.mrb[7].mxu1 }
 0x103   :  { %v428_v11 = vadd.f32 %v690_v7, %v595_v48  ;;  %v718_v13 = vadd.f32 %v717_v12, %v716_v10  ;;  %v474_v14 = vadd.f32 %v715_v9, %v425_v6  ;;  %v567_v48 = vld [vmem:[%s987_s5] sm:$0x1] }
 0x105   :  { %v735_v15 = vpop.f32.mrb[8].mxu0  ;;  %v477_v16 = vadd.f32 %v718_v13, %v428_v11 }
 0x106   :  { %v523_v17 = vadd.f32 %v735_v15, %v474_v14  ;;  %v514_v18 = vpop.f32.mrb[9].mxu0 }
 0x107   :  { %v515_v19 = vadd.f32 %v514_v18, %v466_v62  ;;  %v736_v20 = vpop.f32.mrb[10].mxu0 }
 0x108   :  { %v526_v21 = vadd.f32 %v736_v20, %v477_v16  ;;  %v517_v22 = vpop.f32.mrb[11].mxu0  ;;  %v570_v29 = vmul.f32 %v523_v17, %v523_v17 }
 0x109   :  { %v518_v23 = vadd.f32 %v517_v22, %v469_v1  ;;  %v568_v25 = vmul.f32 %v515_v19, %v515_v19 }
 0x10a   :  { %v660_v24 = vpack.c.bf16 %v526_v21, %v523_v17  ;;  %v571_v32 = vmul.f32 %v526_v21, %v526_v21 }
 0x10b   :  { %v655_v26 = vpack.c.bf16 %v518_v23, %v515_v19  ;;  %v556_v27 = vadd.f32 %v518_v23, %v515_v19  ;;  %v569_v28 = vmul.f32 %v518_v23, %v518_v23 }
 0x10c   :  { %662 = vst [vmem:[%s989_s3 + $0x8] sm:$0xff] %v660_v24  }
 0x10d   :  { %656 = vst [vmem:[%s989_s3] sm:$0xff] %v655_v26   ;;  %v557_v30 = vadd.f32 %v556_v27, %v523_v17  ;;  %v572_v31 = vadd.f32 %v569_v28, %v568_v25 }
 0x10f   :  { %v558_v33 = vadd.f32 %v557_v30, %v526_v21  ;;  %v573_v34 = vadd.f32 %v572_v31, %v570_v29 }
 0x111   :  { %v559_v35 = vrot.slane %v558_v33, 4  ;;  %v574_v36 = vadd.f32 %v573_v34, %v571_v32 }
 0x113   :  { %v560_v37 = vadd.f32 %v559_v35, %v558_v33  ;;  %v575_v38 = vrot.slane %v574_v36, 4 }
 0x115   :  { %v561_v39 = vrot.slane %v560_v37, 2  ;;  %v576_v40 = vadd.f32 %v575_v38, %v574_v36 }
 0x117   :  { %v562_v41 = vadd.f32 %v561_v39, %v560_v37  ;;  %v577_v42 = vrot.slane %v576_v40, 2 }
 0x119   :  { %v563_v43 = vrot.slane %v562_v41, 1  ;;  %v578_v44 = vadd.f32 %v577_v42, %v576_v40 }
 0x11b   :  { %v564_v46 = vadd.f32 %v563_v43, %v562_v41  ;;  %v579_v47 = vrot.slane %v578_v44, 1 }
 0x11d   :  { %v565_v49 = vadd.f32 %v564_v46, %v555_v45  ;;  %v580_v50 = vadd.f32 %v579_v47, %v578_v44 }
 0x11f   :  { %566 = vst [vmem:[%s986_s4] sm:$0x1] %v565_v49  ;;  %v581_v51 = vadd.f32 %v580_v50, %v567_v48 }
 0x121   :  { %582 = vst [vmem:[%s987_s5] sm:$0x1] %v581_v51 }

// kernel: frame_cnn_forward.11
= control target key start
LH: loop header
LB: loop body
LE: loop exit
PB: predicated region body
PF: predicated region fallthrough
CT: control target
= control target key end

     0   :  { %v29_v1 = vlaneseq  ;;  %v398_v4 = vmov 0.0   ;;  %vm58_vm0 = vcmask 64512   ;;  %s664_s0 = inlined_call_operand.vmem [shape: bf16[8,256], index: 0, kind: input, shape index: {}]   ;;  %s665_s1 = inlined_call_operand.vmem [shape: f32[1,256], index: 1, kind: input, shape index: {}]   ;;  %s666_s2 = inlined_call_operand.vmem [shape: f32[1,256], index: 2, kind: input, shape index: {}]   ;;  %s667_s3 = inlined_call_operand.vmem [shape: f32[2,8], index: 3, kind: input, shape index: {}]   ;;  %s668_s4 = inlined_call_operand.vmem [shape: f32[256,256], index: 4, kind: input, shape index: {}]   ;;  %s669_s5 = inlined_call_operand.vmem [shape: f32[1,256], index: 5, kind: input, shape index: {}]   ;;  %s670_s6 = inlined_call_operand.hbm [shape: f32[2,256], index: 6, kind: output, shape index: {}]  }
   0x1   :  { %v24_v0 = vld [vmem:[%s664_s0] sm:$0xff]  ;;  %126 = vmatprep.mubr.f32.mxu0 %v398_v4  ;;  %v134_v5 = vld [vmem:[%s668_s4 + $0x8] sm:$0xff]  ;;  %v136_v6 = vld [vmem:[%s668_s4 + $0x18] sm:$0xff] }
   0x2   :  { %v27_v2 = vld [vmem:[%s665_s1] sm:$0x3]  ;;  %v30_v7 = vshrl.u32 %v29_v1, 7  ;;  %v308_v8 = vpack.c.bf16 %v136_v6, %v134_v5  ;;  %v135_v10 = vld [vmem:[%s668_s4 + $0x10] sm:$0xff]  ;;  %v138_v11 = vld [vmem:[%s668_s4 + $0x28] sm:$0xff]  ;;  %v26_v12 = vunpack.c.h.bf16 %v24_v0  ;;  %v25_v18 = vunpack.c.l.bf16 %v24_v0 }
   0x3   :  { %v41_v3 = vld [vmem:[%s666_s2] sm:$0x3]  ;;  %v140_v14 = vld [vmem:[%s668_s4 + $0x38] sm:$0xff]  ;;  %v139_v16 = vld [vmem:[%s668_s4 + $0x30] sm:$0xff] }
   0x4   :  { %v133_v9 = vld [vmem:[%s668_s4] sm:$0xff]  ;;  %v468_v17 = vsub.s32 1, %v30_v7  ;;  %v470_v19 = vsub.s32 0, %v30_v7  ;;  %309 = vmatprep.subr.bf16.mxu1 %v308_v8  ;;  %v312_v20 = vpack.c.bf16 %v140_v14, %v138_v11  ;;  %v142_v21 = vld [vmem:[%s668_s4 + $0x48] sm:$0xff]  ;;  %v144_v22 = vld [vmem:[%s668_s4 + $0x58] sm:$0xff] }
   0x5   :  { %v310_v13 = vpack.c.bf16 %v135_v10, %v133_v9  ;;  %v137_v15 = vld [vmem:[%s668_s4 + $0x20] sm:$0xff]  ;;  %v316_v24 = vpack.c.bf16 %v144_v22, %v142_v21  ;;  %v143_v30 = vld [vmem:[%s668_s4 + $0x50] sm:$0xff]  ;;  %v146_v31 = vld [vmem:[%s668_s4 + $0x68] sm:$0xff] }
   0x6   :  { %v314_v23 = vpack.c.bf16 %v139_v16, %v137_v15  ;;  %v36_v25 = vrot.slane %v27_v2, %v468_v17  ;;  %v50_v26 = vrot.slane %v41_v3, %v468_v17  ;;  %v32_v27 = vrot.slane %v27_v2, %v470_v19  ;;  %v141_v29 = vld [vmem:[%s668_s4 + $0x40] sm:$0xff]  ;;  %v148_v32 = vld [vmem:[%s668_s4 + $0x78] sm:$0xff]  ;;  %v147_v40 = vld [vmem:[%s668_s4 + $0x70] sm:$0xff] }
   0x7   :  { %311 = vmatpush1.bf16.msra.mxu1 %v310_v13  ;;  %v46_v28 = vrot.slane %v41_v3, %v470_v19  ;;  %v318_v35 = vpack.c.bf16 %v143_v30, %v141_v29  ;;  %v320_v38 = vpack.c.bf16 %v148_v32, %v146_v31  ;;  %v145_v39 = vld [vmem:[%s668_s4 + $0x60] sm:$0xff]  ;;  %v150_v41 = vld [vmem:[%s668_s4 + $0x88] sm:$0xff]  ;;  %v152_v42 = vld [vmem:[%s668_s4 + $0x98] sm:$0xff] }
   0x8   :  { %313 = vmatprep.subr.bf16.mxu1 %v312_v20  ;;  %v40_v33 = vmul.f32 %v36_v25, %v26_v12  ;;  %v39_v34 = vmul.f32 %v32_v27, %v25_v18  ;;  %v57_v45 = vld [vmem:[%s667_s3] sm:$0x3]  ;;  %v322_v46 = vpack.c.bf16 %v147_v40, %v145_v39  ;;  %v324_v47 = vpack.c.bf16 %v152_v42, %v150_v41  ;;  %v151_v49 = vld [vmem:[%s668_s4 + $0x90] sm:$0xff]  ;;  %v154_v50 = vld [vmem:[%s668_s4 + $0xa8] sm:$0xff] }
   0x9   :  { %v149_v48 = vld [vmem:[%s668_s4 + $0x80] sm:$0xff]  ;;  %v156_v51 = vld [vmem:[%s668_s4 + $0xb8] sm:$0xff]  ;;  %v155_v55 = vld [vmem:[%s668_s4 + $0xb0] sm:$0xff] }
   0xa   :  { %v54_v36 = vadd.f32 %v50_v26, %v40_v33  ;;  %v53_v37 = vadd.f32 %v46_v28, %v39_v34  ;;  %v326_v52 = vpack.c.bf16 %v151_v49, %v149_v48  ;;  %v328_v53 = vpack.c.bf16 %v156_v51, %v154_v50  ;;  %v153_v54 = vld [vmem:[%s668_s4 + $0xa0] sm:$0xff]  ;;  %v158_v56 = vld [vmem:[%s668_s4 + $0xc8] sm:$0xff]  ;;  %v160_v57 = vld [vmem:[%s668_s4 + $0xd8] sm:$0xff] }
   0xb   :  { %315 = vmatpush1.bf16.msra.mxu1 %v314_v23  ;;  %v330_v58 = vpack.c.bf16 %v155_v55, %v153_v54  ;;  %v332_v59 = vpack.c.bf16 %v160_v57, %v158_v56  ;;  %v157_v60 = vld [vmem:[%s668_s4 + $0xc0] sm:$0xff]  ;;  %v159_v61 = vld [vmem:[%s668_s4 + $0xd0] sm:$0xff] }
   0xc   :  { %317 = vmatprep.subr.bf16.mxu1 %v316_v24  ;;  %v56_v43 = vmax.f32 %v54_v36, 0.0  ;;  %v55_v44 = vmax.f32 %v53_v37, 0.0 }
   0xe   :  { %62 = vmatprep.subr.mxu0 %v56_v43 }
   0xf   :  { %319 = vmatpush1.bf16.msra.mxu1 %v318_v35  ;;  %63 = vmatpush1.msra.mxu0 %v55_v44 }
  0x10   :  { %321 = vmatprep.subr.bf16.mxu1 %v320_v38  ;;  %306 = vmatmul.mubr.msk.f32.vlgmr.msra.gmra.mrb[0].mxu0 %vm58_vm0, %v57_v45 }
  0x13   :  { %323 = vmatpush1.bf16.msra.mxu1 %v322_v46 }
  0x14   :  { %325 = vmatprep.subr.bf16.mxu1 %v324_v47 }
  0x17   :  { %327 = vmatpush1.bf16.msra.mxu1 %v326_v52 }
  0x18   :  { %329 = vmatprep.subr.bf16.mxu1 %v328_v53 }
  0x19   :  { %11 = vsyncpa [#allocation3], 0  ;;  %v162_v62 = vld [vmem:[%s668_s4 + $0xe8] sm:$0xff]  ;;  %v164_v63 = vld [vmem:[%s668_s4 + $0xf8] sm:$0xff]  ;;  %v334_v0 = vpack.c.bf16 %v159_v61, %v157_v60  ;;  %s399_s20 = smov [#allocation2]  }
  0x1a   :  { %v336_v1 = vpack.c.bf16 %v164_v63, %v162_v62  ;;  %v161_v2 = vld [vmem:[%s668_s4 + $0xe0] sm:$0xff]  ;;  %v163_v3 = vld [vmem:[%s668_s4 + $0xf0] sm:$0xff]  ;;  %v166_v4 = vld [vmem:[%s668_s4 + $0x108] sm:$0xff]  ;;  %s298_s21 = sshll.u32 %s399_s20, 4  ;;  %s299_s21 = int_to_ptr.vmem [resolvable:$true] %s298_s21 }
  0x1b   :  { %331 = vmatpush1.bf16.msra.mxu1 %v330_v58  ;;  %v168_v5 = vld [vmem:[%s668_s4 + $0x118] sm:$0xff]  ;;  %v338_v6 = vpack.c.bf16 %v163_v3, %v161_v2  ;;  %v165_v8 = vld [vmem:[%s668_s4 + $0x100] sm:$0xff]  ;;  %v167_v9 = vld [vmem:[%s668_s4 + $0x110] sm:$0xff]  ;;  %p379_p1 = scmp.lt.s32.totalorder %s299_s21, %s299_s21 }
  0x1c   :  { %333 = vmatprep.subr.bf16.mxu1 %v332_v59  ;;  %v340_v7 = vpack.c.bf16 %v168_v5, %v166_v4  ;;  %v170_v10 = vld [vmem:[%s668_s4 + $0x128] sm:$0xff]  ;;  %v172_v11 = vld [vmem:[%s668_s4 + $0x138] sm:$0xff]  ;;  %v342_v12 = vpack.c.bf16 %v167_v9, %v165_v8  ;;  %v169_v14 = vld [vmem:[%s668_s4 + $0x120] sm:$0xff] }
  0x1d   :  { %v344_v13 = vpack.c.bf16 %v172_v11, %v170_v10  ;;  %v171_v15 = vld [vmem:[%s668_s4 + $0x130] sm:$0xff]  ;;  %v174_v16 = vld [vmem:[%s668_s4 + $0x148] sm:$0xff]  ;;  %v176_v18 = vld [vmem:[%s668_s4 + $0x158] sm:$0xff] }
  0x1e   :  { %v346_v20 = vpack.c.bf16 %v171_v15, %v169_v14  ;;  %v348_v21 = vpack.c.bf16 %v176_v18, %v174_v16  ;;  %v173_v22 = vld [vmem:[%s668_s4 + $0x140] sm:$0xff]  ;;  %v175_v23 = vld [vmem:[%s668_s4 + $0x150] sm:$0xff]  ;;  %v178_v24 = vld [vmem:[%s668_s4 + $0x168] sm:$0xff] }
  0x1f   :  { %335 = vmatpush1.bf16.msra.mxu1 %v334_v0  ;;  %v180_v25 = vld [vmem:[%s668_s4 + $0x178] sm:$0xff]  ;;  %v350_v26 = vpack.c.bf16 %v175_v23, %v173_v22  ;;  %v177_v28 = vld [vmem:[%s668_s4 + $0x160] sm:$0xff]  ;;  %v179_v29 = vld [vmem:[%s668_s4 + $0x170] sm:$0xff] }
  0x20   :  { %337 = vmatprep.subr.bf16.mxu1 %v336_v1  ;;  %v352_v27 = vpack.c.bf16 %v180_v25, %v178_v24  ;;  %v182_v30 = vld [vmem:[%s668_s4 + $0x188] sm:$0xff]  ;;  %v184_v31 = vld [vmem:[%s668_s4 + $0x198] sm:$0xff]  ;;  %v354_v32 = vpack.c.bf16 %v179_v29, %v177_v28  ;;  %v181_v34 = vld [vmem:[%s668_s4 + $0x180] sm:$0xff] }
  0x21   :  { %v356_v33 = vpack.c.bf16 %v184_v31, %v182_v30  ;;  %v183_v35 = vld [vmem:[%s668_s4 + $0x190] sm:$0xff]  ;;  %v186_v36 = vld [vmem:[%s668_s4 + $0x1a8] sm:$0xff]  ;;  %v188_v37 = vld [vmem:[%s668_s4 + $0x1b8] sm:$0xff] }
  0x22   :  { %v358_v38 = vpack.c.bf16 %v183_v35, %v181_v34  ;;  %v360_v39 = vpack.c.bf16 %v188_v37, %v186_v36  ;;  %v185_v40 = vld [vmem:[%s668_s4 + $0x1a0] sm:$0xff]  ;;  %v187_v41 = vld [vmem:[%s668_s4 + $0x1b0] sm:$0xff]  ;;  %v190_v42 = vld [vmem:[%s668_s4 + $0x1c8] sm:$0xff] }
  0x23   :  { %339 = vmatpush1.bf16.msra.mxu1 %v338_v6  ;;  %v192_v43 = vld [vmem:[%s668_s4 + $0x1d8] sm:$0xff]  ;;  %v362_v44 = vpack.c.bf16 %v187_v41, %v185_v40  ;;  %v189_v46 = vld [vmem:[%s668_s4 + $0x1c0] sm:$0xff]  ;;  %v191_v47 = vld [vmem:[%s668_s4 + $0x1d0] sm:$0xff] }
  0x24   :  { %341 = vmatprep.subr.bf16.mxu1 %v340_v7  ;;  %v364_v45 = vpack.c.bf16 %v192_v43, %v190_v42  ;;  %v194_v48 = vld [vmem:[%s668_s4 + $0x1e8] sm:$0xff]  ;;  %v196_v49 = vld [vmem:[%s668_s4 + $0x1f8] sm:$0xff]  ;;  %v366_v50 = vpack.c.bf16 %v191_v47, %v189_v46  ;;  %v193_v52 = vld [vmem:[%s668_s4 + $0x1e0] sm:$0xff] }
  0x25   :  { %v368_v51 = vpack.c.bf16 %v196_v49, %v194_v48  ;;  %v195_v53 = vld [vmem:[%s668_s4 + $0x1f0] sm:$0xff]  ;;  %v197_v57 = vld [vmem:[%s669_s5] sm:$0x3]  ;;  %s374_s4 = scalar_lea.vmem %s299_s21, 64 }
  0x26   :  { %v370_v54 = vpack.c.bf16 %v195_v53, %v193_v52  ;;  %v202_v58 = vrot.slane %v197_v57, %v470_v19  ;;  %v206_v59 = vrot.slane %v197_v57, %v468_v17  ;;  %p375_p0 = scmp.ne.s32.totalorder %s299_s21, %s374_s4  ;;  %p380_p2 = scmp.lt.s32.totalorder %s374_s4, %s374_s4 }
  0x27   :  { %343 = vmatpush1.bf16.msra.mxu1 %v342_v12 }
  0x28   :  { %345 = vmatprep.subr.bf16.mxu1 %v344_v13  ;;  %p381_p3 = por %p380_p2, %p379_p1 }
  0x2a   :  { %p382_p4 = pnand %p381_p3, %p375_p0 }
  0x2b   :  { %347 = vmatpush1.bf16.msra.mxu1 %v346_v20 }
  0x2c   :  { %349 = vmatprep.subr.bf16.mxu1 %v348_v21 }
  0x2f   :  { %351 = vmatpush1.bf16.msra.mxu1 %v350_v26 }
  0x30   :  { %353 = vmatprep.subr.bf16.mxu1 %v352_v27 }
  0x33   :  { %355 = vmatpush1.bf16.msra.mxu1 %v354_v32 }
  0x34   :  { %357 = vmatprep.subr.bf16.mxu1 %v356_v33 }
  0x37   :  { %359 = vmatpush1.bf16.msra.mxu1 %v358_v38 }
  0x38   :  { %361 = vmatprep.subr.bf16.mxu1 %v360_v39 }
  0x3b   :  { %363 = vmatpush1.bf16.msra.mxu1 %v362_v44 }
  0x3c   :  { %365 = vmatprep.subr.bf16.mxu1 %v364_v45 }
  0x3f   :  { %367 = vmatpush1.bf16.msra.mxu1 %v366_v50 }
  0x40   :  { %369 = vmatprep.subr.bf16.mxu1 %v368_v51 }
  0x43   :  { %371 = vmatpush1.bf16.msra.mxu1 %v370_v54 }
  0xe3   :  { %v128_v55 = vpop.f32.mrb[0].mxu0 }
  0xe4   :  { %v130_v56 = vpop.f32.mrb[1].mxu0 }
  0xe5   :  { %273 = vmatprep.mubr.f32.mxu1 %v130_v56 }
  0xe6   :  { %274 = vmatmul.mubr.f32.vlgmr.msra.gmra.mrb[0].mxu1 %v128_v55 }
 0x1b9   :  { %v275_v60 = vpop.f32.mrb[0].mxu1 }
 0x1ba   :  { %v276_v61 = vadd.f32 %v275_v60, %v202_v58  ;;  %v277_v62 = vpop.f32.mrb[1].mxu1 }
 0x1bb   :  { %v278_v63 = vadd.f32 %v277_v62, %v206_v59 }
 0x1bd   :  { %v282_v0 = vcombine.low %v276_v61, %v278_v63 }
 0x1bf   :  { %307 = vst.sshfl [vmem:[#allocation2] sm:$0x33 pattern:$0x76325410] %v282_v0 }
 0x1c0   :  { %385 = shalt.err (!%p382_p4)
}
 0x1c1   :  { %s386_s23 = scalar_lea.hbm %s670_s6, 64 }
 0x1c2   :  { %p387_p5 = scmp.ne.s32.totalorder %s670_s6, %s386_s23  ;;  %p390_p6 = scmp.lt.u32.totalorder %s386_s23, %s670_s6 }
 0x1c4   :  { %p392_p7 = pnand %p390_p6, %p387_p5 }
 0x1c6   :  { %395 = shalt.err (!%p392_p7)
}
 0x1c7   :  { %301 = dma.vmem_to_hbm [thread:$0]  %s299_s21, 64, %s670_s6, [#allocation3]  }
 0x1c8   :  { %396 = dma.done.wait [#allocation3], 64  }
 0x1c9   :  { %397 = vsyncadd [#allocation3], 4294967232 }
 0x1ca   :  { %305 = vsyncpa [#allocation3], 1 }

// kernel: frame_cnn_forward.10
= control target key start
LH: loop header
LB: loop body
LE: loop exit
PB: predicated region body
PF: predicated region fallthrough
CT: control target
= control target key end

     0   :  { %s2166_s1 = inlined_call_operand.vmem [shape: bf16[1152,256], index: 1, kind: input, shape index: {}]   ;;  %s2167_s0 = inlined_call_operand.vmem [shape: bf16[8,1152], index: 0, kind: input, shape index: {}]   ;;  %s2168_s4 = inlined_call_operand.vmem [shape: f32[1,256], index: 4, kind: output, shape index: {1}]   ;;  %s2169_s5 = inlined_call_operand.vmem [shape: f32[1,256], index: 5, kind: output, shape index: {2}]   ;;  %s2170_s2 = inlined_call_operand.vmem [shape: f32[1,256], index: 2, kind: input, shape index: {}]   ;;  %s2171_s3 = inlined_call_operand.vmem [shape: bf16[8,256], index: 3, kind: output, shape index: {0}]  }
   0x1   :  { %v1413_v0 = vld [vmem:[%s2166_s1 + $0x4] ss:$8 sps:$4 sm:$0xff]   ;;  %v1417_v2 = vld [vmem:[%s2166_s1] ss:$8 sps:$4 sm:$0xff]   ;;  %v1419_v4 = vld [vmem:[%s2166_s1 + $0x14] ss:$8 sps:$4 sm:$0xff]  }
   0x2   :  { %v1415_v1 = vld [vmem:[%s2166_s1 + $0x204] ss:$8 sps:$4 sm:$0xff]   ;;  %931 = vmatprep.subr.bf16.mxu1 %v1413_v0  ;;  %v1418_v3 = vld [vmem:[%s2166_s1 + $0x200] ss:$8 sps:$4 sm:$0xff]   ;;  %v1421_v5 = vld [vmem:[%s2166_s1 + $0x214] ss:$8 sps:$4 sm:$0xff]  }
   0x3   :  { %1013 = vmatprep.subr.bf16.mxu0 %v1415_v1  ;;  %932 = vmatpush1.bf16.msra.mxu1 %v1417_v2  ;;  %v1423_v6 = vld [vmem:[%s2166_s1 + $0x10] ss:$8 sps:$4 sm:$0xff]   ;;  %v1425_v8 = vld [vmem:[%s2166_s1 + $0x24] ss:$8 sps:$4 sm:$0xff]   ;;  %v1429_v10 = vld [vmem:[%s2166_s1 + $0x20] ss:$8 sps:$4 sm:$0xff]  }
   0x4   :  { %1014 = vmatpush1.bf16.msra.mxu0 %v1418_v3  ;;  %933 = vmatprep.subr.bf16.mxu1 %v1419_v4  ;;  %v1424_v7 = vld [vmem:[%s2166_s1 + $0x210] ss:$8 sps:$4 sm:$0xff]   ;;  %v1427_v9 = vld [vmem:[%s2166_s1 + $0x224] ss:$8 sps:$4 sm:$0xff]   ;;  %v1430_v11 = vld [vmem:[%s2166_s1 + $0x220] ss:$8 sps:$4 sm:$0xff]  }
   0x5   :  { %1015 = vmatprep.subr.bf16.mxu0 %v1421_v5  ;;  %v1431_v12 = vld [vmem:[%s2166_s1 + $0x34] ss:$8 sps:$4 sm:$0xff]   ;;  %v1435_v14 = vld [vmem:[%s2166_s1 + $0x30] ss:$8 sps:$4 sm:$0xff]   ;;  %v1437_v16 = vld [vmem:[%s2166_s1 + $0x44] ss:$8 sps:$4 sm:$0xff]  }
   0x6   :  { %v1433_v13 = vld [vmem:[%s2166_s1 + $0x234] ss:$8 sps:$4 sm:$0xff]   ;;  %v1436_v15 = vld [vmem:[%s2166_s1 + $0x230] ss:$8 sps:$4 sm:$0xff]   ;;  %v1439_v17 = vld [vmem:[%s2166_s1 + $0x244] ss:$8 sps:$4 sm:$0xff]  }
   0x7   :  { %934 = vmatpush1.bf16.msra.mxu1 %v1423_v6  ;;  %v1441_v18 = vld [vmem:[%s2166_s1 + $0x40] ss:$8 sps:$4 sm:$0xff]   ;;  %v1443_v20 = vld [vmem:[%s2166_s1 + $0x54] ss:$8 sps:$4 sm:$0xff]   ;;  %v1447_v22 = vld [vmem:[%s2166_s1 + $0x50] ss:$8 sps:$4 sm:$0xff]  }
   0x8   :  { %1016 = vmatpush1.bf16.msra.mxu0 %v1424_v7  ;;  %935 = vmatprep.subr.bf16.mxu1 %v1425_v8  ;;  %v1442_v19 = vld [vmem:[%s2166_s1 + $0x240] ss:$8 sps:$4 sm:$0xff]   ;;  %v1445_v21 = vld [vmem:[%s2166_s1 + $0x254] ss:$8 sps:$4 sm:$0xff]   ;;  %v1448_v23 = vld [vmem:[%s2166_s1 + $0x250] ss:$8 sps:$4 sm:$0xff]  }
   0x9   :  { %1017 = vmatprep.subr.bf16.mxu0 %v1427_v9  ;;  %v1449_v24 = vld [vmem:[%s2166_s1 + $0x64] ss:$8 sps:$4 sm:$0xff]   ;;  %v1453_v26 = vld [vmem:[%s2166_s1 + $0x60] ss:$8 sps:$4 sm:$0xff]   ;;  %v1455_v28 = vld [vmem:[%s2166_s1 + $0x74] ss:$8 sps:$4 sm:$0xff]  }
   0xa   :  { %v1451_v25 = vld [vmem:[%s2166_s1 + $0x264] ss:$8 sps:$4 sm:$0xff]   ;;  %v1454_v27 = vld [vmem:[%s2166_s1 + $0x260] ss:$8 sps:$4 sm:$0xff]   ;;  %v1457_v29 = vld [vmem:[%s2166_s1 + $0x274] ss:$8 sps:$4 sm:$0xff]  }
   0xb   :  { %936 = vmatpush1.bf16.msra.mxu1 %v1429_v10  ;;  %v1459_v30 = vld [vmem:[%s2166_s1 + $0x70] ss:$8 sps:$4 sm:$0xff]   ;;  %v1461_v32 = vld [vmem:[%s2166_s1 + $0x84] ss:$8 sps:$4 sm:$0xff]   ;;  %v1465_v34 = vld [vmem:[%s2166_s1 + $0x80] ss:$8 sps:$4 sm:$0xff]  }
   0xc   :  { %1018 = vmatpush1.bf16.msra.mxu0 %v1430_v11  ;;  %937 = vmatprep.subr.bf16.mxu1 %v1431_v12  ;;  %v1460_v31 = vld [vmem:[%s2166_s1 + $0x270] ss:$8 sps:$4 sm:$0xff]   ;;  %v1463_v33 = vld [vmem:[%s2166_s1 + $0x284] ss:$8 sps:$4 sm:$0xff]   ;;  %v1466_v35 = vld [vmem:[%s2166_s1 + $0x280] ss:$8 sps:$4 sm:$0xff]  }
   0xd   :  { %1019 = vmatprep.subr.bf16.mxu0 %v1433_v13  ;;  %v1467_v36 = vld [vmem:[%s2166_s1 + $0x94] ss:$8 sps:$4 sm:$0xff]   ;;  %v1471_v38 = vld [vmem:[%s2166_s1 + $0x90] ss:$8 sps:$4 sm:$0xff]   ;;  %v1473_v40 = vld [vmem:[%s2166_s1 + $0xa4] ss:$8 sps:$4 sm:$0xff]  }
   0xe   :  { %v1469_v37 = vld [vmem:[%s2166_s1 + $0x294] ss:$8 sps:$4 sm:$0xff]   ;;  %v1472_v39 = vld [vmem:[%s2166_s1 + $0x290] ss:$8 sps:$4 sm:$0xff]   ;;  %v1475_v41 = vld [vmem:[%s2166_s1 + $0x2a4] ss:$8 sps:$4 sm:$0xff]  }
   0xf   :  { %938 = vmatpush1.bf16.msra.mxu1 %v1435_v14  ;;  %v1477_v42 = vld [vmem:[%s2166_s1 + $0xa0] ss:$8 sps:$4 sm:$0xff]   ;;  %v1479_v44 = vld [vmem:[%s2166_s1 + $0xb4] ss:$8 sps:$4 sm:$0xff]   ;;  %v1483_v47 = vld [vmem:[%s2166_s1 + $0xb0] ss:$8 sps:$4 sm:$0xff]  }
  0x10   :  { %1020 = vmatpush1.bf16.msra.mxu0 %v1436_v15  ;;  %939 = vmatprep.subr.bf16.mxu1 %v1437_v16  ;;  %v1478_v43 = vld [vmem:[%s2166_s1 + $0x2a0] ss:$8 sps:$4 sm:$0xff]   ;;  %v1481_v45 = vld [vmem:[%s2166_s1 + $0x2b4] ss:$8 sps:$4 sm:$0xff]   ;;  %v1484_v49 = vld [vmem:[%s2166_s1 + $0x2b0] ss:$8 sps:$4 sm:$0xff]  }
  0x11   :  { %1021 = vmatprep.subr.bf16.mxu0 %v1439_v17  ;;  %v18_v46 = vld [vmem:[%s2167_s0] sm:$0xff]  ;;  %v20_v50 = vld [vmem:[%s2167_s0 + $0x10] sm:$0xff] }
  0x12   :  { %v1240_v48 = vcombine.high %v18_v46, %v18_v46  ;;  %v1485_v51 = vld [vmem:[%s2166_s1 + $0xc4] ss:$8 sps:$4 sm:$0xff]   ;;  %v1244_v53 = vcombine.high %v20_v50, %v20_v50  ;;  %v1489_v54 = vld [vmem:[%s2166_s1 + $0xc0] ss:$8 sps:$4 sm:$0xff]   ;;  %v1491_v56 = vld [vmem:[%s2166_s1 + $0xd4] ss:$8 sps:$4 sm:$0xff]   ;;  %v1239_v6 = vcombine.low %v18_v46, %v18_v46  ;;  %v1243_v7 = vcombine.low %v20_v50, %v20_v50 }
  0x13   :  { %940 = vmatpush1.bf16.msra.mxu1 %v1441_v18  ;;  %v1487_v52 = vld [vmem:[%s2166_s1 + $0x2c4] ss:$8 sps:$4 sm:$0xff]   ;;  %v1490_v55 = vld [vmem:[%s2166_s1 + $0x2c0] ss:$8 sps:$4 sm:$0xff]   ;;  %v1493_v57 = vld [vmem:[%s2166_s1 + $0x2d4] ss:$8 sps:$4 sm:$0xff]  }
  0x14   :  { %1022 = vmatpush1.bf16.msra.mxu0 %v1442_v19  ;;  %941 = vmatprep.subr.bf16.mxu1 %v1443_v20  ;;  %v1495_v58 = vld [vmem:[%s2166_s1 + $0xd0] ss:$8 sps:$4 sm:$0xff]   ;;  %v1497_v60 = vld [vmem:[%s2166_s1 + $0xe4] ss:$8 sps:$4 sm:$0xff]   ;;  %v1501_v62 = vld [vmem:[%s2166_s1 + $0xe0] ss:$8 sps:$4 sm:$0xff]  }
  0x15   :  { %1023 = vmatprep.subr.bf16.mxu0 %v1445_v21  ;;  %963 = vmatprep.mubr.bf16.mxu1 %v1240_v48  ;;  %v1496_v59 = vld [vmem:[%s2166_s1 + $0x2d0] ss:$8 sps:$4 sm:$0xff]   ;;  %v1499_v61 = vld [vmem:[%s2166_s1 + $0x2e4] ss:$8 sps:$4 sm:$0xff]   ;;  %v1502_v63 = vld [vmem:[%s2166_s1 + $0x2e0] ss:$8 sps:$4 sm:$0xff]  }
  0x16   :  { %1045 = vmatprep.mubr.bf16.mxu0 %v1244_v53  ;;  %v1503_v0 = vld [vmem:[%s2166_s1 + $0xf4] ss:$8 sps:$4 sm:$0xff]   ;;  %v1507_v2 = vld [vmem:[%s2166_s1 + $0xf0] ss:$8 sps:$4 sm:$0xff]   ;;  %v1513_v4 = vld [vmem:[%s2166_s1 + $0x104] ss:$8 sps:$4 sm:$0xff]  }
  0x17   :  { %942 = vmatpush1.bf16.msra.mxu1 %v1447_v22  ;;  %v1505_v1 = vld [vmem:[%s2166_s1 + $0x2f4] ss:$8 sps:$4 sm:$0xff]   ;;  %v1508_v3 = vld [vmem:[%s2166_s1 + $0x2f0] ss:$8 sps:$4 sm:$0xff]   ;;  %v1518_v5 = vld [vmem:[%s2166_s1 + $0x304] ss:$8 sps:$4 sm:$0xff]  }
  0x18   :  { %1024 = vmatpush1.bf16.msra.mxu0 %v1448_v23  ;;  %943 = vmatprep.subr.bf16.mxu1 %v1449_v24  ;;  %v1511_v8 = vld [vmem:[%s2166_s1 + $0x100] ss:$8 sps:$4 sm:$0xff]   ;;  %v1521_v10 = vld [vmem:[%s2166_s1 + $0x114] ss:$8 sps:$4 sm:$0xff]   ;;  %v1519_v12 = vld [vmem:[%s2166_s1 + $0x110] ss:$8 sps:$4 sm:$0xff]  }
  0x19   :  { %1025 = vmatprep.subr.bf16.mxu0 %v1451_v25  ;;  %v1516_v9 = vld [vmem:[%s2166_s1 + $0x300] ss:$8 sps:$4 sm:$0xff]   ;;  %v1524_v11 = vld [vmem:[%s2166_s1 + $0x314] ss:$8 sps:$4 sm:$0xff]   ;;  %v1522_v13 = vld [vmem:[%s2166_s1 + $0x310] ss:$8 sps:$4 sm:$0xff]  }
  0x1a   :  { %v1527_v14 = vld [vmem:[%s2166_s1 + $0x124] ss:$8 sps:$4 sm:$0xff]   ;;  %v1525_v16 = vld [vmem:[%s2166_s1 + $0x120] ss:$8 sps:$4 sm:$0xff]   ;;  %v1533_v18 = vld [vmem:[%s2166_s1 + $0x134] ss:$8 sps:$4 sm:$0xff]  }
  0x1b   :  { %944 = vmatpush1.bf16.msra.mxu1 %v1453_v26  ;;  %v1530_v15 = vld [vmem:[%s2166_s1 + $0x324] ss:$8 sps:$4 sm:$0xff]   ;;  %v1528_v17 = vld [vmem:[%s2166_s1 + $0x320] ss:$8 sps:$4 sm:$0xff]   ;;  %v1536_v19 = vld [vmem:[%s2166_s1 + $0x334] ss:$8 sps:$4 sm:$0xff]  }
  0x1c   :  { %1026 = vmatpush1.bf16.msra.mxu0 %v1454_v27  ;;  %945 = vmatprep.subr.bf16.mxu1 %v1455_v28  ;;  %v1531_v20 = vld [vmem:[%s2166_s1 + $0x130] ss:$8 sps:$4 sm:$0xff]   ;;  %v1539_v22 = vld [vmem:[%s2166_s1 + $0x144] ss:$8 sps:$4 sm:$0xff]   ;;  %v1537_v24 = vld [vmem:[%s2166_s1 + $0x140] ss:$8 sps:$4 sm:$0xff]  }
  0x1d   :  { %1027 = vmatprep.subr.bf16.mxu0 %v1457_v29  ;;  %v1534_v21 = vld [vmem:[%s2166_s1 + $0x330] ss:$8 sps:$4 sm:$0xff]   ;;  %v1542_v23 = vld [vmem:[%s2166_s1 + $0x344] ss:$8 sps:$4 sm:$0xff]   ;;  %v1540_v25 = vld [vmem:[%s2166_s1 + $0x340] ss:$8 sps:$4 sm:$0xff]  }
  0x1e   :  { %v1545_v26 = vld [vmem:[%s2166_s1 + $0x154] ss:$8 sps:$4 sm:$0xff]   ;;  %v1543_v28 = vld [vmem:[%s2166_s1 + $0x150] ss:$8 sps:$4 sm:$0xff]   ;;  %v1575_v50 = vld [vmem:[%s2166_s1 + $0x1a4] ss:$8 sps:$4 sm:$0xff]  }
  0x1f   :  { %946 = vmatpush1.bf16.msra.mxu1 %v1459_v30  ;;  %v1548_v27 = vld [vmem:[%s2166_s1 + $0x354] ss:$8 sps:$4 sm:$0xff]   ;;  %v1546_v29 = vld [vmem:[%s2166_s1 + $0x350] ss:$8 sps:$4 sm:$0xff]   ;;  %v1551_v30 = vld [vmem:[%s2166_s1 + $0x164] ss:$8 sps:$4 sm:$0xff]  }
  0x20   :  { %1028 = vmatpush1.bf16.msra.mxu0 %v1460_v31  ;;  %947 = vmatprep.subr.bf16.mxu1 %v1461_v32  ;;  %v1554_v31 = vld [vmem:[%s2166_s1 + $0x364] ss:$8 sps:$4 sm:$0xff]   ;;  %v1569_v46 = vld [vmem:[%s2166_s1 + $0x194] ss:$8 sps:$4 sm:$0xff]   ;;  %v1567_v48 = vld [vmem:[%s2166_s1 + $0x190] ss:$8 sps:$4 sm:$0xff]  }
  0x21   :  { %1029 = vmatprep.subr.bf16.mxu0 %v1463_v33  ;;  %v1950_v32 = vld [vmem:[%s2167_s0 + $0x8] sm:$0xff]  ;;  %v1955_v33 = vld [vmem:[%s2167_s0 + $0x18] sm:$0xff] }
  0x22   :  { %v1576_v53 = vld [vmem:[%s2166_s1 + $0x3a0] ss:$8 sps:$4 sm:$0xff]  }
  0x23   :  { %948 = vmatpush1.bf16.msra.mxu1 %v1465_v34  ;;  %v1549_v34 = vld [vmem:[%s2166_s1 + $0x160] ss:$8 sps:$4 sm:$0xff]  }
  0x24   :  { %1030 = vmatpush1.bf16.msra.mxu0 %v1466_v35  ;;  %949 = vmatprep.subr.bf16.mxu1 %v1467_v36  ;;  %v1552_v35 = vld [vmem:[%s2166_s1 + $0x360] ss:$8 sps:$4 sm:$0xff]   ;;  %v1242_v36 = vcombine.high %v1950_v32, %v1950_v32 }
  0x25   :  { %1031 = vmatprep.subr.bf16.mxu0 %v1469_v37  ;;  %v1246_v37 = vcombine.high %v1955_v33, %v1955_v33 }
  0x27   :  { %950 = vmatpush1.bf16.msra.mxu1 %v1471_v38  ;;  %v1557_v38 = vld [vmem:[%s2166_s1 + $0x174] ss:$8 sps:$4 sm:$0xff]  }
  0x28   :  { %1032 = vmatpush1.bf16.msra.mxu0 %v1472_v39  ;;  %951 = vmatprep.subr.bf16.mxu1 %v1473_v40  ;;  %v1560_v39 = vld [vmem:[%s2166_s1 + $0x374] ss:$8 sps:$4 sm:$0xff]   ;;  %v1555_v40 = vld [vmem:[%s2166_s1 + $0x170] ss:$8 sps:$4 sm:$0xff]  }
  0x29   :  { %1033 = vmatprep.subr.bf16.mxu0 %v1475_v41  ;;  %v1558_v41 = vld [vmem:[%s2166_s1 + $0x370] ss:$8 sps:$4 sm:$0xff]  }
  0x2b   :  { %952 = vmatpush1.bf16.msra.mxu1 %v1477_v42  ;;  %v1563_v42 = vld [vmem:[%s2166_s1 + $0x184] ss:$8 sps:$4 sm:$0xff]  }
  0x2c   :  { %1034 = vmatpush1.bf16.msra.mxu0 %v1478_v43  ;;  %953 = vmatprep.subr.bf16.mxu1 %v1479_v44  ;;  %v1566_v43 = vld [vmem:[%s2166_s1 + $0x384] ss:$8 sps:$4 sm:$0xff]   ;;  %v1561_v44 = vld [vmem:[%s2166_s1 + $0x180] ss:$8 sps:$4 sm:$0xff]  }
  0x2d   :  { %1035 = vmatprep.subr.bf16.mxu0 %v1481_v45  ;;  %v1564_v45 = vld [vmem:[%s2166_s1 + $0x380] ss:$8 sps:$4 sm:$0xff]  }
  0x2f   :  { %954 = vmatpush1.bf16.msra.mxu1 %v1483_v47  ;;  %v1572_v47 = vld [vmem:[%s2166_s1 + $0x394] ss:$8 sps:$4 sm:$0xff]  }
  0x30   :  { %1036 = vmatpush1.bf16.msra.mxu0 %v1484_v49  ;;  %955 = vmatprep.subr.bf16.mxu1 %v1485_v51  ;;  %v1570_v49 = vld [vmem:[%s2166_s1 + $0x390] ss:$8 sps:$4 sm:$0xff]   ;;  %v1578_v51 = vld [vmem:[%s2166_s1 + $0x3a4] ss:$8 sps:$4 sm:$0xff]  }
  0x31   :  { %1037 = vmatprep.subr.bf16.mxu0 %v1487_v52  ;;  %v1573_v52 = vld [vmem:[%s2166_s1 + $0x1a0] ss:$8 sps:$4 sm:$0xff]  }
  0x33   :  { %956 = vmatpush1.bf16.msra.mxu1 %v1489_v54  ;;  %v1581_v54 = vld [vmem:[%s2166_s1 + $0x1b4] ss:$8 sps:$4 sm:$0xff]  }
  0x34   :  { %1038 = vmatpush1.bf16.msra.mxu0 %v1490_v55  ;;  %957 = vmatprep.subr.bf16.mxu1 %v1491_v56  ;;  %v1584_v55 = vld [vmem:[%s2166_s1 + $0x3b4] ss:$8 sps:$4 sm:$0xff]   ;;  %v1579_v56 = vld [vmem:[%s2166_s1 + $0x1b0] ss:$8 sps:$4 sm:$0xff]  }
  0x35   :  { %1039 = vmatprep.subr.bf16.mxu0 %v1493_v57  ;;  %v1582_v57 = vld [vmem:[%s2166_s1 + $0x3b0] ss:$8 sps:$4 sm:$0xff]  }
  0x37   :  { %958 = vmatpush1.bf16.msra.mxu1 %v1495_v58  ;;  %v1587_v58 = vld [vmem:[%s2166_s1 + $0x1c4] ss:$8 sps:$4 sm:$0xff]  }
  0x38   :  { %1040 = vmatpush1.bf16.msra.mxu0 %v1496_v59  ;;  %959 = vmatprep.subr.bf16.mxu1 %v1497_v60  ;;  %v1590_v59 = vld [vmem:[%s2166_s1 + $0x3c4] ss:$8 sps:$4 sm:$0xff]   ;;  %v1585_v60 = vld [vmem:[%s2166_s1 + $0x1c0] ss:$8 sps:$4 sm:$0xff]  }
  0x39   :  { %1041 = vmatprep.subr.bf16.mxu0 %v1499_v61  ;;  %v1588_v61 = vld [vmem:[%s2166_s1 + $0x3c0] ss:$8 sps:$4 sm:$0xff]  }
  0x3b   :  { %960 = vmatpush1.bf16.msra.mxu1 %v1501_v62  ;;  %v1593_v62 = vld [vmem:[%s2166_s1 + $0x1d4] ss:$8 sps:$4 sm:$0xff]  }
  0x3c   :  { %1042 = vmatpush1.bf16.msra.mxu0 %v1502_v63  ;;  %961 = vmatprep.subr.bf16.mxu1 %v1503_v0  ;;  %v1596_v63 = vld [vmem:[%s2166_s1 + $0x3d4] ss:$8 sps:$4 sm:$0xff]   ;;  %v1591_v0 = vld [vmem:[%s2166_s1 + $0x1d0] ss:$8 sps:$4 sm:$0xff]  }
  0x3d   :  { %1043 = vmatprep.subr.bf16.mxu0 %v1505_v1  ;;  %v1594_v1 = vld [vmem:[%s2166_s1 + $0x3d0] ss:$8 sps:$4 sm:$0xff]  }
  0x3f   :  { %962 = vmatpush1.bf16.msra.mxu1 %v1507_v2  ;;  %v1599_v2 = vld [vmem:[%s2166_s1 + $0x1e4] ss:$8 sps:$4 sm:$0xff]  }
  0x40   :  { %1044 = vmatpush1.bf16.msra.mxu0 %v1508_v3  ;;  %972 = vmatprep.subr.bf16.mxu1 %v1513_v4  ;;  %v1602_v3 = vld [vmem:[%s2166_s1 + $0x3e4] ss:$8 sps:$4 sm:$0xff]   ;;  %v1597_v4 = vld [vmem:[%s2166_s1 + $0x1e0] ss:$8 sps:$4 sm:$0xff]  }
  0x41   :  { %1054 = vmatprep.subr.bf16.mxu0 %v1518_v5  ;;  %v1600_v5 = vld [vmem:[%s2166_s1 + $0x3e0] ss:$8 sps:$4 sm:$0xff]  }
  0x42   :  { %964 = vmatmul.mubr.bf16.vlgmr.msra.gmra.mrb[0].mxu1 %v1239_v6  ;;  %v1605_v6 = vld [vmem:[%s2166_s1 + $0x1f4] ss:$8 sps:$4 sm:$0xff]  }
  0x43   :  { %1046 = vmatmul.mubr.bf16.vlgmr.msra.gmra.mrb[0].mxu0 %v1243_v7  ;;  %973 = vmatpush1.bf16.msra.mxu1 %v1511_v8  ;;  %v1608_v7 = vld [vmem:[%s2166_s1 + $0x3f4] ss:$8 sps:$4 sm:$0xff]   ;;  %v1603_v8 = vld [vmem:[%s2166_s1 + $0x1f0] ss:$8 sps:$4 sm:$0xff]  }
  0x44   :  { %1055 = vmatpush1.bf16.msra.mxu0 %v1516_v9  ;;  %974 = vmatprep.subr.bf16.mxu1 %v1521_v10  ;;  %v1606_v9 = vld [vmem:[%s2166_s1 + $0x3f0] ss:$8 sps:$4 sm:$0xff]   ;;  %v1615_v10 = vld [vmem:[%s2166_s1 + $0x404] ss:$8 sps:$4 sm:$0xff]  }
  0x45   :  { %1056 = vmatprep.subr.bf16.mxu0 %v1524_v11  ;;  %1004 = vmatprep.mubr.bf16.mxu1 %v1242_v36  ;;  %v1241_v11 = vcombine.low %v1950_v32, %v1950_v32  ;;  %v1639_v32 = vmov 0.0  }
  0x46   :  { %1086 = vmatprep.mubr.bf16.mxu0 %v1246_v37 }
  0x47   :  { %975 = vmatpush1.bf16.msra.mxu1 %v1519_v12  ;;  %v1245_v12 = vcombine.low %v1955_v33, %v1955_v33 }
  0x48   :  { %1057 = vmatpush1.bf16.msra.mxu0 %v1522_v13  ;;  %976 = vmatprep.subr.bf16.mxu1 %v1527_v14  ;;  %v1613_v13 = vld [vmem:[%s2166_s1 + $0x400] ss:$8 sps:$4 sm:$0xff]   ;;  %v1618_v14 = vld [vmem:[%s2166_s1 + $0x414] ss:$8 sps:$4 sm:$0xff]  }
  0x49   :  { %1058 = vmatprep.subr.bf16.mxu0 %v1530_v15  ;;  %v1616_v15 = vld [vmem:[%s2166_s1 + $0x410] ss:$8 sps:$4 sm:$0xff]  }
  0x4b   :  { %977 = vmatpush1.bf16.msra.mxu1 %v1525_v16  ;;  %v1638_v16 = vmov 0  }
  0x4c   :  { %1059 = vmatpush1.bf16.msra.mxu0 %v1528_v17  ;;  %978 = vmatprep.subr.bf16.mxu1 %v1533_v18  ;;  %v1621_v17 = vld [vmem:[%s2166_s1 + $0x424] ss:$8 sps:$4 sm:$0xff]   ;;  %v1619_v18 = vld [vmem:[%s2166_s1 + $0x420] ss:$8 sps:$4 sm:$0xff]  }
  0x4d   :  { %1060 = vmatprep.subr.bf16.mxu0 %v1536_v19  ;;  %v1624_v19 = vld [vmem:[%s2166_s1 + $0x434] ss:$8 sps:$4 sm:$0xff]  }
  0x4f   :  { %979 = vmatpush1.bf16.msra.mxu1 %v1531_v20  ;;  %v1622_v20 = vld [vmem:[%s2166_s1 + $0x430] ss:$8 sps:$4 sm:$0xff]  }
  0x50   :  { %1061 = vmatpush1.bf16.msra.mxu0 %v1534_v21  ;;  %980 = vmatprep.subr.bf16.mxu1 %v1539_v22  ;;  %v1627_v21 = vld [vmem:[%s2166_s1 + $0x444] ss:$8 sps:$4 sm:$0xff]   ;;  %v1625_v22 = vld [vmem:[%s2166_s1 + $0x440] ss:$8 sps:$4 sm:$0xff]  }
  0x51   :  { %1062 = vmatprep.subr.bf16.mxu0 %v1542_v23  ;;  %v1630_v23 = vld [vmem:[%s2166_s1 + $0x454] ss:$8 sps:$4 sm:$0xff]  }
  0x53   :  { %981 = vmatpush1.bf16.msra.mxu1 %v1537_v24  ;;  %v1628_v24 = vld [vmem:[%s2166_s1 + $0x450] ss:$8 sps:$4 sm:$0xff]  }
  0x54   :  { %1063 = vmatpush1.bf16.msra.mxu0 %v1540_v25  ;;  %982 = vmatprep.subr.bf16.mxu1 %v1545_v26  ;;  %v1633_v25 = vld [vmem:[%s2166_s1 + $0x464] ss:$8 sps:$4 sm:$0xff]   ;;  %v1631_v26 = vld [vmem:[%s2166_s1 + $0x460] ss:$8 sps:$4 sm:$0xff]  }
  0x55   :  { %1064 = vmatprep.subr.bf16.mxu0 %v1548_v27  ;;  %v1636_v27 = vld [vmem:[%s2166_s1 + $0x474] ss:$8 sps:$4 sm:$0xff]  }
  0x57   :  { %983 = vmatpush1.bf16.msra.mxu1 %v1543_v28  ;;  %v1634_v28 = vld [vmem:[%s2166_s1 + $0x470] ss:$8 sps:$4 sm:$0xff]  }
  0x58   :  { %1065 = vmatpush1.bf16.msra.mxu0 %v1546_v29  ;;  %984 = vmatprep.subr.bf16.mxu1 %v1551_v30  ;;  %v1637_v29 = vld [vmem:[%s2167_s0 + $0x20] ss:$0 sps:$4 sm:$0xff]   ;;  %v169_v30 = vlaneseq }
  0x59   :  { %1066 = vmatprep.subr.bf16.mxu0 %v1554_v31 }
  0x5a   :  { %vm2130_vm0 = vcmp.lt.s32.totalorder %v169_v30, 256  ;;  %v170_v37 = vshrl.u32 %v169_v30, 7 }
  0x5b   :  { %985 = vmatpush1.bf16.msra.mxu1 %v1549_v34  ;;  %1153 = vst.msk [vmem:[%s2168_s4] sm:$0x3] %vm2130_vm0, %v1639_v32  ;;  %1154 = vst.msk [vmem:[%s2169_s5] sm:$0x3] %vm2130_vm0, %v1639_v32 }
  0x5c   :  { %1067 = vmatpush1.bf16.msra.mxu0 %v1552_v35  ;;  %986 = vmatprep.subr.bf16.mxu1 %v1557_v38  ;;  %v171_v38 = vsub.s32 0, %v170_v37 }
  0x5d   :  { %1068 = vmatprep.subr.bf16.mxu0 %v1560_v39  ;;  %v167_v39 = vld [vmem:[%s2170_s2] sm:$0x3] }
  0x5f   :  { %987 = vmatpush1.bf16.msra.mxu1 %v1555_v40  ;;  %v175_v40 = vsub.s32 1, %v170_v37 }
  0x60   :  { %1069 = vmatpush1.bf16.msra.mxu0 %v1558_v41  ;;  %988 = vmatprep.subr.bf16.mxu1 %v1563_v42  ;;  %v172_v41 = vrot.slane %v167_v39, %v171_v38 }
  0x61   :  { %1070 = vmatprep.subr.bf16.mxu0 %v1566_v43  ;;  %v176_v42 = vrot.slane %v167_v39, %v175_v40 }
  0x63   :  { %989 = vmatpush1.bf16.msra.mxu1 %v1561_v44 }
  0x64   :  { %1071 = vmatpush1.bf16.msra.mxu0 %v1564_v45  ;;  %990 = vmatprep.subr.bf16.mxu1 %v1569_v46 }
  0x65   :  { %1072 = vmatprep.subr.bf16.mxu0 %v1572_v47 }
  0x67   :  { %991 = vmatpush1.bf16.msra.mxu1 %v1567_v48 }
  0x68   :  { %1073 = vmatpush1.bf16.msra.mxu0 %v1570_v49  ;;  %992 = vmatprep.subr.bf16.mxu1 %v1575_v50 }
  0x69   :  { %1074 = vmatprep.subr.bf16.mxu0 %v1578_v51 }
  0x6b   :  { %993 = vmatpush1.bf16.msra.mxu1 %v1573_v52 }
  0x6c   :  { %1075 = vmatpush1.bf16.msra.mxu0 %v1576_v53  ;;  %994 = vmatprep.subr.bf16.mxu1 %v1581_v54 }
  0x6d   :  { %1076 = vmatprep.subr.bf16.mxu0 %v1584_v55 }
  0x6f   :  { %995 = vmatpush1.bf16.msra.mxu1 %v1579_v56 }
  0x70   :  { %1077 = vmatpush1.bf16.msra.mxu0 %v1582_v57  ;;  %996 = vmatprep.subr.bf16.mxu1 %v1587_v58  ;;  %v1640_v58 = vmov 1966171168  }
  0x71   :  { %1078 = vmatprep.subr.bf16.mxu0 %v1590_v59  ;;  %v1172_v59 = vunpack.c.l.s4 %v1640_v58 }
  0x73   :  { %997 = vmatpush1.bf16.msra.mxu1 %v1585_v60 }
  0x74   :  { %1079 = vmatpush1.bf16.msra.mxu0 %v1588_v61  ;;  %998 = vmatprep.subr.bf16.mxu1 %v1593_v62 }
  0x75   :  { %1080 = vmatprep.subr.bf16.mxu0 %v1596_v63 }
  0x77   :  { %999 = vmatpush1.bf16.msra.mxu1 %v1591_v0 }
  0x78   :  { %1081 = vmatpush1.bf16.msra.mxu0 %v1594_v1  ;;  %1000 = vmatprep.subr.bf16.mxu1 %v1599_v2 }
  0x79   :  { %1082 = vmatprep.subr.bf16.mxu0 %v1602_v3 }
  0x7b   :  { %1001 = vmatpush1.bf16.msra.mxu1 %v1597_v4  ;;  %v1173_v4 = vunpack.c.0.s8 %v1172_v59 }
  0x7c   :  { %1083 = vmatpush1.bf16.msra.mxu0 %v1600_v5  ;;  %1002 = vmatprep.subr.bf16.mxu1 %v1605_v6 }
  0x7d   :  { %1084 = vmatprep.subr.bf16.mxu0 %v1608_v7 }
  0x7f   :  { %1003 = vmatpush1.bf16.msra.mxu1 %v1603_v8 }
  0x80   :  { %1085 = vmatpush1.bf16.msra.mxu0 %v1606_v9 }
  0x81   :  { %1095 = vmatprep.subr.bf16.mxu0 %v1615_v10 }
  0x82   :  { %1005 = vmatmul.mubr.bf16.vlgmr.msra.gmra.mrb[0].mxu1 %v1241_v11 }
  0x83   :  { %1087 = vmatmul.mubr.bf16.vlgmr.msra.gmra.mrb[0].mxu0 %v1245_v12 }
  0x84   :  { %1096 = vmatpush1.bf16.msra.mxu0 %v1613_v13  ;;  %1127 = vmatprep.mubr.bf16.mxu0 %v1638_v16  ;;  %v1176_v13 = vsub.s32 %v1173_v4, %v170_v37 }
  0x85   :  { %1097 = vmatprep.subr.bf16.mxu0 %v1618_v14 }
  0x88   :  { %1098 = vmatpush1.bf16.msra.mxu0 %v1616_v15 }
  0x89   :  { %1099 = vmatprep.subr.bf16.mxu0 %v1621_v17 }
  0x8c   :  { %1100 = vmatpush1.bf16.msra.mxu0 %v1619_v18 }
  0x8d   :  { %1101 = vmatprep.subr.bf16.mxu0 %v1624_v19 }
  0x90   :  { %1102 = vmatpush1.bf16.msra.mxu0 %v1622_v20 }
  0x91   :  { %1103 = vmatprep.subr.bf16.mxu0 %v1627_v21  ;;  %v1155_v21 = vld [vmem:[%s2168_s4] sm:$0x3] }
  0x94   :  { %1104 = vmatpush1.bf16.msra.mxu0 %v1625_v22 }
  0x95   :  { %1105 = vmatprep.subr.bf16.mxu0 %v1630_v23 }
  0x98   :  { %1106 = vmatpush1.bf16.msra.mxu0 %v1628_v24  ;;  %v1192_v24 = vld [vmem:[%s2169_s5] sm:$0x3] }
  0x99   :  { %1107 = vmatprep.subr.bf16.mxu0 %v1633_v25 }
  0x9c   :  { %1108 = vmatpush1.bf16.msra.mxu0 %v1631_v26 }
  0x9d   :  { %1109 = vmatprep.subr.bf16.mxu0 %v1636_v27 }
  0xa0   :  { %1110 = vmatpush1.bf16.msra.mxu0 %v1634_v28 }
  0xa3   :  { %1128 = vmatmul.mubr.bf16.vlgmr.msra.gmra.mrb[0].mxu0 %v1637_v29 }
 0x155   :  { %v1006_v33 = vpop.f32.mrb[0].mxu1 }
 0x156   :  { %v1008_v34 = vpop.f32.mrb[1].mxu1  ;;  %v1394_v43 = vadd.f32 %v1006_v33, %v172_v41 }
 0x157   :  { %v1010_v35 = vpop.f32.mrb[2].mxu1  ;;  %v1396_v44 = vadd.f32 %v1008_v34, %v176_v42 }
 0x158   :  { %v1011_v36 = vpop.f32.mrb[3].mxu1 }
 0x176   :  { %v1129_v45 = vpop.f32.mrb[0].mxu0 }
 0x177   :  { %v1395_v46 = vadd.f32 %v1394_v43, %v1129_v45  ;;  %v1131_v47 = vpop.f32.mrb[1].mxu0 }
 0x178   :  { %v1397_v48 = vadd.f32 %v1396_v44, %v1131_v47  ;;  %v1133_v49 = vpop.f32.mrb[2].mxu0 }
 0x179   :  { %v1156_v50 = vrot.slane %v1395_v46, 4  ;;  %v1193_v51 = vmul.f32 %v1395_v46, %v1395_v46  ;;  %v1134_v52 = vpop.f32.mrb[3].mxu0 }
 0x17a   :  { %v1393_v53 = vpack.c.bf16 %v1397_v48, %v1395_v46  ;;  %v1162_v54 = vrot.slane %v1397_v48, 4  ;;  %v1194_v55 = vmul.f32 %v1397_v48, %v1397_v48 }
 0x17b   :  { %v1157_v56 = vadd.f32 %v1395_v46, %v1156_v50  ;;  %v1195_v57 = vrot.slane %v1193_v51, 4 }
 0x17c   :  { %1144 = vst [vmem:[%s2171_s3] sm:$0xff] %v1393_v53  ;;  %v1163_v60 = vadd.f32 %v1397_v48, %v1162_v54  ;;  %v1201_v61 = vrot.slane %v1194_v55, 4 }
 0x17d   :  { %v1158_v62 = vrot.slane %v1157_v56, 2  ;;  %v1196_v63 = vadd.f32 %v1195_v57, %v1193_v51 }
 0x17e   :  { %v1164_v0 = vrot.slane %v1163_v60, 2  ;;  %v1202_v1 = vadd.f32 %v1201_v61, %v1194_v55 }
 0x17f   :  { %v1159_v2 = vadd.f32 %v1158_v62, %v1157_v56  ;;  %v1197_v3 = vrot.slane %v1196_v63, 2 }
 0x180   :  { %v1165_v5 = vadd.f32 %v1164_v0, %v1163_v60  ;;  %v1203_v6 = vrot.slane %v1202_v1, 2 }
 0x181   :  { %v1160_v7 = vrot.slane %v1159_v2, 1  ;;  %v1198_v8 = vadd.f32 %v1197_v3, %v1196_v63 }
 0x182   :  { %v1166_v9 = vrot.slane %v1165_v5, 1  ;;  %v1204_v10 = vadd.f32 %v1203_v6, %v1202_v1 }
 0x183   :  { %v1161_v11 = vadd.f32 %v1160_v7, %v1159_v2  ;;  %v1199_v12 = vrot.slane %v1198_v8, 1 }
 0x184   :  { %v1167_v14 = vadd.f32 %v1166_v9, %v1165_v5  ;;  %v1205_v15 = vrot.slane %v1204_v10, 1 }
 0x185   :  { %v1200_v16 = vadd.f32 %v1199_v12, %v1198_v8 }
 0x186   :  { %v1170_v17 = vcombine.low %v1161_v11, %v1167_v14  ;;  %v1206_v18 = vadd.f32 %v1205_v15, %v1204_v10 }
 0x188   :  { %v1177_v19 = vrot.slane %v1170_v17, %v1176_v13  ;;  %v1209_v20 = vcombine.low %v1200_v16, %v1206_v18 }
 0x18a   :  { %v1184_v22 = vrot.slane %v1177_v19, %v1176_v13  ;;  %v1216_v23 = vrot.slane %v1209_v20, %v1176_v13 }
 0x18c   :  { %v1186_v25 = vadd.f32 %v1184_v22, %v1155_v21  ;;  %v1223_v26 = vrot.slane %v1216_v23, %v1176_v13 }
 0x18e   :  { %1191 = vst.msk [vmem:[%s2168_s4] sm:$0x3] %vm2130_vm0, %v1186_v25  ;;  %v1225_v27 = vadd.f32 %v1223_v26, %v1192_v24 }
 0x190   :  { %1226 = vst.msk [vmem:[%s2169_s5] sm:$0x3] %vm2130_vm0, %v1225_v27 }

</bundles_post_ra>
